<compile_context>
chip_gen: v6e
topology: v6e:2x2x1
jax: 0.10.0
libtpu: 0.0.40
codegen_flags: <defaults>
</compile_context>

<pallas_src>
import math
import functools

import jax
import jax.numpy as jnp
from jax import lax
from jax.experimental import pallas as pl
from jax.experimental.pallas import tpu as pltpu


# ----------------------------------------------------------------------------
# BlockSpec helpers
# ----------------------------------------------------------------------------
def _const_spec(shape):
    """Full-array block, same block for every layer (loaded once, stays resident)."""
    nd = len(shape)
    return pl.BlockSpec(shape, lambda l, _nd=nd: (0,) * _nd)


def _layer_spec(block_shape):
    """Per-layer weight block: leading (L, ...) axis indexed by the grid step."""
    nd = len(block_shape)
    return pl.BlockSpec(block_shape, lambda l, _nd=nd: (l,) + (0,) * (_nd - 1))


# ----------------------------------------------------------------------------
# Fused kernel: prologue (l==0) + encoder layer l + epilogue (l==L-1)
# ----------------------------------------------------------------------------
def _fused_transformer_kernel(
    batch_ref,      # (N*T, P)   f32   keypoints, flattened over (N, T)
    embw_ref,       # (P, D)     f32
    embb_ref,       # (1, D)     f32
    prolog_ref,     # (S, D)     f32   row0 = class_token + pe[0]; rows 1..T = pe[1:S]
    pad_ref,        # (N, S)     f32   1.0 = masked key
    inw_ref,        # (1, D, 3D) bf16  fused QKV projection (layer block)
    inb_ref,        # (1, 1, 3D) f32
    outw_ref,       # (1, D, D)  bf16
    outb_ref,       # (1, 1, D)  f32
    f1w_ref,        # (1, D, F)  bf16
    f1b_ref,        # (1, 1, F)  f32
    f2w_ref,        # (1, F, D)  bf16
    f2b_ref,        # (1, 1, D)  f32
    g1_ref, b1_ref, # (1, 1, D)  f32   LayerNorm 1
    g2_ref, b2_ref, # (1, 1, D)  f32   LayerNorm 2
    mlpw_ref,       # (D, A_pad) f32   classification head (zero-padded lanes)
    mlpb_ref,       # (1, A_pad) f32
    o_ref,          # (N, A_pad) f32   output (written on last layer only)
    x_scr,          # VMEM (N*S, D) f32  resident activations
    *, N, S, T, D, nhead,
):
    l = pl.program_id(0)
    head_dim = D // nhead
    scale = 1.0 / math.sqrt(head_dim)

    # ---------------- prologue: embedding + class token + positional encoding ----
    @pl.when(l == 0)
    def _():
        emb = (jnp.dot(batch_ref[...], embw_ref[...],
                       preferred_element_type=jnp.float32) + embb_ref[...])   # (N*T, D)
        prolog = prolog_ref[...]                                              # (S, D)
        for n in range(N):  # static, N is small
            x_scr[n * S:n * S + 1, :] = prolog[0:1, :]                        # class token + pe[0]
            x_scr[n * S + 1:n * S + 1 + T, :] = emb[n * T:(n + 1) * T, :] + prolog[1:S, :]
        o_ref[...] = jnp.zeros_like(o_ref)

    # ---------------- encoder layer l (post-norm, eval mode) ----------------------
    x2 = x_scr[...]                                   # (N*S, D) f32, resident
    xb = x2.astype(jnp.bfloat16)

    # fused QKV projection (bf16 x bf16 -> f32 MXU)
    qkv = (jnp.dot(xb, inw_ref[0], preferred_element_type=jnp.float32)
           + inb_ref[0])                              # (N*S, 3D) f32

    pad = pad_ref[...]                                # (N, S) f32
    w_out = outw_ref[0]                               # (D, D) bf16

    # multi-head self-attention; per-head result is folded straight into the
    # output projection (no lane-axis concatenate, no extra scratch slab).
    sa_rows = []
    for n in range(N):                                # static loops (N, nhead tiny)
        padn = pad[n:n + 1, :]                        # (1, S) -> broadcasts over queries
        acc_n = jnp.zeros((S, D), jnp.float32)
        for h in range(nhead):
            lo = h * head_dim
            qh = qkv[n * S:(n + 1) * S, lo:lo + head_dim]               # (S, hd)
            kh = qkv[n * S:(n + 1) * S, D + lo:D + lo + head_dim]       # (S, hd)
            vh = qkv[n * S:(n + 1) * S, 2 * D + lo:2 * D + lo + head_dim]
            s = lax.dot_general(qh, kh, (((1,), (1,)), ((), ())),
                                preferred_element_type=jnp.float32) * scale   # (S, S)
            # key padding mask: masked keys -> -1e30 (exp underflows to exactly 0)
            s = jnp.where(padn > 0.5, -1e30, s)
            m = jnp.max(s, axis=-1, keepdims=True)
            p = jnp.exp(s - m)
            p = p * pl.reciprocal(jnp.sum(p, axis=-1, keepdims=True), approx=True)
            oh = jnp.dot(p, vh, preferred_element_type=jnp.float32)     # (S, hd)
            # partial output projection for this head (== concat-then-project)
            acc_n = acc_n + jnp.dot(oh.astype(jnp.bfloat16),
                                    w_out[lo:lo + head_dim, :],
                                    preferred_element_type=jnp.float32)
        sa_rows.append(acc_n)
    sa = jnp.concatenate(sa_rows, axis=0) + outb_ref[0]                 # (N*S, D)

    # residual + LayerNorm 1 (eps = 1e-5, PyTorch default), all in f32
    z = x2 + sa
    mu = jnp.mean(z, axis=-1, keepdims=True)
    var = jnp.mean(jnp.square(z - mu), axis=-1, keepdims=True)
    y = (z - mu) * lax.rsqrt(var + 1e-5) * g1_ref[0] + b1_ref[0]

    # feed-forward (ReLU), bf16 weights, f32 accumulation
    h1 = (jnp.dot(y.astype(jnp.bfloat16), f1w_ref[0],
                  preferred_element_type=jnp.float32) + f1b_ref[0])
    h1 = jnp.maximum(h1, 0.0)
    ff = (jnp.dot(h1.astype(jnp.bfloat16), f2w_ref[0],
                  preferred_element_type=jnp.float32) + f2b_ref[0])

    # residual + LayerNorm 2
    z2 = y + ff
    mu2 = jnp.mean(z2, axis=-1, keepdims=True)
    var2 = jnp.mean(jnp.square(z2 - mu2), axis=-1, keepdims=True)
    xn = (z2 - mu2) * lax.rsqrt(var2 + 1e-5) * g2_ref[0] + b2_ref[0]

    x_scr[...] = xn                                   # activations stay in VMEM

    # ---------------- epilogue: classification head on the class token -----------
    @pl.when(l == pl.num_programs(0) - 1)
    def _():
        cls = jnp.concatenate([xn[n * S:n * S + 1, :] for n in range(N)], axis=0)  # (N, D)
        o_ref[...] = (jnp.dot(cls, mlpw_ref[...],
                              preferred_element_type=jnp.float32) + mlpb_ref[...])


# ----------------------------------------------------------------------------
# Parameters (deterministic synthetic init; weights stored as (in, out))
# ----------------------------------------------------------------------------
def make_positional_encoding(d_model, max_len):
    position = jnp.arange(max_len, dtype=jnp.float32)[:, None]
    div_term = jnp.exp(jnp.arange(0, d_model, 2, dtype=jnp.float32)
                       * (-math.log(10000.0) / d_model))
    pe = jnp.zeros((max_len, d_model), jnp.float32)
    pe = pe.at[:, 0::2].set(jnp.sin(position * div_term))
    pe = pe.at[:, 1::2].set(jnp.cos(position * div_term))
    return pe[None]  # (1, max_len, d_model)


def init_params(key, nhead, num_layers, d_keypoints, nb_actions,
                dim_ff=2048, max_len=64):
    d_model = 64 * nhead
    L = num_layers
    std = 0.02

    def dense(k, shape):
        return std * jax.random.normal(k, shape, jnp.float32)

    keys = jax.random.split(key, 12)
    return {
        "emb_w": dense(keys[0], (d_keypoints, d_model)),
        "emb_b": dense(keys[1], (d_model,)),
        "class_token": jnp.ones((1, d_model), jnp.float32),   # matches torch.ones init
        "pe": make_positional_encoding(d_model, max_len),
        "mlp_w": dense(keys[2], (d_model, nb_actions)),
        "mlp_b": dense(keys[3], (nb_actions,)),
        # per-layer weights pre-stacked over the layer axis L
        "in_w":  dense(keys[4],  (L, d_model, 3 * d_model)),
        "in_b":  dense(keys[5],  (L, 1, 3 * d_model)),
        "out_w": dense(keys[6],  (L, d_model, d_model)),
        "out_b": dense(keys[7],  (L, 1, d_model)),
        "ff1_w": dense(keys[8],  (L, d_model, dim_ff)),
        "ff1_b": dense(keys[9],  (L, 1, dim_ff)),
        "ff2_w": dense(keys[10], (L, dim_ff, d_model)),
        "ff2_b": dense(keys[11], (L, 1, d_model)),
        "ln1_g": jnp.ones((L, 1, d_model), jnp.float32),
        "ln1_b": jnp.zeros((L, 1, d_model), jnp.float32),
        "ln2_g": jnp.ones((L, 1, d_model), jnp.float32),
        "ln2_b": jnp.zeros((L, 1, d_model), jnp.float32),
    }


# ----------------------------------------------------------------------------
# Forward pass (eval mode: dropout = identity)
# ----------------------------------------------------------------------------
def action_transformer_forward(params, batch, batch_frames_valid, *, nhead):
    N, T, P = batch.shape
    D = params["emb_w"].shape[1]
    S = T + 1
    L = params["in_w"].shape[0]
    F = params["ff1_w"].shape[2]
    A = params["mlp_w"].shape[1]
    A_pad = ((A + 127) // 128) * 128

    # --- small host-side prep (runs once) ---
    # prologue additive term: row 0 = class_token + pe[0]; rows 1..T = pe[1:S]
    prolog = jnp.concatenate(
        [params["class_token"] + params["pe"][0, 0:1], params["pe"][0, 1:S]], axis=0)
    # key padding mask (1.0 = masked); class-token key is never masked
    pad = jnp.concatenate(
        [jnp.zeros((N, 1), jnp.float32),
         (~batch_frames_valid).astype(jnp.float32)], axis=1)          # (N, S)
    # pad the 4-wide classification head to a lane-dense 128-wide output
    mlp_w_pad = jnp.zeros((D, A_pad), jnp.float32).at[:, :A].set(params["mlp_w"])
    mlp_b_pad = jnp.zeros((1, A_pad), jnp.float32).at[:, :A].set(params["mlp_b"][None, :])
    # matmul weights streamed as bf16 (halves HBM weight traffic); biases/LN stay f32
    in_w = params["in_w"].astype(jnp.bfloat16)
    out_w = params["out_w"].astype(jnp.bfloat16)
    ff1_w = params["ff1_w"].astype(jnp.bfloat16)
    ff2_w = params["ff2_w"].astype(jnp.bfloat16)

    kernel = functools.partial(_fused_transformer_kernel,
                               N=N, S=S, T=T, D=D, nhead=nhead)

    out = pl.pallas_call(
        kernel,
        out_shape=jax.ShapeDtypeStruct((N, A_pad), jnp.float32),
        grid_spec=pltpu.PrefetchScalarGridSpec(
            num_scalar_prefetch=0,
            grid=(L,),
            in_specs=[
                _const_spec((N * T, P)),        # batch (flattened)
                _const_spec((P, D)),            # emb_w
                _const_spec((1, D)),            # emb_b
                _const_spec((S, D)),            # prolog (cls + positional encoding)
                _const_spec((N, S)),            # key padding mask
                _layer_spec((1, D, 3 * D)),     # in_w   (QKV)
                _layer_spec((1, 1, 3 * D)),     # in_b
                _layer_spec((1, D, D)),         # out_w
                _layer_spec((1, 1, D)),         # out_b
                _layer_spec((1, D, F)),         # ff1_w
                _layer_spec((1, 1, F)),         # ff1_b
                _layer_spec((1, F, D)),         # ff2_w
                _layer_spec((1, 1, D)),         # ff2_b
                _layer_spec((1, 1, D)),         # ln1_g
                _layer_spec((1, 1, D)),         # ln1_b
                _layer_spec((1, 1, D)),         # ln2_g
                _layer_spec((1, 1, D)),         # ln2_b
                _const_spec((D, A_pad)),        # mlp_w (padded)
                _const_spec((1, A_pad)),        # mlp_b (padded)
            ],
            out_specs=pl.BlockSpec((N, A_pad), lambda l: (0, 0)),  # resident across layers
            scratch_shapes=[pltpu.VMEM((N * S, D), jnp.float32)],  # resident activations
        ),
        compiler_params=pltpu.CompilerParams(
            dimension_semantics=("arbitrary",)),                    # layers are sequential
    )(batch.reshape(N * T, P),
      params["emb_w"], params["emb_b"].reshape(1, D), prolog, pad,
      in_w, params["in_b"], out_w, params["out_b"],
      ff1_w, params["ff1_b"], ff2_w, params["ff2_b"],
      params["ln1_g"], params["ln1_b"], params["ln2_g"], params["ln2_b"],
      mlp_w_pad, mlp_b_pad)

    return out[:, :A]


# ----------------------------------------------------------------------------
# Main
# ----------------------------------------------------------------------------
if __name__ == "__main__":
    NHEAD = 2
    NUM_LAYERS = 2
    D_KEYPOINTS = 17 * 2
    NB_ACTIONS = 4
    N, T = 2, 8                      # batch=2, frames=8 -> S=9 with class token

    key = jax.random.PRNGKey(0)
    k_param, k_batch, k_mask = jax.random.split(key, 3)

    params = init_params(k_param, NHEAD, NUM_LAYERS, D_KEYPOINTS, NB_ACTIONS)

    batch = jax.random.normal(k_batch, (N, T, D_KEYPOINTS), jnp.float32)
    batch_frames_valid = jax.random.bernoulli(k_mask, 0.75, (N, T))
    # guarantee at least one valid frame per instance
    batch_frames_valid = batch_frames_valid.at[:, 0].set(True)

    pred = action_transformer_forward(params, batch, batch_frames_valid, nhead=NHEAD)
    pred = jax.block_until_ready(pred)

    assert pred.shape == (N, NB_ACTIONS)
    assert bool(jnp.all(jnp.isfinite(pred)))
    print("KERNEL_OK")
</pallas_src>

<mosaic_0001>
module attributes {stable_mosaic.version = 11 : i64} {
  func.func @_fused_transformer_kernel(%arg0: i32, %arg1: memref<16x34xf32, #tpu.memory_space<vmem>>, %arg2: memref<34x128xf32, #tpu.memory_space<vmem>>, %arg3: memref<1x128xf32, #tpu.memory_space<vmem>>, %arg4: memref<9x128xf32, #tpu.memory_space<vmem>>, %arg5: memref<2x9xf32, #tpu.memory_space<vmem>>, %arg6: memref<1x128x384xbf16, #tpu.memory_space<vmem>>, %arg7: memref<1x1x384xf32, #tpu.memory_space<vmem>>, %arg8: memref<1x128x128xbf16, #tpu.memory_space<vmem>>, %arg9: memref<1x1x128xf32, #tpu.memory_space<vmem>>, %arg10: memref<1x128x2048xbf16, #tpu.memory_space<vmem>>, %arg11: memref<1x1x2048xf32, #tpu.memory_space<vmem>>, %arg12: memref<1x2048x128xbf16, #tpu.memory_space<vmem>>, %arg13: memref<1x1x128xf32, #tpu.memory_space<vmem>>, %arg14: memref<1x1x128xf32, #tpu.memory_space<vmem>>, %arg15: memref<1x1x128xf32, #tpu.memory_space<vmem>>, %arg16: memref<1x1x128xf32, #tpu.memory_space<vmem>>, %arg17: memref<1x1x128xf32, #tpu.memory_space<vmem>>, %arg18: memref<128x128xf32, #tpu.memory_space<vmem>>, %arg19: memref<1x128xf32, #tpu.memory_space<vmem>>, %arg20: memref<2x128xf32, #tpu.memory_space<vmem>>, %arg21: memref<18x128xf32, #tpu.memory_space<vmem>>) attributes {dimension_semantics = [#tpu.dimension_semantics<arbitrary>], iteration_bounds = array<i64: 2>, scalar_prefetch = 0 : i64, scratch_operands = 1 : i64, tpu.core_type = #tpu.core_type<tc>, window_params = [{pipeline_mode = #tpu.pipeline_mode<synchronous>, transform_indices = @transform_0, window_bounds = array<i64: 16, 34>}, {pipeline_mode = #tpu.pipeline_mode<synchronous>, transform_indices = @transform_1, window_bounds = array<i64: 34, 128>}, {pipeline_mode = #tpu.pipeline_mode<synchronous>, transform_indices = @transform_2, window_bounds = array<i64: 1, 128>}, {pipeline_mode = #tpu.pipeline_mode<synchronous>, transform_indices = @transform_3, window_bounds = array<i64: 9, 128>}, {pipeline_mode = #tpu.pipeline_mode<synchronous>, transform_indices = @transform_4, window_bounds = array<i64: 2, 9>}, {transform_indices = @transform_5, window_bounds = array<i64: 1, 128, 384>}, {transform_indices = @transform_6, window_bounds = array<i64: 1, 1, 384>}, {transform_indices = @transform_7, window_bounds = array<i64: 1, 128, 128>}, {transform_indices = @transform_8, window_bounds = array<i64: 1, 1, 128>}, {transform_indices = @transform_9, window_bounds = array<i64: 1, 128, 2048>}, {transform_indices = @transform_10, window_bounds = array<i64: 1, 1, 2048>}, {transform_indices = @transform_11, window_bounds = array<i64: 1, 2048, 128>}, {transform_indices = @transform_12, window_bounds = array<i64: 1, 1, 128>}, {transform_indices = @transform_13, window_bounds = array<i64: 1, 1, 128>}, {transform_indices = @transform_14, window_bounds = array<i64: 1, 1, 128>}, {transform_indices = @transform_15, window_bounds = array<i64: 1, 1, 128>}, {transform_indices = @transform_16, window_bounds = array<i64: 1, 1, 128>}, {pipeline_mode = #tpu.pipeline_mode<synchronous>, transform_indices = @transform_17, window_bounds = array<i64: 128, 128>}, {pipeline_mode = #tpu.pipeline_mode<synchronous>, transform_indices = @transform_18, window_bounds = array<i64: 1, 128>}, {pipeline_mode = #tpu.pipeline_mode<synchronous>, transform_indices = @transform_19, window_bounds = array<i64: 2, 128>}]} {
    %c0_i32 = arith.constant 0 : i32
    %0 = arith.cmpi eq, %arg0, %c0_i32 : i32
    %1 = arith.extui %0 : i1 to i32
    %c0_i32_0 = arith.constant 0 : i32
    %2 = arith.cmpi ne, %1, %c0_i32_0 : i32
    scf.if %2 {
      %c0_90 = arith.constant 0 : index
      %c0_91 = arith.constant 0 : index
      %208 = vector.load %arg1[%c0_90, %c0_91] : memref<16x34xf32, #tpu.memory_space<vmem>>, vector<16x34xf32>
      %c0_92 = arith.constant 0 : index
      %c0_93 = arith.constant 0 : index
      %209 = vector.load %arg2[%c0_92, %c0_93] : memref<34x128xf32, #tpu.memory_space<vmem>>, vector<34x128xf32>
      %cst_94 = arith.constant dense<0.000000e+00> : vector<16x128xf32>
      %210 = tpu.matmul %208, %209, %cst_94 {dimension_numbers = #tpu.dot_dimension_numbers<[1], [0], [0], [1], [0, 0, 1, 1], [], []>} : vector<16x34xf32>, vector<34x128xf32>, vector<16x128xf32> -> vector<16x128xf32>
      %c0_95 = arith.constant 0 : index
      %c0_96 = arith.constant 0 : index
      %211 = vector.load %arg3[%c0_95, %c0_96] : memref<1x128xf32, #tpu.memory_space<vmem>>, vector<1x128xf32>
      %212 = vector.broadcast %211 : vector<1x128xf32> to vector<16x128xf32>
      %213 = arith.addf %210, %212 : vector<16x128xf32>
      %c0_97 = arith.constant 0 : index
      %c0_98 = arith.constant 0 : index
      %214 = vector.load %arg4[%c0_97, %c0_98] : memref<9x128xf32, #tpu.memory_space<vmem>>, vector<9x128xf32>
      %215 = vector.extract_strided_slice %214 {offsets = [0, 0], sizes = [1, 128], strides = [1, 1]} : vector<9x128xf32> to vector<1x128xf32>
      %c0_99 = arith.constant 0 : index
      %c0_100 = arith.constant 0 : index
      %216 = vector.load %arg21[%c0_99, %c0_100] : memref<18x128xf32, #tpu.memory_space<vmem>>, vector<1x128xf32>
      tpu.vector_store %arg21[%c0_99, %c0_100], %215 {strides = array<i32>} : memref<18x128xf32, #tpu.memory_space<vmem>>, vector<1x128xf32>,
      %217 = vector.extract_strided_slice %213 {offsets = [0, 0], sizes = [8, 128], strides = [1, 1]} : vector<16x128xf32> to vector<8x128xf32>
      %218 = vector.extract_strided_slice %214 {offsets = [1, 0], sizes = [8, 128], strides = [1, 1]} : vector<9x128xf32> to vector<8x128xf32>
      %219 = arith.addf %217, %218 : vector<8x128xf32>
      %c1 = arith.constant 1 : index
      %c0_101 = arith.constant 0 : index
      %220 = vector.load %arg21[%c1, %c0_101] : memref<18x128xf32, #tpu.memory_space<vmem>>, vector<8x128xf32>
      tpu.vector_store %arg21[%c1, %c0_101], %219 {strides = array<i32>} : memref<18x128xf32, #tpu.memory_space<vmem>>, vector<8x128xf32>,
      %221 = vector.extract_strided_slice %214 {offsets = [0, 0], sizes = [1, 128], strides = [1, 1]} : vector<9x128xf32> to vector<1x128xf32>
      %c9 = arith.constant 9 : index
      %c0_102 = arith.constant 0 : index
      %222 = vector.load %arg21[%c9, %c0_102] : memref<18x128xf32, #tpu.memory_space<vmem>>, vector<1x128xf32>
      tpu.vector_store %arg21[%c9, %c0_102], %221 {strides = array<i32>} : memref<18x128xf32, #tpu.memory_space<vmem>>, vector<1x128xf32>,
      %223 = vector.extract_strided_slice %213 {offsets = [8, 0], sizes = [8, 128], strides = [1, 1]} : vector<16x128xf32> to vector<8x128xf32>
      %224 = vector.extract_strided_slice %214 {offsets = [1, 0], sizes = [8, 128], strides = [1, 1]} : vector<9x128xf32> to vector<8x128xf32>
      %225 = arith.addf %223, %224 : vector<8x128xf32>
      %c10 = arith.constant 10 : index
      %c0_103 = arith.constant 0 : index
      %226 = vector.load %arg21[%c10, %c0_103] : memref<18x128xf32, #tpu.memory_space<vmem>>, vector<8x128xf32>
      tpu.vector_store %arg21[%c10, %c0_103], %225 {strides = array<i32>} : memref<18x128xf32, #tpu.memory_space<vmem>>, vector<8x128xf32>,
      %cst_104 = arith.constant 0.000000e+00 : f32
      %227 = vector.broadcast %cst_104 : f32 to vector<2x128xf32>
      %c0_105 = arith.constant 0 : index
      %c0_106 = arith.constant 0 : index
      %228 = vector.load %arg20[%c0_105, %c0_106] : memref<2x128xf32, #tpu.memory_space<vmem>>, vector<2x128xf32>
      tpu.vector_store %arg20[%c0_105, %c0_106], %227 {strides = array<i32>} : memref<2x128xf32, #tpu.memory_space<vmem>>, vector<2x128xf32>,
    } else {
    }
    %c0 = arith.constant 0 : index
    %c0_1 = arith.constant 0 : index
    %3 = vector.load %arg21[%c0, %c0_1] : memref<18x128xf32, #tpu.memory_space<vmem>>, vector<18x128xf32>
    %4 = arith.truncf %3 : vector<18x128xf32> to vector<18x128xbf16>
    %c0_2 = arith.constant 0 : index
    %c0_3 = arith.constant 0 : index
    %c0_4 = arith.constant 0 : index
    %5 = vector.load %arg6[%c0_2, %c0_3, %c0_4] : memref<1x128x384xbf16, #tpu.memory_space<vmem>>, vector<1x128x384xbf16>
    %6 = vector.shape_cast %5 : vector<1x128x384xbf16> to vector<128x384xbf16>
    %cst = arith.constant dense<0.000000e+00> : vector<18x384xf32>
    %7 = tpu.matmul %4, %6, %cst {dimension_numbers = #tpu.dot_dimension_numbers<[1], [0], [0], [1], [0, 0, 1, 1], [], []>} : vector<18x128xbf16>, vector<128x384xbf16>, vector<18x384xf32> -> vector<18x384xf32>
    %c0_5 = arith.constant 0 : index
    %c0_6 = arith.constant 0 : index
    %c0_7 = arith.constant 0 : index
    %8 = vector.load %arg7[%c0_5, %c0_6, %c0_7] : memref<1x1x384xf32, #tpu.memory_space<vmem>>, vector<1x1x384xf32>
    %9 = vector.shape_cast %8 : vector<1x1x384xf32> to vector<1x384xf32>
    %10 = vector.broadcast %9 : vector<1x384xf32> to vector<18x384xf32>
    %11 = arith.addf %7, %10 : vector<18x384xf32>
    %c0_8 = arith.constant 0 : index
    %c0_9 = arith.constant 0 : index
    %12 = vector.load %arg5[%c0_8, %c0_9] : memref<2x9xf32, #tpu.memory_space<vmem>>, vector<2x9xf32>
    %c0_10 = arith.constant 0 : index
    %c0_11 = arith.constant 0 : index
    %c0_12 = arith.constant 0 : index
    %13 = vector.load %arg8[%c0_10, %c0_11, %c0_12] : memref<1x128x128xbf16, #tpu.memory_space<vmem>>, vector<1x128x128xbf16>
    %14 = vector.shape_cast %13 : vector<1x128x128xbf16> to vector<128x128xbf16>
    %15 = vector.extract_strided_slice %12 {offsets = [0, 0], sizes = [1, 9], strides = [1, 1]} : vector<2x9xf32> to vector<1x9xf32>
    %cst_13 = arith.constant 0.000000e+00 : f32
    %16 = vector.broadcast %cst_13 : f32 to vector<9x128xf32>
    %17 = vector.extract_strided_slice %11 {offsets = [0, 0], sizes = [9, 64], strides = [1, 1]} : vector<18x384xf32> to vector<9x64xf32>
    %18 = vector.extract_strided_slice %11 {offsets = [0, 128], sizes = [9, 64], strides = [1, 1]} : vector<18x384xf32> to vector<9x64xf32>
    %19 = vector.extract_strided_slice %11 {offsets = [0, 256], sizes = [9, 64], strides = [1, 1]} : vector<18x384xf32> to vector<9x64xf32>
    %cst_14 = arith.constant dense<0.000000e+00> : vector<9x9xf32>
    %20 = tpu.matmul %17, %18, %cst_14 {dimension_numbers = #tpu.dot_dimension_numbers<[1], [1], [0], [0], [0, 0, 1, 0], [], []>} : vector<9x64xf32>, vector<9x64xf32>, vector<9x9xf32> -> vector<9x9xf32>
    %cst_15 = arith.constant 1.250000e-01 : f32
    %21 = vector.broadcast %cst_15 : f32 to vector<9x9xf32>
    %22 = arith.mulf %20, %21 : vector<9x9xf32>
    %cst_16 = arith.constant 5.000000e-01 : f32
    %23 = vector.broadcast %cst_16 : f32 to vector<1x9xf32>
    %24 = arith.cmpf ogt, %15, %23 : vector<1x9xf32>
    %cst_17 = arith.constant -1.000000e+30 : f32
    %25 = vector.shape_cast %24 : vector<1x9xi1> to vector<1x9xi1>
    %26 = vector.broadcast %25 : vector<1x9xi1> to vector<9x9xi1>
    %27 = vector.broadcast %cst_17 : f32 to vector<9x9xf32>
    %28 = arith.select %26, %27, %22 : vector<9x9xi1>, vector<9x9xf32>
    %cst_18 = arith.constant dense<0xFF800000> : vector<9xf32>
    %29 = vector.multi_reduction <maximumf>, %28, %cst_18 [1] : vector<9x9xf32> to vector<9xf32>
    %30 = vector.shape_cast %29 : vector<9xf32> to vector<9x1xf32>
    %31 = vector.broadcast %30 : vector<9x1xf32> to vector<9x9xf32>
    %32 = arith.subf %28, %31 : vector<9x9xf32>
    %33 = math.exp %32 : vector<9x9xf32>
    %cst_19 = arith.constant dense<0.000000e+00> : vector<9xf32>
    %34 = vector.multi_reduction <add>, %33, %cst_19 [1] : vector<9x9xf32> to vector<9xf32>
    %35 = vector.shape_cast %34 : vector<9xf32> to vector<9x1xf32>
    %36 = tpu.reciprocal %35 {approx = true} : vector<9x1xf32> -> vector<9x1xf32>
    %37 = vector.broadcast %36 : vector<9x1xf32> to vector<9x9xf32>
    %38 = arith.mulf %33, %37 : vector<9x9xf32>
    %cst_20 = arith.constant dense<0.000000e+00> : vector<9x64xf32>
    %39 = tpu.matmul %38, %19, %cst_20 {dimension_numbers = #tpu.dot_dimension_numbers<[1], [0], [0], [1], [0, 0, 1, 1], [], []>} : vector<9x9xf32>, vector<9x64xf32>, vector<9x64xf32> -> vector<9x64xf32>
    %40 = arith.truncf %39 : vector<9x64xf32> to vector<9x64xbf16>
    %41 = vector.extract_strided_slice %14 {offsets = [0, 0], sizes = [64, 128], strides = [1, 1]} : vector<128x128xbf16> to vector<64x128xbf16>
    %cst_21 = arith.constant dense<0.000000e+00> : vector<9x128xf32>
    %42 = tpu.matmul %40, %41, %cst_21 {dimension_numbers = #tpu.dot_dimension_numbers<[1], [0], [0], [1], [0, 0, 1, 1], [], []>} : vector<9x64xbf16>, vector<64x128xbf16>, vector<9x128xf32> -> vector<9x128xf32>
    %43 = arith.addf %16, %42 : vector<9x128xf32>
    %44 = vector.extract_strided_slice %11 {offsets = [0, 64], sizes = [9, 64], strides = [1, 1]} : vector<18x384xf32> to vector<9x64xf32>
    %45 = vector.extract_strided_slice %11 {offsets = [0, 192], sizes = [9, 64], strides = [1, 1]} : vector<18x384xf32> to vector<9x64xf32>
    %46 = vector.extract_strided_slice %11 {offsets = [0, 320], sizes = [9, 64], strides = [1, 1]} : vector<18x384xf32> to vector<9x64xf32>
    %cst_22 = arith.constant dense<0.000000e+00> : vector<9x9xf32>
    %47 = tpu.matmul %44, %45, %cst_22 {dimension_numbers = #tpu.dot_dimension_numbers<[1], [1], [0], [0], [0, 0, 1, 0], [], []>} : vector<9x64xf32>, vector<9x64xf32>, vector<9x9xf32> -> vector<9x9xf32>
    %cst_23 = arith.constant 1.250000e-01 : f32
    %48 = vector.broadcast %cst_23 : f32 to vector<9x9xf32>
    %49 = arith.mulf %47, %48 : vector<9x9xf32>
    %cst_24 = arith.constant 5.000000e-01 : f32
    %50 = vector.broadcast %cst_24 : f32 to vector<1x9xf32>
    %51 = arith.cmpf ogt, %15, %50 : vector<1x9xf32>
    %cst_25 = arith.constant -1.000000e+30 : f32
    %52 = vector.shape_cast %51 : vector<1x9xi1> to vector<1x9xi1>
    %53 = vector.broadcast %52 : vector<1x9xi1> to vector<9x9xi1>
    %54 = vector.broadcast %cst_25 : f32 to vector<9x9xf32>
    %55 = arith.select %53, %54, %49 : vector<9x9xi1>, vector<9x9xf32>
    %cst_26 = arith.constant dense<0xFF800000> : vector<9xf32>
    %56 = vector.multi_reduction <maximumf>, %55, %cst_26 [1] : vector<9x9xf32> to vector<9xf32>
    %57 = vector.shape_cast %56 : vector<9xf32> to vector<9x1xf32>
    %58 = vector.broadcast %57 : vector<9x1xf32> to vector<9x9xf32>
    %59 = arith.subf %55, %58 : vector<9x9xf32>
    %60 = math.exp %59 : vector<9x9xf32>
    %cst_27 = arith.constant dense<0.000000e+00> : vector<9xf32>
    %61 = vector.multi_reduction <add>, %60, %cst_27 [1] : vector<9x9xf32> to vector<9xf32>
    %62 = vector.shape_cast %61 : vector<9xf32> to vector<9x1xf32>
    %63 = tpu.reciprocal %62 {approx = true} : vector<9x1xf32> -> vector<9x1xf32>
    %64 = vector.broadcast %63 : vector<9x1xf32> to vector<9x9xf32>
    %65 = arith.mulf %60, %64 : vector<9x9xf32>
    %cst_28 = arith.constant dense<0.000000e+00> : vector<9x64xf32>
    %66 = tpu.matmul %65, %46, %cst_28 {dimension_numbers = #tpu.dot_dimension_numbers<[1], [0], [0], [1], [0, 0, 1, 1], [], []>} : vector<9x9xf32>, vector<9x64xf32>, vector<9x64xf32> -> vector<9x64xf32>
    %67 = arith.truncf %66 : vector<9x64xf32> to vector<9x64xbf16>
    %68 = vector.extract_strided_slice %14 {offsets = [64, 0], sizes = [64, 128], strides = [1, 1]} : vector<128x128xbf16> to vector<64x128xbf16>
    %cst_29 = arith.constant dense<0.000000e+00> : vector<9x128xf32>
    %69 = tpu.matmul %67, %68, %cst_29 {dimension_numbers = #tpu.dot_dimension_numbers<[1], [0], [0], [1], [0, 0, 1, 1], [], []>} : vector<9x64xbf16>, vector<64x128xbf16>, vector<9x128xf32> -> vector<9x128xf32>
    %70 = arith.addf %43, %69 : vector<9x128xf32>
    %71 = vector.extract_strided_slice %12 {offsets = [1, 0], sizes = [1, 9], strides = [1, 1]} : vector<2x9xf32> to vector<1x9xf32>
    %cst_30 = arith.constant 0.000000e+00 : f32
    %72 = vector.broadcast %cst_30 : f32 to vector<9x128xf32>
    %73 = vector.extract_strided_slice %11 {offsets = [9, 0], sizes = [9, 64], strides = [1, 1]} : vector<18x384xf32> to vector<9x64xf32>
    %74 = vector.extract_strided_slice %11 {offsets = [9, 128], sizes = [9, 64], strides = [1, 1]} : vector<18x384xf32> to vector<9x64xf32>
    %75 = vector.extract_strided_slice %11 {offsets = [9, 256], sizes = [9, 64], strides = [1, 1]} : vector<18x384xf32> to vector<9x64xf32>
    %cst_31 = arith.constant dense<0.000000e+00> : vector<9x9xf32>
    %76 = tpu.matmul %73, %74, %cst_31 {dimension_numbers = #tpu.dot_dimension_numbers<[1], [1], [0], [0], [0, 0, 1, 0], [], []>} : vector<9x64xf32>, vector<9x64xf32>, vector<9x9xf32> -> vector<9x9xf32>
    %cst_32 = arith.constant 1.250000e-01 : f32
    %77 = vector.broadcast %cst_32 : f32 to vector<9x9xf32>
    %78 = arith.mulf %76, %77 : vector<9x9xf32>
    %cst_33 = arith.constant 5.000000e-01 : f32
    %79 = vector.broadcast %cst_33 : f32 to vector<1x9xf32>
    %80 = arith.cmpf ogt, %71, %79 : vector<1x9xf32>
    %cst_34 = arith.constant -1.000000e+30 : f32
    %81 = vector.shape_cast %80 : vector<1x9xi1> to vector<1x9xi1>
    %82 = vector.broadcast %81 : vector<1x9xi1> to vector<9x9xi1>
    %83 = vector.broadcast %cst_34 : f32 to vector<9x9xf32>
    %84 = arith.select %82, %83, %78 : vector<9x9xi1>, vector<9x9xf32>
    %cst_35 = arith.constant dense<0xFF800000> : vector<9xf32>
    %85 = vector.multi_reduction <maximumf>, %84, %cst_35 [1] : vector<9x9xf32> to vector<9xf32>
    %86 = vector.shape_cast %85 : vector<9xf32> to vector<9x1xf32>
    %87 = vector.broadcast %86 : vector<9x1xf32> to vector<9x9xf32>
    %88 = arith.subf %84, %87 : vector<9x9xf32>
    %89 = math.exp %88 : vector<9x9xf32>
    %cst_36 = arith.constant dense<0.000000e+00> : vector<9xf32>
    %90 = vector.multi_reduction <add>, %89, %cst_36 [1] : vector<9x9xf32> to vector<9xf32>
    %91 = vector.shape_cast %90 : vector<9xf32> to vector<9x1xf32>
    %92 = tpu.reciprocal %91 {approx = true} : vector<9x1xf32> -> vector<9x1xf32>
    %93 = vector.broadcast %92 : vector<9x1xf32> to vector<9x9xf32>
    %94 = arith.mulf %89, %93 : vector<9x9xf32>
    %cst_37 = arith.constant dense<0.000000e+00> : vector<9x64xf32>
    %95 = tpu.matmul %94, %75, %cst_37 {dimension_numbers = #tpu.dot_dimension_numbers<[1], [0], [0], [1], [0, 0, 1, 1], [], []>} : vector<9x9xf32>, vector<9x64xf32>, vector<9x64xf32> -> vector<9x64xf32>
    %96 = arith.truncf %95 : vector<9x64xf32> to vector<9x64xbf16>
    %97 = vector.extract_strided_slice %14 {offsets = [0, 0], sizes = [64, 128], strides = [1, 1]} : vector<128x128xbf16> to vector<64x128xbf16>
    %cst_38 = arith.constant dense<0.000000e+00> : vector<9x128xf32>
    %98 = tpu.matmul %96, %97, %cst_38 {dimension_numbers = #tpu.dot_dimension_numbers<[1], [0], [0], [1], [0, 0, 1, 1], [], []>} : vector<9x64xbf16>, vector<64x128xbf16>, vector<9x128xf32> -> vector<9x128xf32>
    %99 = arith.addf %72, %98 : vector<9x128xf32>
    %100 = vector.extract_strided_slice %11 {offsets = [9, 64], sizes = [9, 64], strides = [1, 1]} : vector<18x384xf32> to vector<9x64xf32>
    %101 = vector.extract_strided_slice %11 {offsets = [9, 192], sizes = [9, 64], strides = [1, 1]} : vector<18x384xf32> to vector<9x64xf32>
    %102 = vector.extract_strided_slice %11 {offsets = [9, 320], sizes = [9, 64], strides = [1, 1]} : vector<18x384xf32> to vector<9x64xf32>
    %cst_39 = arith.constant dense<0.000000e+00> : vector<9x9xf32>
    %103 = tpu.matmul %100, %101, %cst_39 {dimension_numbers = #tpu.dot_dimension_numbers<[1], [1], [0], [0], [0, 0, 1, 0], [], []>} : vector<9x64xf32>, vector<9x64xf32>, vector<9x9xf32> -> vector<9x9xf32>
    %cst_40 = arith.constant 1.250000e-01 : f32
    %104 = vector.broadcast %cst_40 : f32 to vector<9x9xf32>
    %105 = arith.mulf %103, %104 : vector<9x9xf32>
    %cst_41 = arith.constant 5.000000e-01 : f32
    %106 = vector.broadcast %cst_41 : f32 to vector<1x9xf32>
    %107 = arith.cmpf ogt, %71, %106 : vector<1x9xf32>
    %cst_42 = arith.constant -1.000000e+30 : f32
    %108 = vector.shape_cast %107 : vector<1x9xi1> to vector<1x9xi1>
    %109 = vector.broadcast %108 : vector<1x9xi1> to vector<9x9xi1>
    %110 = vector.broadcast %cst_42 : f32 to vector<9x9xf32>
    %111 = arith.select %109, %110, %105 : vector<9x9xi1>, vector<9x9xf32>
    %cst_43 = arith.constant dense<0xFF800000> : vector<9xf32>
    %112 = vector.multi_reduction <maximumf>, %111, %cst_43 [1] : vector<9x9xf32> to vector<9xf32>
    %113 = vector.shape_cast %112 : vector<9xf32> to vector<9x1xf32>
    %114 = vector.broadcast %113 : vector<9x1xf32> to vector<9x9xf32>
    %115 = arith.subf %111, %114 : vector<9x9xf32>
    %116 = math.exp %115 : vector<9x9xf32>
    %cst_44 = arith.constant dense<0.000000e+00> : vector<9xf32>
    %117 = vector.multi_reduction <add>, %116, %cst_44 [1] : vector<9x9xf32> to vector<9xf32>
    %118 = vector.shape_cast %117 : vector<9xf32> to vector<9x1xf32>
    %119 = tpu.reciprocal %118 {approx = true} : vector<9x1xf32> -> vector<9x1xf32>
    %120 = vector.broadcast %119 : vector<9x1xf32> to vector<9x9xf32>
    %121 = arith.mulf %116, %120 : vector<9x9xf32>
    %cst_45 = arith.constant dense<0.000000e+00> : vector<9x64xf32>
    %122 = tpu.matmul %121, %102, %cst_45 {dimension_numbers = #tpu.dot_dimension_numbers<[1], [0], [0], [1], [0, 0, 1, 1], [], []>} : vector<9x9xf32>, vector<9x64xf32>, vector<9x64xf32> -> vector<9x64xf32>
    %123 = arith.truncf %122 : vector<9x64xf32> to vector<9x64xbf16>
    %124 = vector.extract_strided_slice %14 {offsets = [64, 0], sizes = [64, 128], strides = [1, 1]} : vector<128x128xbf16> to vector<64x128xbf16>
    %cst_46 = arith.constant dense<0.000000e+00> : vector<9x128xf32>
    %125 = tpu.matmul %123, %124, %cst_46 {dimension_numbers = #tpu.dot_dimension_numbers<[1], [0], [0], [1], [0, 0, 1, 1], [], []>} : vector<9x64xbf16>, vector<64x128xbf16>, vector<9x128xf32> -> vector<9x128xf32>
    %126 = arith.addf %99, %125 : vector<9x128xf32>
    %127 = tpu.concatenate %70, %126 in 0 : vector<9x128xf32>, vector<9x128xf32> -> vector<18x128xf32>
    %c0_47 = arith.constant 0 : index
    %c0_48 = arith.constant 0 : index
    %c0_49 = arith.constant 0 : index
    %128 = vector.load %arg9[%c0_47, %c0_48, %c0_49] : memref<1x1x128xf32, #tpu.memory_space<vmem>>, vector<1x1x128xf32>
    %129 = vector.shape_cast %128 : vector<1x1x128xf32> to vector<1x128xf32>
    %130 = vector.broadcast %129 : vector<1x128xf32> to vector<18x128xf32>
    %131 = arith.addf %127, %130 : vector<18x128xf32>
    %132 = arith.addf %3, %131 : vector<18x128xf32>
    %cst_50 = arith.constant dense<0.000000e+00> : vector<18xf32>
    %133 = vector.multi_reduction <add>, %132, %cst_50 [1] : vector<18x128xf32> to vector<18xf32>
    %134 = vector.shape_cast %133 : vector<18xf32> to vector<18x1xf32>
    %cst_51 = arith.constant 1.280000e+02 : f32
    %135 = vector.broadcast %cst_51 : f32 to vector<18x1xf32>
    %136 = arith.divf %134, %135 : vector<18x1xf32>
    %137 = vector.broadcast %136 : vector<18x1xf32> to vector<18x128xf32>
    %138 = arith.subf %132, %137 : vector<18x128xf32>
    %139 = arith.mulf %138, %138 : vector<18x128xf32>
    %cst_52 = arith.constant dense<0.000000e+00> : vector<18xf32>
    %140 = vector.multi_reduction <add>, %139, %cst_52 [1] : vector<18x128xf32> to vector<18xf32>
    %141 = vector.shape_cast %140 : vector<18xf32> to vector<18x1xf32>
    %cst_53 = arith.constant 1.280000e+02 : f32
    %142 = vector.broadcast %cst_53 : f32 to vector<18x1xf32>
    %143 = arith.divf %141, %142 : vector<18x1xf32>
    %144 = vector.broadcast %136 : vector<18x1xf32> to vector<18x128xf32>
    %145 = arith.subf %132, %144 : vector<18x128xf32>
    %cst_54 = arith.constant 9.99999974E-6 : f32
    %146 = vector.broadcast %cst_54 : f32 to vector<18x1xf32>
    %147 = arith.addf %143, %146 : vector<18x1xf32>
    %148 = math.rsqrt %147 : vector<18x1xf32>
    %149 = vector.broadcast %148 : vector<18x1xf32> to vector<18x128xf32>
    %150 = arith.mulf %145, %149 : vector<18x128xf32>
    %c0_55 = arith.constant 0 : index
    %c0_56 = arith.constant 0 : index
    %c0_57 = arith.constant 0 : index
    %151 = vector.load %arg14[%c0_55, %c0_56, %c0_57] : memref<1x1x128xf32, #tpu.memory_space<vmem>>, vector<1x1x128xf32>
    %152 = vector.shape_cast %151 : vector<1x1x128xf32> to vector<1x128xf32>
    %153 = vector.broadcast %152 : vector<1x128xf32> to vector<18x128xf32>
    %154 = arith.mulf %150, %153 : vector<18x128xf32>
    %c0_58 = arith.constant 0 : index
    %c0_59 = arith.constant 0 : index
    %c0_60 = arith.constant 0 : index
    %155 = vector.load %arg15[%c0_58, %c0_59, %c0_60] : memref<1x1x128xf32, #tpu.memory_space<vmem>>, vector<1x1x128xf32>
    %156 = vector.shape_cast %155 : vector<1x1x128xf32> to vector<1x128xf32>
    %157 = vector.broadcast %156 : vector<1x128xf32> to vector<18x128xf32>
    %158 = arith.addf %154, %157 : vector<18x128xf32>
    %159 = arith.truncf %158 : vector<18x128xf32> to vector<18x128xbf16>
    %c0_61 = arith.constant 0 : index
    %c0_62 = arith.constant 0 : index
    %c0_63 = arith.constant 0 : index
    %160 = vector.load %arg10[%c0_61, %c0_62, %c0_63] : memref<1x128x2048xbf16, #tpu.memory_space<vmem>>, vector<1x128x2048xbf16>
    %161 = vector.shape_cast %160 : vector<1x128x2048xbf16> to vector<128x2048xbf16>
    %cst_64 = arith.constant dense<0.000000e+00> : vector<18x2048xf32>
    %162 = tpu.matmul %159, %161, %cst_64 {dimension_numbers = #tpu.dot_dimension_numbers<[1], [0], [0], [1], [0, 0, 1, 1], [], []>} : vector<18x128xbf16>, vector<128x2048xbf16>, vector<18x2048xf32> -> vector<18x2048xf32>
    %c0_65 = arith.constant 0 : index
    %c0_66 = arith.constant 0 : index
    %c0_67 = arith.constant 0 : index
    %163 = vector.load %arg11[%c0_65, %c0_66, %c0_67] : memref<1x1x2048xf32, #tpu.memory_space<vmem>>, vector<1x1x2048xf32>
    %164 = vector.shape_cast %163 : vector<1x1x2048xf32> to vector<1x2048xf32>
    %165 = vector.broadcast %164 : vector<1x2048xf32> to vector<18x2048xf32>
    %166 = arith.addf %162, %165 : vector<18x2048xf32>
    %cst_68 = arith.constant 0.000000e+00 : f32
    %167 = vector.broadcast %cst_68 : f32 to vector<18x2048xf32>
    %168 = arith.maximumf %166, %167 : vector<18x2048xf32>
    %169 = arith.truncf %168 : vector<18x2048xf32> to vector<18x2048xbf16>
    %c0_69 = arith.constant 0 : index
    %c0_70 = arith.constant 0 : index
    %c0_71 = arith.constant 0 : index
    %170 = vector.load %arg12[%c0_69, %c0_70, %c0_71] : memref<1x2048x128xbf16, #tpu.memory_space<vmem>>, vector<1x2048x128xbf16>
    %171 = vector.shape_cast %170 : vector<1x2048x128xbf16> to vector<2048x128xbf16>
    %cst_72 = arith.constant dense<0.000000e+00> : vector<18x128xf32>
    %172 = tpu.matmul %169, %171, %cst_72 {dimension_numbers = #tpu.dot_dimension_numbers<[1], [0], [0], [1], [0, 0, 1, 1], [], []>} : vector<18x2048xbf16>, vector<2048x128xbf16>, vector<18x128xf32> -> vector<18x128xf32>
    %c0_73 = arith.constant 0 : index
    %c0_74 = arith.constant 0 : index
    %c0_75 = arith.constant 0 : index
    %173 = vector.load %arg13[%c0_73, %c0_74, %c0_75] : memref<1x1x128xf32, #tpu.memory_space<vmem>>, vector<1x1x128xf32>
    %174 = vector.shape_cast %173 : vector<1x1x128xf32> to vector<1x128xf32>
    %175 = vector.broadcast %174 : vector<1x128xf32> to vector<18x128xf32>
    %176 = arith.addf %172, %175 : vector<18x128xf32>
    %177 = arith.addf %158, %176 : vector<18x128xf32>
    %cst_76 = arith.constant dense<0.000000e+00> : vector<18xf32>
    %178 = vector.multi_reduction <add>, %177, %cst_76 [1] : vector<18x128xf32> to vector<18xf32>
    %179 = vector.shape_cast %178 : vector<18xf32> to vector<18x1xf32>
    %cst_77 = arith.constant 1.280000e+02 : f32
    %180 = vector.broadcast %cst_77 : f32 to vector<18x1xf32>
    %181 = arith.divf %179, %180 : vector<18x1xf32>
    %182 = vector.broadcast %181 : vector<18x1xf32> to vector<18x128xf32>
    %183 = arith.subf %177, %182 : vector<18x128xf32>
    %184 = arith.mulf %183, %183 : vector<18x128xf32>
    %cst_78 = arith.constant dense<0.000000e+00> : vector<18xf32>
    %185 = vector.multi_reduction <add>, %184, %cst_78 [1] : vector<18x128xf32> to vector<18xf32>
    %186 = vector.shape_cast %185 : vector<18xf32> to vector<18x1xf32>
    %cst_79 = arith.constant 1.280000e+02 : f32
    %187 = vector.broadcast %cst_79 : f32 to vector<18x1xf32>
    %188 = arith.divf %186, %187 : vector<18x1xf32>
    %189 = vector.broadcast %181 : vector<18x1xf32> to vector<18x128xf32>
    %190 = arith.subf %177, %189 : vector<18x128xf32>
    %cst_80 = arith.constant 9.99999974E-6 : f32
    %191 = vector.broadcast %cst_80 : f32 to vector<18x1xf32>
    %192 = arith.addf %188, %191 : vector<18x1xf32>
    %193 = math.rsqrt %192 : vector<18x1xf32>
    %194 = vector.broadcast %193 : vector<18x1xf32> to vector<18x128xf32>
    %195 = arith.mulf %190, %194 : vector<18x128xf32>
    %c0_81 = arith.constant 0 : index
    %c0_82 = arith.constant 0 : index
    %c0_83 = arith.constant 0 : index
    %196 = vector.load %arg16[%c0_81, %c0_82, %c0_83] : memref<1x1x128xf32, #tpu.memory_space<vmem>>, vector<1x1x128xf32>
    %197 = vector.shape_cast %196 : vector<1x1x128xf32> to vector<1x128xf32>
    %198 = vector.broadcast %197 : vector<1x128xf32> to vector<18x128xf32>
    %199 = arith.mulf %195, %198 : vector<18x128xf32>
    %c0_84 = arith.constant 0 : index
    %c0_85 = arith.constant 0 : index
    %c0_86 = arith.constant 0 : index
    %200 = vector.load %arg17[%c0_84, %c0_85, %c0_86] : memref<1x1x128xf32, #tpu.memory_space<vmem>>, vector<1x1x128xf32>
    %201 = vector.shape_cast %200 : vector<1x1x128xf32> to vector<1x128xf32>
    %202 = vector.broadcast %201 : vector<1x128xf32> to vector<18x128xf32>
    %203 = arith.addf %199, %202 : vector<18x128xf32>
    %c0_87 = arith.constant 0 : index
    %c0_88 = arith.constant 0 : index
    %204 = vector.load %arg21[%c0_87, %c0_88] : memref<18x128xf32, #tpu.memory_space<vmem>>, vector<18x128xf32>
    tpu.vector_store %arg21[%c0_87, %c0_88], %203 {strides = array<i32>} : memref<18x128xf32, #tpu.memory_space<vmem>>, vector<18x128xf32>,
    %c1_i32 = arith.constant 1 : i32
    %205 = arith.cmpi eq, %arg0, %c1_i32 : i32
    %206 = arith.extui %205 : i1 to i32
    %c0_i32_89 = arith.constant 0 : i32
    %207 = arith.cmpi ne, %206, %c0_i32_89 : i32
    scf.if %207 {
      %208 = vector.extract_strided_slice %203 {offsets = [0, 0], sizes = [1, 128], strides = [1, 1]} : vector<18x128xf32> to vector<1x128xf32>
      %209 = vector.extract_strided_slice %203 {offsets = [9, 0], sizes = [1, 128], strides = [1, 1]} : vector<18x128xf32> to vector<1x128xf32>
      %210 = tpu.concatenate %208, %209 in 0 : vector<1x128xf32>, vector<1x128xf32> -> vector<2x128xf32>
      %c0_90 = arith.constant 0 : index
      %c0_91 = arith.constant 0 : index
      %211 = vector.load %arg18[%c0_90, %c0_91] : memref<128x128xf32, #tpu.memory_space<vmem>>, vector<128x128xf32>
      %cst_92 = arith.constant dense<0.000000e+00> : vector<2x128xf32>
      %212 = tpu.matmul %210, %211, %cst_92 {dimension_numbers = #tpu.dot_dimension_numbers<[1], [0], [0], [1], [0, 0, 1, 1], [], []>} : vector<2x128xf32>, vector<128x128xf32>, vector<2x128xf32> -> vector<2x128xf32>
      %c0_93 = arith.constant 0 : index
      %c0_94 = arith.constant 0 : index
      %213 = vector.load %arg19[%c0_93, %c0_94] : memref<1x128xf32, #tpu.memory_space<vmem>>, vector<1x128xf32>
      %214 = vector.broadcast %213 : vector<1x128xf32> to vector<2x128xf32>
      %215 = arith.addf %212, %214 : vector<2x128xf32>
      %c0_95 = arith.constant 0 : index
      %c0_96 = arith.constant 0 : index
      %216 = vector.load %arg20[%c0_95, %c0_96] : memref<2x128xf32, #tpu.memory_space<vmem>>, vector<2x128xf32>
      tpu.vector_store %arg20[%c0_95, %c0_96], %215 {strides = array<i32>} : memref<2x128xf32, #tpu.memory_space<vmem>>, vector<2x128xf32>,
    } else {
    }
    return
  }
  func.func @transform_0(%arg0: i32) -> (i32, i32) {
    %c0_i32 = arith.constant 0 : i32
    %c0_i32_0 = arith.constant 0 : i32
    %c0_i32_1 = arith.constant 0 : i32
    return %c0_i32, %c0_i32_0 : i32, i32
  }
  func.func @transform_1(%arg0: i32) -> (i32, i32) {
    %c0_i32 = arith.constant 0 : i32
    %c0_i32_0 = arith.constant 0 : i32
    %c0_i32_1 = arith.constant 0 : i32
    return %c0_i32, %c0_i32_0 : i32, i32
  }
  func.func @transform_2(%arg0: i32) -> (i32, i32) {
    %c0_i32 = arith.constant 0 : i32
    %c0_i32_0 = arith.constant 0 : i32
    %c0_i32_1 = arith.constant 0 : i32
    return %c0_i32, %c0_i32_0 : i32, i32
  }
  func.func @transform_3(%arg0: i32) -> (i32, i32) {
    %c0_i32 = arith.constant 0 : i32
    %c0_i32_0 = arith.constant 0 : i32
    %c0_i32_1 = arith.constant 0 : i32
    return %c0_i32, %c0_i32_0 : i32, i32
  }
  func.func @transform_4(%arg0: i32) -> (i32, i32) {
    %c0_i32 = arith.constant 0 : i32
    %c0_i32_0 = arith.constant 0 : i32
    %c0_i32_1 = arith.constant 0 : i32
    return %c0_i32, %c0_i32_0 : i32, i32
  }
  func.func @transform_5(%arg0: i32) -> (i32, i32, i32) {
    %c0_i32 = arith.constant 0 : i32
    %c0_i32_0 = arith.constant 0 : i32
    %c0_i32_1 = arith.constant 0 : i32
    return %arg0, %c0_i32, %c0_i32_0 : i32, i32, i32
  }
  func.func @transform_6(%arg0: i32) -> (i32, i32, i32) {
    %c0_i32 = arith.constant 0 : i32
    %c0_i32_0 = arith.constant 0 : i32
    %c0_i32_1 = arith.constant 0 : i32
    return %arg0, %c0_i32, %c0_i32_0 : i32, i32, i32
  }
  func.func @transform_7(%arg0: i32) -> (i32, i32, i32) {
    %c0_i32 = arith.constant 0 : i32
    %c0_i32_0 = arith.constant 0 : i32
    %c0_i32_1 = arith.constant 0 : i32
    return %arg0, %c0_i32, %c0_i32_0 : i32, i32, i32
  }
  func.func @transform_8(%arg0: i32) -> (i32, i32, i32) {
    %c0_i32 = arith.constant 0 : i32
    %c0_i32_0 = arith.constant 0 : i32
    %c0_i32_1 = arith.constant 0 : i32
    return %arg0, %c0_i32, %c0_i32_0 : i32, i32, i32
  }
  func.func @transform_9(%arg0: i32) -> (i32, i32, i32) {
    %c0_i32 = arith.constant 0 : i32
    %c0_i32_0 = arith.constant 0 : i32
    %c0_i32_1 = arith.constant 0 : i32
    return %arg0, %c0_i32, %c0_i32_0 : i32, i32, i32
  }
  func.func @transform_10(%arg0: i32) -> (i32, i32, i32) {
    %c0_i32 = arith.constant 0 : i32
    %c0_i32_0 = arith.constant 0 : i32
    %c0_i32_1 = arith.constant 0 : i32
    return %arg0, %c0_i32, %c0_i32_0 : i32, i32, i32
  }
  func.func @transform_11(%arg0: i32) -> (i32, i32, i32) {
    %c0_i32 = arith.constant 0 : i32
    %c0_i32_0 = arith.constant 0 : i32
    %c0_i32_1 = arith.constant 0 : i32
    return %arg0, %c0_i32, %c0_i32_0 : i32, i32, i32
  }
  func.func @transform_12(%arg0: i32) -> (i32, i32, i32) {
    %c0_i32 = arith.constant 0 : i32
    %c0_i32_0 = arith.constant 0 : i32
    %c0_i32_1 = arith.constant 0 : i32
    return %arg0, %c0_i32, %c0_i32_0 : i32, i32, i32
  }
  func.func @transform_13(%arg0: i32) -> (i32, i32, i32) {
    %c0_i32 = arith.constant 0 : i32
    %c0_i32_0 = arith.constant 0 : i32
    %c0_i32_1 = arith.constant 0 : i32
    return %arg0, %c0_i32, %c0_i32_0 : i32, i32, i32
  }
  func.func @transform_14(%arg0: i32) -> (i32, i32, i32) {
    %c0_i32 = arith.constant 0 : i32
    %c0_i32_0 = arith.constant 0 : i32
    %c0_i32_1 = arith.constant 0 : i32
    return %arg0, %c0_i32, %c0_i32_0 : i32, i32, i32
  }
  func.func @transform_15(%arg0: i32) -> (i32, i32, i32) {
    %c0_i32 = arith.constant 0 : i32
    %c0_i32_0 = arith.constant 0 : i32
    %c0_i32_1 = arith.constant 0 : i32
    return %arg0, %c0_i32, %c0_i32_0 : i32, i32, i32
  }
  func.func @transform_16(%arg0: i32) -> (i32, i32, i32) {
    %c0_i32 = arith.constant 0 : i32
    %c0_i32_0 = arith.constant 0 : i32
    %c0_i32_1 = arith.constant 0 : i32
    return %arg0, %c0_i32, %c0_i32_0 : i32, i32, i32
  }
  func.func @transform_17(%arg0: i32) -> (i32, i32) {
    %c0_i32 = arith.constant 0 : i32
    %c0_i32_0 = arith.constant 0 : i32
    %c0_i32_1 = arith.constant 0 : i32
    return %c0_i32, %c0_i32_0 : i32, i32
  }
  func.func @transform_18(%arg0: i32) -> (i32, i32) {
    %c0_i32 = arith.constant 0 : i32
    %c0_i32_0 = arith.constant 0 : i32
    %c0_i32_1 = arith.constant 0 : i32
    return %c0_i32, %c0_i32_0 : i32, i32
  }
  func.func @transform_19(%arg0: i32) -> (i32, i32) {
    %c0_i32 = arith.constant 0 : i32
    %c0_i32_0 = arith.constant 0 : i32
    %c0_i32_1 = arith.constant 0 : i32
    return %c0_i32, %c0_i32_0 : i32, i32
  }
}

</mosaic_0001>

<bundles_post_ra>
// kernel: tpu_custom_call.1
= control target key start
LH: loop header
LB: loop body
LE: loop exit
PB: predicated region body
PF: predicated region fallthrough
CT: control target
= control target key end

     0   :  { %s8379_s0 = inlined_call_operand.hbm [shape: f32[16,34], index: 0, kind: input, shape index: {}]   ;;  %s8380_s1 = inlined_call_operand.hbm [shape: f32[34,128], index: 1, kind: input, shape index: {}]   ;;  %s8381_s2 = inlined_call_operand.hbm [shape: f32[1,128], index: 2, kind: input, shape index: {}]   ;;  %s8382_s3 = inlined_call_operand.hbm [shape: f32[9,128], index: 3, kind: input, shape index: {}]   ;;  %s8383_s4 = inlined_call_operand.vmem [shape: f32[2,9], index: 4, kind: input, shape index: {}]   ;;  %s8384_s5 = inlined_call_operand.hbm [shape: bf16[2,128,384], index: 5, kind: input, shape index: {}]   ;;  %s8385_s6 = inlined_call_operand.vmem [shape: f32[2,1,384], index: 6, kind: input, shape index: {}]   ;;  %s8386_s7 = inlined_call_operand.hbm [shape: bf16[2,128,128], index: 7, kind: input, shape index: {}]   ;;  %s8387_s8 = inlined_call_operand.vmem [shape: f32[2,1,128], index: 8, kind: input, shape index: {}]   ;;  %s8388_s9 = inlined_call_operand.hbm [shape: bf16[2,128,2048], index: 9, kind: input, shape index: {}]   ;;  %s8389_s10 = inlined_call_operand.hbm [shape: f32[2,1,2048], index: 10, kind: input, shape index: {}]   ;;  %s8390_s11 = inlined_call_operand.hbm [shape: bf16[2,2048,128], index: 11, kind: input, shape index: {}]   ;;  %s8391_s12 = inlined_call_operand.vmem [shape: f32[2,1,128], index: 12, kind: input, shape index: {}]   ;;  %s8392_s13 = inlined_call_operand.vmem [shape: f32[2,1,128], index: 13, kind: input, shape index: {}]   ;;  %s8393_s14 = inlined_call_operand.vmem [shape: f32[2,1,128], index: 14, kind: input, shape index: {}]   ;;  %s8394_s15 = inlined_call_operand.vmem [shape: f32[2,1,128], index: 15, kind: input, shape index: {}]   ;;  %s8395_s16 = inlined_call_operand.vmem [shape: f32[2,1,128], index: 16, kind: input, shape index: {}]   ;;  %s8396_s17 = inlined_call_operand.hbm [shape: f32[128,128], index: 17, kind: input, shape index: {}]   ;;  %s8397_s18 = inlined_call_operand.vmem [shape: f32[1,128], index: 18, kind: input, shape index: {}]   ;;  %s8398_s19 = inlined_call_operand.hbm [shape: f32[2,128], index: 19, kind: output, shape index: {}]  }
   0x1   :  { %8421 = sst [smem:[#allocation29_spill]] %s8379_s0 }
   0x2   :  { %8422 = sst [smem:[#allocation30_spill]] %s8380_s1 }
   0x3   :  { %8423 = sst [smem:[#allocation31_spill]] %s8381_s2 }
   0x4   :  { %8424 = sst [smem:[#allocation32_spill]] %s8382_s3 }
   0x5   :  { %8425 = sst [smem:[#allocation33_spill]] %s8383_s4 }
   0x6   :  { %8426 = sst [smem:[#allocation34_spill]] %s8384_s5 }
   0x7   :  { %8427 = sst [smem:[#allocation35_spill]] %s8385_s6 }
   0x8   :  { %8428 = sst [smem:[#allocation36_spill]] %s8386_s7 }
   0x9   :  { %8429 = sst [smem:[#allocation37_spill]] %s8387_s8 }
   0xa   :  { %8430 = sst [smem:[#allocation38_spill]] %s8388_s9 }
   0xb   :  { %8431 = sst [smem:[#allocation39_spill]] %s8389_s10 }
   0xc   :  { %8432 = sst [smem:[#allocation40_spill]] %s8391_s12 }
   0xd   :  { %8433 = sst [smem:[#allocation41_spill]] %s8392_s13 }
   0xe   :  { %8434 = sst [smem:[#allocation42_spill]] %s8393_s14 }
   0xf   :  { %8435 = sst [smem:[#allocation43_spill]] %s8394_s15 }
  0x10   :  { %8436 = sst [smem:[#allocation44_spill]] %s8395_s16 }
  0x11   :  { %8437 = sst [smem:[#allocation45_spill]] %s8397_s18 }
  0x12   :  { %8438 = sst [smem:[#allocation46_spill]] %s8398_s19 }
  0x13   :  { %24 = vsyncpa [#allocation4], 0 }
  0x14   :  { %25 = vsyncpa [#allocation7], 0 }
  0x15   :  { %26 = vsyncpa [#allocation10], 0 }
  0x16   :  { %27 = vsyncpa [#allocation5], 0  ;;  %s7325_s0 = smov 0   ;;  %s7327_s30 = smov 0  }
  0x17   :  { %s7329_s20 = smov 0   ;;  %s7331_s21 = smov 0  }
  0x18 LB: > { %8439 = sst [smem:[#allocation24_spill]] %s7190_s30  ;;  %s7344_s1 = sadd.s32 4294967295, %s7198_s21   ;;  %s7198_s21 = sphi %s7331_s21, %s8504_s21   ;;  %s7194_s20 = sphi %s7329_s20, %s8507_s20   ;;  %s7190_s30 = sphi %s7327_s30, %s8506_s30   ;;  %s7186_s0 = sphi %s7325_s0, %s8505_s0  }
  0x19   : > { %8440 = sst [smem:[#allocation25_spill]] %s7194_s20  ;;  %p158_p0 = scmp.ne.s32.totalorder %s7190_s30, %s7186_s0 }
  0x1a   : > { %p8405_p1 = scmp.eq.s32.totalorder %s7344_s1, 0  ;;  %p5647_p2 = scmp.ge.s32.totalorder %s7198_s21, 1 }
  0x1b   : > { %p518_p3 = scmp.lt.s32.totalorder %s7198_s21, 3  ;;  %s7200_s23 = smov [#allocation3]  }
  0x1c   : > { %p7353_p5 = por %p8405_p1, %p158_p0  ;;  %s530_s24 = sshll.u32 %s7200_s23, 4  ;;  %s531_s24 = int_to_ptr.vmem [resolvable:$true] %s530_s24 }
  0x1d   : > { %p7357_p6 = pnand %p5647_p2, %p518_p3  ;;  %s7370_s3 = sadd.s32 1, %s7198_s21  }
  0x1e   : > { %s8441_s22 = scalar_select %p7353_p5, 1, 0 }
  0x1f   : > { %s8443_s2 = scalar_select %p7357_p6, 1, 0 }
  0x20   : > { %8442 = sst [smem:[#allocation26_spill]] %s8441_s22  ;;  %p6538_p7 = pneg %p7357_p6 }
  0x21   : > { %8445 = sst [smem:[#allocation27_spill]] %s7370_s3  ;;  %s145_s26 = sadd.s32 1, %s7194_s20 }
  0x22   : > { %p7365_p8 = pnand %p6538_p7, %p8405_p1  ;;  %s142_s27 = ssub.s32 %s7198_s21, %s7370_s3 }
  0x23   : > { %s6861_s29 = scalar_lea.vmem %s531_s24, 256  ;;  %p6869_p13 = scmp.lt.s32.totalorder %s531_s24, %s531_s24 }
  0x24   : > { %s8444_s25 = scalar_select %p7365_p8, 1, 0 }
  0x25   : > { %p7377_p9 = pneg %p7365_p8  ;;  %p6862_p10 = scmp.ne.s32.totalorder %s531_s24, %s6861_s29 }
  0x26   : > { %p6870_p0 = scmp.lt.s32.totalorder %s6861_s29, %s6861_s29 }
  0x27   : > { %s8446_s28 = scalar_select %p7377_p9, 1, 0 }
  0x28   : > { %p6864_p11 = pnand %p6862_p10, %p7377_p9  ;;  %p6871_p2 = por %p6870_p0, %p6869_p13 }
  0x2a   : > { %p6865_p12 = pneg %p6864_p11 }
  0x2c   : > { %p6872_p3 = pnand %p6871_p2, %p6865_p12 }
  0x2e   : > { %6875 = shalt.err (!%p6872_p3)
}
  0x2f   : > { %s8401_s0 = smov 128   ;;  %s8403_s23 = smov 8  }
  0x30   : > { %s8447_s19 = sld [smem:[#allocation29_spill]]  ;;  %p143_p7 = scmp.eq.s32.totalorder %s142_s27, 0 }
  0x31   : > { %p152_p10 = scmp.ne.s32.totalorder %s7194_s20, %s7190_s30  ;;  %p153_p11 = scmp.eq.s32.totalorder %s7198_s21, 0 }
  0x32   : > { %p6575_p12 = scmp.lt.s32.totalorder %s7198_s21, 2  ;;  %s600_s4 = sand.u32 1, %s7198_s21  }
  0x33   : > { %s7396_s18 = scalar_select %p143_p7, %s7194_s20, %s145_s26  }
  0x34   : > { %p154_p13 = por %p153_p11, %p152_p10  ;;  %s7400_s16 = sand.u32 1, %s7194_s20  }
  0x35   : > { %8448 = sst [smem:[#allocation28_spill]] %s7396_s18  ;;  %s6500_s15 = smul.u32 192, %s7400_s16 }
  0x36   : > { %6541 = dma.hbm_to_vmem [thread:$0]  (!%p7365_p8), %s8447_s19, 256, %s531_s24, [#allocation4], %s8401_s0, %s8401_s0, %s8403_s23  }
  0x37   : > { %p7403_p0 = pnand %p6575_p12, %p154_p13  ;;  %s6501_s6 = smul.u32 3072, %s7198_s21 }
  0x38   : > { %s8450_s5 = sld [smem:[#allocation34_spill]]  ;;  %s604_s26 = scalar_lea.vmem [#allocation11], %s6500_s15 }
  0x39   : > { %s611_s27 = sshll.u32 %s604_s26, 4  ;;  %s7415_s29 = scalar_lea.sflag [#allocation4], %s600_s4  ;;  %s7413_s27 = int_to_ptr.vmem [resolvable:$true] %s611_s27 }
  0x3a   : > { %p7421_p3 = pneg %p7403_p0 }
  0x3e   : > { %s7411_s24 = scalar_lea.hbm %s8450_s5, %s6501_s6  ;;  %s6881_s15 = scalar_lea.hbm %s8450_s5, 6144 }
  0x3f   : > { %s6876_s0 = scalar_lea.hbm %s7411_s24, 3072  ;;  %p6882_p11 = scmp.lt.s32.totalorder %s7411_s24, %s8450_s5 }
  0x40   : > { %p6877_p2 = scmp.ne.s32.totalorder %s7411_s24, %s6876_s0  ;;  %p6883_p12 = scmp.lt.s32.totalorder %s6881_s15, %s6876_s0 }
  0x42   : > { %p6879_p7 = pnand %p7421_p3, %p6877_p2  ;;  %p6884_p13 = por %p6883_p12, %p6882_p11 }
  0x44   : > { %p6880_p10 = pneg %p6879_p7 }
  0x46   : > { %p6885_p4 = pnand %p6884_p13, %p6880_p10 }
  0x48   : > { %6888 = shalt.err (!%p6885_p4)
}
  0x49   : > { %s6889_s4 = scalar_lea.vmem %s7413_s27, 3072  ;;  %s7203_s18 = smov [#allocation11]  }
  0x4a   : > { %p6890_p1 = scmp.ne.s32.totalorder %s7413_s27, %s6889_s4  ;;  %s6894_s6 = sshll.u32 %s7203_s18, 4  ;;  %s6895_s6 = int_to_ptr.vmem [resolvable:$false] %s6894_s6 }
  0x4b   : > { %s6896_s3 = scalar_lea.vmem %s6895_s6, 6144  ;;  %p6897_p5 = scmp.lt.s32.totalorder %s7413_s27, %s6895_s6 }
  0x4c   : > { %p6892_p2 = pnand %p6890_p1, %p7421_p3  ;;  %p6898_p6 = scmp.lt.s32.totalorder %s6896_s3, %s6889_s4 }
  0x4e   : > { %p6893_p7 = pneg %p6892_p2  ;;  %p6899_p8 = por %p6898_p6, %p6897_p5 }
  0x50   : > { %p6900_p9 = pnand %p6899_p8, %p6893_p7 }
  0x52   : > { %6903 = shalt.err (!%p6900_p9)
}
  0x53   : > { %s7204_s0 = smov 192   ;;  %s7205_s15 = smov 12  }
  0x54   : > { %6557 = dma.hbm_to_vmem [thread:$0]  (!%p7403_p0), %s7411_s24, 3072, %s7413_s27, %s7415_s29, %s7204_s0, %s7204_s0, %s7205_s15  }
  0x55   : > { %s5655_s19 = sshll.u32 %s7400_s16, 6  ;;  %s6014_s18 = sshll.u32 %s7198_s21, 10 }
  0x56   : > { %s8452_s7 = sld [smem:[#allocation36_spill]]  ;;  %s632_s6 = scalar_lea.vmem [#allocation12], %s5655_s19 }
  0x57   : > { %s639_s3 = sshll.u32 %s632_s6, 4  ;;  %s7451_s3 = int_to_ptr.vmem [resolvable:$true] %s639_s3 }
  0x5c   : > { %s7449_s4 = scalar_lea.hbm %s8452_s7, %s6014_s18  ;;  %s6909_s0 = scalar_lea.hbm %s8452_s7, 2048 }
  0x5d   : > { %s6904_s20 = scalar_lea.hbm %s7449_s4, 1024  ;;  %p6910_p6 = scmp.lt.s32.totalorder %s7449_s4, %s8452_s7 }
  0x5e   : > { %p6905_p1 = scmp.ne.s32.totalorder %s7449_s4, %s6904_s20  ;;  %p6911_p8 = scmp.lt.s32.totalorder %s6909_s0, %s6904_s20 }
  0x60   : > { %p6907_p4 = pnand %p6905_p1, %p7421_p3  ;;  %p6912_p9 = por %p6911_p8, %p6910_p6 }
  0x62   : > { %p6908_p5 = pneg %p6907_p4 }
  0x64   : > { %p6913_p10 = pnand %p6912_p9, %p6908_p5 }
  0x66   : > { %6916 = shalt.err (!%p6913_p10)
}
  0x67   : > { %s6917_s19 = scalar_lea.vmem %s7451_s3, 1024  ;;  %s7206_s18 = smov [#allocation12]  }
  0x68   : > { %p6918_p11 = scmp.ne.s32.totalorder %s7451_s3, %s6917_s19  ;;  %s6922_s26 = sshll.u32 %s7206_s18, 4  ;;  %s6923_s26 = int_to_ptr.vmem [resolvable:$false] %s6922_s26 }
  0x69   : > { %s6924_s6 = scalar_lea.vmem %s6923_s26, 2048  ;;  %p6925_p2 = scmp.lt.s32.totalorder %s7451_s3, %s6923_s26 }
  0x6a   : > { %p6920_p12 = pnand %p6918_p11, %p7421_p3  ;;  %p6926_p7 = scmp.lt.s32.totalorder %s6924_s6, %s6917_s19 }
  0x6c   : > { %p6921_p13 = pneg %p6920_p12  ;;  %p6927_p1 = por %p6926_p7, %p6925_p2 }
  0x6e   : > { %p6928_p4 = pnand %p6927_p1, %p6921_p13 }
  0x70   : > { %6931 = shalt.err (!%p6928_p4)
}
  0x71   : > { %s8414_s20 = smov 64   ;;  %s8413_s24 = smov 4  }
  0x72   : > { %6560 = dma.hbm_to_vmem [thread:$0]  (!%p7403_p0), %s7449_s4, 1024, %s7451_s3, %s7415_s29, %s8414_s20, %s8414_s20, %s8413_s24  }
  0x73   : > { %s8416_s27 = sshll.u32 %s7400_s16, 10  ;;  %s7209_s0 = smov [#allocation6]  }
  0x74   : > { %s543_s15 = sshll.u32 %s7209_s0, 4  ;;  %s8417_s5 = sshll.u32 %s7198_s21, 14  ;;  %s544_s15 = int_to_ptr.vmem [resolvable:$true] %s543_s15 }
  0x75   : > { %s6943_s19 = scalar_lea.vmem %s544_s15, 640  ;;  %p8453_p6 = scmp.ne.s32.totalorder %s8446_s28, 0 }
  0x76   : > { %p6944_p5 = scmp.ne.s32.totalorder %s544_s15, %s6943_s19  ;;  %p6951_p10 = scmp.lt.s32.totalorder %s544_s15, %s544_s15 }
  0x77   : > { %p6952_p11 = scmp.lt.s32.totalorder %s6943_s19, %s6943_s19 }
  0x78   : > { %p6946_p8 = pnand %p6944_p5, %p8453_p6 }
  0x79   : > { %p6953_p12 = por %p6952_p11, %p6951_p10 }
  0x7a   : > { %p6947_p9 = pneg %p6946_p8 }
  0x7c   : > { %p6954_p13 = pnand %p6953_p12, %p6947_p9 }
  0x7e   : > { %6957 = shalt.err (!%p6954_p13)
}
  0x7f   : > { %p8454_p2 = scmp.ne.s32.totalorder %s8444_s25, 0  ;;  %s8455_s18 = smov 8  }
  0x80   : > { %s8456_s26 = smov 128   ;;  %s8457_s6 = sld [smem:[#allocation30_spill]] }
  0x81   : > { %s8458_s9 = sld [smem:[#allocation38_spill]]  ;;  %s659_s20 = scalar_lea.vmem [#allocation13], %s8416_s27 }
  0x82   : > { %s666_s7 = sshll.u32 %s659_s20, 4  ;;  %s7498_s7 = int_to_ptr.vmem [resolvable:$true] %s666_s7 }
  0x86   : > { %6544 = dma.hbm_to_vmem [thread:$0]  (!%p8454_p2), %s8457_s6, 640, %s544_s15, [#allocation7], %s8456_s26, %s8456_s26, %s8455_s18  }
  0x87   : > { %s7494_s19 = scalar_lea.hbm %s8458_s9, %s8417_s5  ;;  %s6963_s3 = scalar_lea.hbm %s8458_s9, 32768 }
  0x88   : > { %s6958_s13 = scalar_lea.hbm %s7494_s19, 16384  ;;  %p6964_p5 = scmp.lt.s32.totalorder %s7494_s19, %s8458_s9 }
  0x89   : > { %p6959_p7 = scmp.ne.s32.totalorder %s7494_s19, %s6958_s13  ;;  %p6965_p8 = scmp.lt.s32.totalorder %s6963_s3, %s6958_s13 }
  0x8b   : > { %p6961_p1 = pnand %p6959_p7, %p7421_p3  ;;  %p6966_p9 = por %p6965_p8, %p6964_p5 }
  0x8d   : > { %p6962_p4 = pneg %p6961_p1 }
  0x8f   : > { %p6967_p10 = pnand %p6966_p9, %p6962_p4 }
  0x91   : > { %6970 = shalt.err (!%p6967_p10)
}
  0x92   : > { %s6971_s20 = scalar_lea.vmem %s7498_s7, 16384  ;;  %s7210_s0 = smov [#allocation13]  }
  0x93   : > { %p6972_p11 = scmp.ne.s32.totalorder %s7498_s7, %s6971_s20  ;;  %s6976_s15 = sshll.u32 %s7210_s0, 4  ;;  %s6977_s15 = int_to_ptr.vmem [resolvable:$false] %s6976_s15 }
  0x94   : > { %s6978_s4 = scalar_lea.vmem %s6977_s15, 32768  ;;  %p6979_p7 = scmp.lt.s32.totalorder %s7498_s7, %s6977_s15 }
  0x95   : > { %p6974_p12 = pnand %p6972_p11, %p7421_p3  ;;  %p6980_p1 = scmp.lt.s32.totalorder %s6978_s4, %s6971_s20 }
  0x97   : > { %p6975_p13 = pneg %p6974_p12  ;;  %p6981_p2 = por %p6980_p1, %p6979_p7 }
  0x99   : > { %p6982_p6 = pnand %p6981_p2, %p6975_p13 }
  0x9b   : > { %6985 = shalt.err (!%p6982_p6)
}
  0x9c   : > { %s7211_s13 = smov 1024   ;;  %s8459_s3 = smov 64  }
  0x9d   : > { %6563 = dma.hbm_to_vmem [thread:$0]  (!%p7403_p0), %s7494_s19, 16384, %s7498_s7, %s7415_s29, %s7211_s13, %s7211_s13, %s8459_s3  }
  0x9e   : > { %s5661_s24 = sshll.u32 %s7400_s16, 4  ;;  %s7212_s6 = smov [#allocation8]  }
  0x9f   : > { %s557_s0 = sshll.u32 %s7212_s6, 4  ;;  %s6016_s15 = sshll.u32 %s7198_s21, 8  ;;  %s558_s0 = int_to_ptr.vmem [resolvable:$true] %s557_s0 }
  0xa0   : > { %s6997_s20 = scalar_lea.vmem %s558_s0, 16  ;;  %p8460_p2 = scmp.ne.s32.totalorder %s8446_s28, 0 }
  0xa1   : > { %p6998_p4 = scmp.ne.s32.totalorder %s558_s0, %s6997_s20  ;;  %s7004_s4 = scalar_lea.vmem %s558_s0, 32 }
  0xa2   : > { %p7005_p8 = scmp.lt.s32.totalorder %s558_s0, %s558_s0  ;;  %p7006_p9 = scmp.lt.s32.totalorder %s7004_s4, %s6997_s20 }
  0xa3   : > { %p7000_p6 = pnand %p6998_p4, %p8460_p2 }
  0xa4   : > { %p7007_p10 = por %p7006_p9, %p7005_p8 }
  0xa5   : > { %p7001_p5 = pneg %p7000_p6 }
  0xa7   : > { %p7008_p11 = pnand %p7007_p10, %p7001_p5 }
  0xa9   : > { %7011 = shalt.err (!%p7008_p11)
}
  0xaa   : > { %p8461_p12 = scmp.ne.s32.totalorder %s8444_s25, 0  ;;  %s8462_s19 = sld [smem:[#allocation31_spill]] }
  0xab   : > { %s8463_s10 = sld [smem:[#allocation39_spill]]  ;;  %s680_s9 = scalar_lea.vmem [#allocation14], %s5661_s24 }
  0xac   : > { %s688_s12 = sshll.u32 %s680_s9, 4  ;;  %s689_s12 = int_to_ptr.vmem [resolvable:$true] %s688_s12 }
  0xb0   : > { %6547 = dma.hbm_to_vmem [thread:$0]  (!%p8461_p12), %s8462_s19, 16, %s558_s0, [#allocation7]  }
  0xb1   : > { %s686_s5 = scalar_lea.hbm %s8463_s10, %s6016_s15  ;;  %s7017_s22 = scalar_lea.hbm %s8463_s10, 512 }
  0xb2   : > { %s7012_s8 = scalar_lea.hbm %s686_s5, 256  ;;  %p7018_p4 = scmp.lt.s32.totalorder %s686_s5, %s8463_s10 }
  0xb3   : > { %p7013_p13 = scmp.ne.s32.totalorder %s686_s5, %s7012_s8  ;;  %p7019_p6 = scmp.lt.s32.totalorder %s7017_s22, %s7012_s8 }
  0xb5   : > { %p7015_p7 = pnand %p7013_p13, %p7421_p3  ;;  %p7020_p5 = por %p7019_p6, %p7018_p4 }
  0xb7   : > { %p7016_p1 = pneg %p7015_p7 }
  0xb9   : > { %p7021_p8 = pnand %p7020_p5, %p7016_p1 }
  0xbb   : > { %7024 = shalt.err (!%p7021_p8)
}
  0xbc   : > { %s7025_s24 = scalar_lea.vmem %s689_s12, 256  ;;  %s7213_s9 = smov [#allocation14]  }
  0xbd   : > { %p7026_p9 = scmp.ne.s32.totalorder %s689_s12, %s7025_s24  ;;  %s7030_s0 = sshll.u32 %s7213_s9, 4  ;;  %s7031_s0 = int_to_ptr.vmem [resolvable:$false] %s7030_s0 }
  0xbe   : > { %s7032_s15 = scalar_lea.vmem %s7031_s0, 512  ;;  %p7033_p13 = scmp.lt.s32.totalorder %s689_s12, %s7031_s0 }
  0xbf   : > { %p7028_p10 = pnand %p7026_p9, %p7421_p3  ;;  %p7034_p7 = scmp.lt.s32.totalorder %s7032_s15, %s7025_s24 }
  0xc1   : > { %p7029_p11 = pneg %p7028_p10  ;;  %p7035_p12 = por %p7034_p7, %p7033_p13 }
  0xc3   : > { %p7036_p2 = pnand %p7035_p12, %p7029_p11 }
  0xc5   : > { %7039 = shalt.err (!%p7036_p2)
}
  0xc6   : > { %6566 = dma.hbm_to_vmem [thread:$0]  (!%p7403_p0), %s686_s5, 256, %s689_s12, %s7415_s29  }
  0xc7   : > { %s7214_s8 = smov [#allocation9]   ;;  %s7215_s22 = smov [#allocation16]  }
  0xc8   : > { %s567_s30 = sshll.u32 %s7214_s8, 4  ;;  %s583_s7 = sshll.u32 %s7215_s22, 4  ;;  %s568_s30 = int_to_ptr.vmem [resolvable:$true] %s567_s30  ;;  %s584_s7 = int_to_ptr.vmem [resolvable:$true] %s583_s7 }
  0xc9   : > { %s7051_s19 = scalar_lea.vmem %s568_s30, 256  ;;  %p8464_p4 = scmp.ne.s32.totalorder %s8446_s28, 0 }
  0xca   : > { %p7052_p1 = scmp.ne.s32.totalorder %s568_s30, %s7051_s19  ;;  %p7059_p8 = scmp.lt.s32.totalorder %s568_s30, %s568_s30 }
  0xcb   : > { %p7060_p9 = scmp.lt.s32.totalorder %s7051_s19, %s7051_s19 }
  0xcc   : > { %p7054_p6 = pnand %p7052_p1, %p8464_p4 }
  0xcd   : > { %p7061_p10 = por %p7060_p9, %p7059_p8 }
  0xce   : > { %p7055_p5 = pneg %p7054_p6 }
  0xd0   : > { %p7062_p12 = pnand %p7061_p10, %p7055_p5 }
  0xd2   : > { %7065 = shalt.err (!%p7062_p12)
}
  0xd3   : > { %p8465_p2 = scmp.ne.s32.totalorder %s8444_s25, 0  ;;  %s8466_s13 = sld [smem:[#allocation32_spill]] }
  0xd4   : > { %s7077_s6 = scalar_lea.vmem %s584_s7, 2048  ;;  %p7085_p1 = scmp.lt.s32.totalorder %s584_s7, %s584_s7 }
  0xd5   : > { %p7078_p11 = scmp.ne.s32.totalorder %s584_s7, %s7077_s6  ;;  %p7086_p6 = scmp.lt.s32.totalorder %s7077_s6, %s7077_s6 }
  0xd7   : > { %p7080_p13 = pnand %p7078_p11, %p8464_p4  ;;  %p7087_p5 = por %p7086_p6, %p7085_p1 }
  0xd9   : > { %6550 = dma.hbm_to_vmem [thread:$0]  (!%p8465_p2), %s8466_s13, 256, %s568_s30, [#allocation10], %s8456_s26, %s8456_s26, %s8455_s18  }
  0xda   : > { %p7081_p7 = pneg %p7080_p13 }
  0xdc   : > { %p7088_p8 = pnand %p7087_p5, %p7081_p7 }
  0xde   : > { %7091 = shalt.err (!%p7088_p8)
}
  0xdf   : > { %6553 = dma.hbm_to_vmem [thread:$0]  (!%p8465_p2), %s8396_s17, 2048, %s584_s7, [#allocation7], %s8456_s26, %s8456_s26, %s8455_s18  }
  0xe0   : > { %s8467_s28 = sshll.u32 %s7198_s21, 14  ;;  %s8468_s0 = sshll.u32 %s7400_s16, 10 }
  0xe1   : > { %s7572_s9 = scalar_lea.hbm %s8390_s11, %s8467_s28  ;;  %s699_s25 = scalar_lea.vmem [#allocation15], %s8468_s0 }
  0xe2   : > { %s706_s15 = sshll.u32 %s699_s25, 4  ;;  %s7092_s8 = scalar_lea.hbm %s7572_s9, 16384  ;;  %s707_s15 = int_to_ptr.vmem [resolvable:$true] %s706_s15 }
  0xe3   : > { %p7093_p4 = scmp.ne.s32.totalorder %s7572_s9, %s7092_s8  ;;  %s7097_s21 = scalar_lea.hbm %s8390_s11, 32768 }
  0xe4   : > { %p7098_p12 = scmp.lt.s32.totalorder %s7572_s9, %s8390_s11  ;;  %p7099_p2 = scmp.lt.s32.totalorder %s7097_s21, %s7092_s8 }
  0xe5   : > { %p7095_p9 = pnand %p7093_p4, %p7421_p3 }
  0xe6   : > { %p7100_p11 = por %p7099_p2, %p7098_p12 }
  0xe7   : > { %p7096_p10 = pneg %p7095_p9 }
  0xe9   : > { %p7101_p13 = pnand %p7100_p11, %p7096_p10 }
  0xeb   : > { %7104 = shalt.err (!%p7101_p13)
}
  0xec   : > { %s7105_s16 = scalar_lea.vmem %s707_s15, 16384  ;;  %s7216_s7 = smov [#allocation15]  }
  0xed   : > { %p7106_p7 = scmp.ne.s32.totalorder %s707_s15, %s7105_s16  ;;  %s7110_s19 = sshll.u32 %s7216_s7, 4  ;;  %s7111_s19 = int_to_ptr.vmem [resolvable:$false] %s7110_s19 }
  0xee   : > { %s7112_s12 = scalar_lea.vmem %s7111_s19, 32768  ;;  %p7113_p5 = scmp.lt.s32.totalorder %s707_s15, %s7111_s19 }
  0xef   : > { %p7108_p1 = pnand %p7106_p7, %p7421_p3  ;;  %p7114_p8 = scmp.lt.s32.totalorder %s7112_s12, %s7105_s16 }
  0xf1   : > { %p7109_p6 = pneg %p7108_p1  ;;  %p7115_p4 = por %p7114_p8, %p7113_p5 }
  0xf3   : > { %p7116_p9 = pnand %p7115_p4, %p7109_p6 }
  0xf5   : > { %7119 = shalt.err (!%p7116_p9)
}
  0xf6   : > { %s8469_s5 = smov 4   ;;  %p8470_p3 = scmp.ne.s32.totalorder %s8443_s2, 0 }
  0xf7   : > { %6569 = dma.hbm_to_vmem [thread:$0]  (!%p7403_p0), %s7572_s9, 16384, %s707_s15, %s7415_s29, %s8459_s3, %s8459_s3, %s8469_s5  }
  0xf8   : > { %748 = sbr.rel (%p8470_p3) target bundleno = 3881 (0xf29), region = 96  ;;  %p8471_p10 = scmp.eq.s32.totalorder (!%p8470_p3), %s7344_s1, 0 }
  0xfd   : > { %7161 = dma.done.wait (%p8471_p10), [#allocation4], 256   ;;  %p8472_p12 = pmov %p8471_p10 }
  0xfe   : > { %p8473_p2 = pmov %p8471_p10 }
  0xff   : > { %7163 = vsyncadd (%p8472_p12), [#allocation4], 4294967040 }
 0x100   : > { %7165 = dma.done.wait (%p8473_p2), [#allocation7], 656   ;;  %p8474_p11 = pmov %p8473_p2 }
 0x101   : > { %p8475_p13 = pmov %p8473_p2 }
 0x102   : > { %7167 = vsyncadd (%p8474_p11), [#allocation7], 4294966640 }
 0x103   : > { %7169 = dma.done.wait (%p8475_p13), [#allocation10], 256   ;;  %p8476_p0 = pmov %p8473_p2 }
 0x104   : > { %s8477_s14 = sld [smem:[#allocation24_spill]]  ;;  %s766_s23 = sand.u32 1, %s7344_s1  }
 0x105   : > { %7171 = vsyncadd (%p8476_p0), [#allocation10], 4294967040  ;;  %s8478_s2 = sld [smem:[#allocation26_spill]]  ;;  %s767_s13 = scalar_lea.sflag [#allocation4], %s766_s23 }
 0x10a   : > { %s768_s29 = sand.u32 1, %s8477_s14  }
 0x10b   : > { %s6502_s3 = smul.u32 192, %s768_s29  ;;  %p8479_p7 = scmp.ne.s32.totalorder %s8478_s2, 0 }
 0x10d   : > { %s7612_s6 = scalar_lea.vmem [#allocation11], %s6502_s3 }
 0x10e   : > { %7173 = dma.done.wait (%p8479_p7), %s767_s13, 37120  }
 0x10f   : > { %7175 = vsyncadd (%p8479_p7), %s767_s13, 4294930176  ;;  %s5672_s20 = sshll.u32 %s768_s29, 6  ;;  %s5673_s4 = sshll.u32 %s768_s29, 10 }
 0x110   : > { %s5674_s28 = sshll.u32 %s768_s29, 4  ;;  %s7618_s27 = scalar_lea.vmem [#allocation12], %s5672_s20 }
 0x111   : > { %s7620_s24 = scalar_lea.vmem [#allocation13], %s5673_s4  ;;  %s7622_s9 = scalar_lea.vmem [#allocation14], %s5674_s28 }
 0x112   : > { %s7624_s0 = scalar_lea.vmem [#allocation15], %s5673_s4  ;;  %p8480_p1 = pmov %p8476_p0 }
 0x113   : > { %p8481_p6 = pmov %p8476_p0 }
 0x114   : > { %7177 = dma.done.wait (%p8480_p1), [#allocation7], 2048  }
 0x115   : > { %7179 = vsyncadd (%p8481_p6), [#allocation7], 4294965248  ;;  %p902_p5 = scmp.lt.s32.totalorder %s7344_s1, 1  ;;  %s8483_s16 = sld [smem:[#allocation40_spill]] }
 0x116   : > { %s8484_s5 = sld [smem:[#allocation41_spill]]  ;;  %p8489_p8 = scmp.ne.s32.totalorder %s7344_s1, 0 }
 0x117   : > { %s7632_s25 = scalar_select %p902_p5, %s7344_s1, 1 }
 0x118   : > { %s8485_s29 = sld [smem:[#allocation35_spill]] }
 0x119   : > { %s6503_s15 = smul.u32 3, %s7632_s25  ;;  %s8486_s4 = sld [smem:[#allocation42_spill]] }
 0x11a   : > { %s8487_s30 = sld [smem:[#allocation43_spill]] }
 0x11b   : > { %s911_s7 = scalar_lea.vmem %s8483_s16, %s7632_s25  ;;  %s8488_s22 = sld [smem:[#allocation44_spill]] }
 0x11c   : > { %s914_s14 = scalar_lea.vmem %s8484_s5, %s7632_s25 }
 0x11d   : > { %928 = sbr.rel (%p8489_p8) target bundleno = 501 (0x1f5), region = 140 }
 0x11e   : > { %s7650_s3 = scalar_lea.vmem %s8485_s29, %s6503_s15 }
 0x11f   : > { %s917_s28 = scalar_lea.vmem %s8486_s4, %s7632_s25 }
 0x120   : > { %s920_s18 = scalar_lea.vmem %s8487_s30, %s7632_s25 }
 0x121   : > { %s923_s16 = scalar_lea.vmem %s8488_s22, %s7632_s25 }
 0x122   : > { %v935_v0 = vld [vmem:[#allocation6 + $0x20] sm:$0x3]  ;;  %vm950_vm0 = vcmask 1041408   ;;  %v934_v1 = vld [vmem:[#allocation6 + $0x18] sm:$0xff]  ;;  %vm943_vm1 = vcmask 277504   ;;  %v929_v2 = vld [vmem:[#allocation3] sm:$0xff] }
 0x123   : > { %6328 = vmatprep.subr.msk.mxu0 %vm950_vm0, %v935_v0  ;;  %v933_v3 = vld [vmem:[#allocation6 + $0x10] sm:$0xff]  ;;  %6338 = vmatprep.mubr.msk.f32.mxu0 %vm943_vm1, %v929_v2  ;;  %v932_v4 = vld [vmem:[#allocation6 + $0x8] sm:$0xff]  ;;  %v931_v5 = vld [vmem:[#allocation6] sm:$0xff]  ;;  %v7217_v8 = vmov 0.0   ;;  %vm1034_vm2 = vcmask 1046528  }
 0x124   : > { %6329 = vmatpush3.msk.msra.mxu0 %vm950_vm0, %v935_v0  ;;  %v930_v6 = vld [vmem:[#allocation3 + $0x8] sm:$0xff]  ;;  %v1029_v7 = vld [vmem:[#allocation9] sm:$0xff]  ;;  %1044 = vst [vmem:[#allocation17] sm:$0x3] %v7217_v8  ;;  %v1030_v9 = vld [vmem:[#allocation9 + $0x8] sm:$0x1] }
 0x125   : > { %6330 = vmatprep.subr.mxu0 %v934_v1  ;;  %1031 = vst [vmem:[#allocation2] sm:$0x1] %v1029_v7  ;;  %1041 = vst [vmem:[#allocation2 + $0x9] sm:$0x1] %v1029_v7  ;;  %v1035_v10 = vrot.slane %v1029_v7, 1  ;;  %v1036_v11 = vrot.slane %v1030_v9, 1 }
 0x126   : > { %6331 = vmatpush3.msra.mxu0 %v934_v1  ;;  %v5678_v12 = vld [vmem:[#allocation8] ss:$0 sm:$0xff] }
 0x127   : > { %6332 = vmatprep.subr.mxu0 %v933_v3  ;;  %v1037_v14 = vsel %vm1034_vm2, %v1035_v10, %v1036_v11 }
 0x128   : > { %6333 = vmatpush3.msra.mxu0 %v933_v3 }
 0x129   : > { %6334 = vmatprep.subr.mxu0 %v932_v4 }
 0x12a   : > { %6335 = vmatpush3.msra.mxu0 %v932_v4 }
 0x12b   : > { %6336 = vmatprep.subr.mxu0 %v931_v5 }
 0x12c   : > { %6337 = vmatpush3.msra.mxu0 %v931_v5 }
 0x12d   : > { %6339 = vmatmul.mubr.msk.f32.vlgmr.msra.gmra.mxu0 %vm943_vm1, %v930_v6 }
 0x1ed   : > { %v6340_v13 = vpop.f32.mrf.mxu0 }
 0x1ee   : > { %v1026_v15 = vadd.f32 %v6340_v13, %v5678_v12 }
 0x1ef   : > { %v1020_v16 = vpop.f32.mrf.mxu0 }
 0x1f0   : > { %v1042_v17 = vadd.f32 %v1037_v14, %v1026_v15  ;;  %v1021_v18 = vadd.f32 %v5678_v12, %v1020_v16 }
 0x1f2   : > { %1043 = vst [vmem:[#allocation2 + $0xa] sm:$0xff] %v1042_v17  ;;  %v1039_v19 = vadd.f32 %v1037_v14, %v1021_v18 }
 0x1f4   : > { %1040 = vst [vmem:[#allocation2 + $0x1] sm:$0xff] %v1039_v19 }
 0x1f5 PF: > { %v6635_v20 = vld [vmem:[%s7612_s6 + $0xac] ss:$12 sps:$4 sm:$0xff]   ;;  %v6637_v21 = vld [vmem:[%s7612_s6 + $0xa8] ss:$12 sps:$4 sm:$0xff]   ;;  %v7218_v22 = vmov 0   ;;  %v1084_v50 = vlaneseq  ;;  %vm1343_vm3 = vcmask 523264  }
 0x1f6   : > { %1259 = vmatprep.mubr.bf16.mxu0 %v7218_v22  ;;  %1227 = vmatprep.subr.bf16.mxu0 %v6635_v20  ;;  %v6638_v23 = vld [vmem:[%s7612_s6 + $0x94] ss:$12 sps:$4 sm:$0xff]   ;;  %v6640_v24 = vld [vmem:[%s7612_s6 + $0x90] ss:$12 sps:$4 sm:$0xff]   ;;  %v6643_v26 = vld [vmem:[%s7612_s6 + $0x78] ss:$12 sps:$4 sm:$0xff]  }
 0x1f7   : > { %1228 = vmatpush1.bf16.msra.mxu0 %v6637_v21  ;;  %v6641_v25 = vld [vmem:[%s7612_s6 + $0x7c] ss:$12 sps:$4 sm:$0xff]   ;;  %v6644_v27 = vld [vmem:[%s7612_s6 + $0x64] ss:$12 sps:$4 sm:$0xff]   ;;  %v6646_v28 = vld [vmem:[%s7612_s6 + $0x60] ss:$12 sps:$4 sm:$0xff]  }
 0x1f8   : > { %1229 = vmatprep.subr.bf16.mxu0 %v6638_v23  ;;  %v6647_v30 = vld [vmem:[%s7612_s6 + $0x4c] ss:$12 sps:$4 sm:$0xff]   ;;  %v6659_v33 = vld [vmem:[%s7612_s6 + $0xb0] ss:$12 sps:$4 sm:$0xff]   ;;  %v6649_v35 = vld [vmem:[%s7612_s6 + $0x48] ss:$12 sps:$4 sm:$0xff]  }
 0x1f9   : > { %v6660_v34 = vld [vmem:[%s7612_s6 + $0x98] ss:$12 sps:$4 sm:$0xff]   ;;  %6341 = vmatprep.subr.bf16.mxu1 %v6659_v33  ;;  %v6650_v36 = vld [vmem:[%s7612_s6 + $0x34] ss:$12 sps:$4 sm:$0xff]   ;;  %v6652_v38 = vld [vmem:[%s7612_s6 + $0x30] ss:$12 sps:$4 sm:$0xff]  }
 0x1fa   : > { %6342 = vmatpush3.bf16.msra.mxu1 %v6659_v33  ;;  %v6661_v37 = vld [vmem:[%s7612_s6 + $0x80] ss:$12 sps:$4 sm:$0xff]   ;;  %v6653_v39 = vld [vmem:[%s7612_s6 + $0x1c] ss:$12 sps:$4 sm:$0xff]   ;;  %v6655_v41 = vld [vmem:[%s7612_s6 + $0x18] ss:$12 sps:$4 sm:$0xff]  }
 0x1fb   : > { %1230 = vmatpush1.bf16.msra.mxu0 %v6640_v24  ;;  %v1045_v29 = vld [vmem:[#allocation2] sm:$0xff]  ;;  %v1046_v31 = vld [vmem:[#allocation2 + $0x8] sm:$0xff]  ;;  %6343 = vmatprep.subr.bf16.mxu1 %v6660_v34  ;;  %v1047_v47 = vld [vmem:[#allocation2 + $0x10] sm:$0x3]  ;;  %v7694_v51 = vshrl.u32 %v1084_v50, 7  ;;  %s7219_s10 = smov 64  }
 0x1fc   : > { %1231 = vmatprep.subr.bf16.mxu0 %v6641_v25  ;;  %v1048_v32 = vpack.c.bf16 %v1046_v31, %v1045_v29  ;;  %v6662_v40 = vld [vmem:[%s7612_s6 + $0x68] ss:$12 sps:$4 sm:$0xff]   ;;  %v6656_v42 = vld [vmem:[%s7612_s6 + $0x4] ss:$12 sps:$4 sm:$0xff]   ;;  %v6658_v44 = vld [vmem:[%s7612_s6] ss:$12 sps:$4 sm:$0xff]   ;;  %v1049_v49 = vpack.c.bf16 %v1047_v47, %v1047_v47 }
 0x1fd   : > { %v6663_v43 = vld [vmem:[%s7612_s6 + $0x50] ss:$12 sps:$4 sm:$0xff]   ;;  %v6664_v45 = vld [vmem:[%s7612_s6 + $0x38] ss:$12 sps:$4 sm:$0xff]   ;;  %v6665_v46 = vld [vmem:[%s7612_s6 + $0x20] ss:$12 sps:$4 sm:$0xff]  }
 0x1fe   : > { %6357 = vmatprep.mubr.bf16.mxu1 %v1048_v32  ;;  %6344 = vmatpush3.bf16.msra.mxu1 %v6660_v34  ;;  %v6666_v48 = vld [vmem:[%s7612_s6 + $0x8] ss:$12 sps:$4 sm:$0xff]   ;;  %v7697_v52 = vsub.s32 0, %v7694_v51  ;;  %v1082_v53 = vld [vmem:[%s7650_s3] sm:$0x7]  ;;  %v7702_v57 = vsub.s32 1, %v7694_v51 }
 0x1ff   : > { %1232 = vmatpush1.bf16.msra.mxu0 %v6643_v26  ;;  %6345 = vmatprep.subr.bf16.mxu1 %v6661_v37  ;;  %v7714_v0 = vsub.s32 2, %v7694_v51  ;;  %vm1472_vm4 = vcmask 1040384   ;;  %v7748_v19 = vld [vmem:[%s7618_s27 + $0x38] sm:$0xff]   ;;  %v7220_v20 = vmov 0.0   ;;  %v7754_v23 = vld [vmem:[%s7618_s27 + $0x30] sm:$0xff]   ;;  %v7760_v24 = vld [vmem:[%s7618_s27 + $0x28] sm:$0xff]  }
 0x200   : > { %1233 = vmatprep.subr.bf16.mxu0 %v6644_v27  ;;  %v1087_v54 = vrot.slane %v1082_v53, %v7697_v52  ;;  %v1091_v60 = vrot.slane %v1082_v53, %v7702_v57  ;;  %v7765_v25 = vld [vmem:[%s7618_s27 + $0x20] sm:$0xff]   ;;  %s8490_s21 = sld [smem:[#allocation33_spill]]  ;;  %vm1446_vm7 = vcmask 65536   ;;  %vm1442_vm8 = vcmask 72704   ;;  %p6008_p4 = scmp.ne.s32.totalorder %s7344_s1, 1 }
 0x201   : > { %v1095_v6 = vrot.slane %v1082_v53, %v7714_v0  ;;  %vm1896_vm9 = vcmask 1046528   ;;  %vm7221_vm10 = vmmov 0   ;;  %s8495_s12 = sld [smem:[#allocation37_spill]]  ;;  %vm2426_vm12 = vcmask 1041408  }
 0x202   : > { %6346 = vmatpush3.bf16.msra.mxu1 %v6661_v37  ;;  %s8502_s26 = sld [smem:[#allocation45_spill]] (!%p6008_p4) }
 0x203   : > { %1234 = vmatpush1.bf16.msra.mxu0 %v6646_v28  ;;  %6347 = vmatprep.subr.bf16.mxu1 %v6662_v40 }
 0x204   : > { %1235 = vmatprep.subr.bf16.mxu0 %v6647_v30 }
 0x206   : > { %6348 = vmatpush3.bf16.msra.mxu1 %v6662_v40  ;;  %v1326_v27 = vld [vmem:[%s8490_s21] sm:$0x3] }
 0x207   : > { %1236 = vmatpush1.bf16.msra.mxu0 %v6649_v35  ;;  %6349 = vmatprep.subr.bf16.mxu1 %v6663_v43  ;;  %vm1433_vm5 = vcmp.gt.f32.partialorder %v1326_v27, 0.5  ;;  %s8496_s5 = scalar_lea.vmem %s8495_s12, %s7632_s25 }
 0x208   : > { %1237 = vmatprep.subr.bf16.mxu0 %v6650_v36  ;;  %v7776_v28 = vsel %vm1433_vm5, 1, %v7218_v22 }
 0x209   : > { %v1438_v29 = vrot.slane %v7776_v28, %v7697_v52 }
 0x20a   : > { %6350 = vmatpush3.bf16.msra.mxu1 %v6663_v43 }
 0x20b   : > { %1238 = vmatpush1.bf16.msra.mxu0 %v6652_v38  ;;  %6351 = vmatprep.subr.bf16.mxu1 %v6664_v45  ;;  %vm7780_vm6 = vcmp.eq.s32.totalorder %v1438_v29, 1 }
 0x20c   : > { %1239 = vmatprep.subr.bf16.mxu0 %v6653_v39 }
 0x20e   : > { %6352 = vmatpush3.bf16.msra.mxu1 %v6664_v45 }
 0x20f   : > { %1240 = vmatpush1.bf16.msra.mxu0 %v6655_v41  ;;  %6353 = vmatprep.subr.bf16.mxu1 %v6665_v46 }
 0x210   : > { %1241 = vmatprep.subr.bf16.mxu0 %v6656_v42 }
 0x212   : > { %6354 = vmatpush3.bf16.msra.mxu1 %v6665_v46 }
 0x213   : > { %1242 = vmatpush1.bf16.msra.mxu0 %v6658_v44  ;;  %6355 = vmatprep.subr.bf16.mxu1 %v6666_v48 }
 0x216   : > { %1260 = vmatmul.mubr.bf16.vlgmr.msra.gmra.mxu0 %v1048_v32  ;;  %6356 = vmatpush3.bf16.msra.mxu1 %v6666_v48 }
 0x217   : > { %1269 = vmatprep.mubr.bf16.mxu0 %v7218_v22 }
 0x219   : > { %6358 = vmatmul.mubr.bf16.vlgmr.msra.gmra.mxu1 %v1049_v49 }
 0x21e   : > { %1270 = vmatmul.mubr.bf16.gmra.mxu0 %v1049_v49 }
 0x2d6   : > { %v1261_v55 = vpop.f32.mrf.mxu0 }
 0x2d7   : > { %v1262_v56 = vadd.f32 %v1261_v55, %v1087_v54 }
 0x2d8   : > { %v1263_v58 = vpop.f32.mrf.mxu0 }
 0x2d9   : > { %1552 = vrot.lane.b32.xlu1 %v1262_v56, %s7219_s10  ;;  %6365 = vmatprep.mubr.msk.f32.mxu1 %vm1343_vm3, %v1262_v56  ;;  %v1264_v2 = vadd.f32 %v1263_v58, %v1091_v60  ;;  %v6359_v7 = vpop.f32.mrf.mxu1 }
 0x2da   : > { %v1265_v59 = vpop.f32.mrf.mxu0  ;;  %v7727_v9 = vadd.f32 %v6359_v7, %v1095_v6 }
 0x2db   : > { %v7707_v61 = vadd.f32 %v1265_v59, %v1087_v54  ;;  %v1312_v10 = vpop.f32.mrf.mxu1 }
 0x2dc   : > { %v1267_v62 = vpop.f32.mrf.mxu0  ;;  %v7734_v15 = vadd.f32 %v1312_v10, %v1095_v6 }
 0x2dd   : > { %v7709_v63 = vadd.f32 %v1267_v62, %v1091_v60  ;;  %1554 = vrot.lane.b32.xlu1 %v7707_v61, %s7219_s10  ;;  %v6360_v12 = vpop.f32.mrf.mxu1 }
 0x2de   : > { %v1271_v1 = vpop.f32.mrf.mxu0 }
 0x2df   : > { %v7716_v3 = vadd.f32 %v1271_v1, %v1087_v54  ;;  %1558 = vrot.lane.b32.xlu0 %v7709_v63, %s7219_s10  ;;  %6361 = vmatprep.subr.msk.mxu1 %vm1343_vm3, %v7709_v63  ;;  %v1315_v13 = vpop.f32.mrf.mxu1 }
 0x2e0   : > { %v1273_v4 = vpop.f32.mrf.mxu0  ;;  %6362 = vmatpush3.xpose.msk.msra.mxu1 %vm1343_vm3, %v7709_v63  ;;  %v7732_v14 = vadd.f32 %v1315_v13, %v1095_v6  ;;  %v1901_v13 = vrot.slane %v7709_v63, 1 }
 0x2e1   : > { %v1274_v5 = vadd.f32 %v1273_v4, %v1091_v60  ;;  %6363 = vmatprep.subr.msk.mxu1 %vm1343_vm3, %v1264_v2 }
 0x2e2   : > { %v1275_v8 = vpop.f32.mrf.mxu0 }
 0x2e3   : > { %1556 = vrot.lane.b32.xlu0 %v1264_v2, %s7219_s10  ;;  %v7767_v26 = vrot.slane %v1274_v5, 1 }
 0x2e4   : > { %6364 = vmatpush3.xpose.msk.msra.mxu1 %vm1343_vm3, %v1264_v2  ;;  %v1276_v11 = vpop.f32.mrf.mxu0 }
 0x2e5   : > { %6368 = vmatprep.subr.msk.mxu1 %vm1472_vm4, %v7732_v14 }
 0x2e7   : > { %6366 = vmatmul.mubr.msk.f32.vlgmr.msra.gmra.mxu1 %vm1343_vm3, %v7707_v61 }
 0x2e8   : > { %6369 = vmatpush3.msk.msra.mxu1 %vm1472_vm4, %v7732_v14 }
 0x2e9   : > { %6370 = vmatprep.subr.mxu1 %v7734_v15 }
 0x2ea   : > { %6371 = vmatpush3.msra.mxu1 %v7734_v15 }
 0x34b   : > { %v1553_v16 = vpop.permute.xlu1 %1552 }
 0x34c   : > { %6379 = vmatprep.mubr.msk.f32.mxu0 %vm1343_vm3, %v1553_v16  ;;  %v7807_v16 = vsel %vm1896_vm9, %v1901_v13, %v7767_v26 }
 0x34f   : > { %v1555_v21 = vpop.permute.xlu1 %1554 }
 0x351   : > { %v1559_v17 = vpop.permute.xlu0 %1558 }
 0x352   : > { %6375 = vmatprep.subr.msk.mxu0 %vm1343_vm3, %v1559_v17 }
 0x353   : > { %6376 = vmatpush3.xpose.msk.msra.mxu0 %vm1343_vm3, %v1559_v17  ;;  %v7810_v17 = vrot.slane %v7716_v3, 1 }
 0x355   : > { %v1557_v18 = vpop.permute.xlu0 %1556 }
 0x356   : > { %6377 = vmatprep.subr.msk.mxu0 %vm1343_vm3, %v1557_v18 }
 0x357   : > { %6378 = vmatpush3.xpose.msk.msra.mxu0 %vm1343_vm3, %v1557_v18  ;;  %v1897_v18 = vrot.slane %v7707_v61, 1 }
 0x358   : > { %6389 = vmatprep.subr.bf16.mxu0 %v7220_v20 }
 0x359   : > { %v1899_v63 = vsel %vm1896_vm9, %v1897_v18, %v7810_v17 }
 0x35a   : > { %6380 = vmatmul.mubr.msk.f32.vlgmr.msra.gmra.mxu0 %vm1343_vm3, %v1555_v21 }
 0x35b   : > { %6390 = vmatpush3.bf16.msra.mxu0 %v7748_v19  ;;  %6397 = vmatprep.mubr.msk.bf16.mxu0 %vm7221_vm10, %v7220_v20 }
 0x35c   : > { %6391 = vmatprep.subr.bf16.mxu0 %v7220_v20 }
 0x35f   : > { %6392 = vmatpush3.bf16.msra.mxu0 %v7754_v23 }
 0x360   : > { %6393 = vmatprep.subr.bf16.mxu0 %v7220_v20 }
 0x363   : > { %6394 = vmatpush3.bf16.msra.mxu0 %v7760_v24 }
 0x364   : > { %6395 = vmatprep.subr.bf16.mxu0 %v7220_v20 }
 0x367   : > { %6396 = vmatpush3.bf16.msra.mxu0 %v7765_v25 }
 0x368   : > { %6413 = vmatprep.subr.msk.mxu0 %vm1343_vm3, %v7767_v26 }
 0x3a7   : > { %v6367_v30 = vpop.f32.mrf.mxu1 }
 0x3a8   : > { %v1432_v32 = vmul.f32 0.125, %v6367_v30 }
 0x3a9   : > { %v1422_v33 = vpop.f32.mrf.mxu1 }
 0x3aa   : > { %v1431_v34 = vmul.f32 0.125, %v1422_v33  ;;  %v1441_v35 = vsel %vm7780_vm6, -1e+30, %v1432_v32 }
 0x3ab   : > { %v1447_v36 = vsel %vm1446_vm7, %v1441_v35, -inf }
 0x3ac   : > { %1448 = vmax.xlane.f32.xlu1 %v1447_v36  ;;  %v1440_v37 = vsel %vm7780_vm6, -1e+30, %v1431_v34 }
 0x3ad   : > { %v1443_v38 = vsel %vm1442_vm8, %v1440_v37, -inf }
 0x3ae   : > { %1444 = vmax.xlane.f32.xlu0 %v1443_v38  ;;  %v6673_v38 = vld [vmem:[%s7618_s27 + $0x8] sm:$0xff]  }
 0x41a   : > { %v6381_v39 = vpop.f32.mrf.mxu0 }
 0x41b   : > { %v1644_v41 = vmul.f32 0.125, %v6381_v39  ;;  %v6674_v39 = vld [vmem:[%s7618_s27] sm:$0xff]  }
 0x41c   : > { %v1634_v40 = vpop.f32.mrf.mxu0 }
 0x41d   : > { %v1643_v42 = vmul.f32 0.125, %v1634_v40  ;;  %v1646_v45 = vsel %vm7780_vm6, -1e+30, %v1644_v41  ;;  %v7841_v40 = vrot.slane %v7727_v9, 1 }
 0x41e   : > { %v1650_v46 = vsel %vm1446_vm7, %v1646_v45, -inf }
 0x41f   : > { %v1645_v43 = vsel %vm7780_vm6, -1e+30, %v1643_v42 }
 0x420   : > { %v1647_v44 = vsel %vm1442_vm8, %v1645_v43, -inf }
 0x421   : > { %1648 = vmax.xlane.f32.xlu0 %v1647_v44 }
 0x425   : > { %1651 = vmax.xlane.f32.xlu0 %v1650_v46 }
 0x435   : > { %v1449_v47 = vpop.xlane.xlu1 %1448 }
 0x436   : > { %v1451_v48 = vsub.f32 %v1441_v35, %v1449_v47  ;;  %v6671_v35 = vld [vmem:[%s7618_s27 + $0x18] sm:$0xff]  }
 0x437   : > { %v1445_v49 = vpop.xlane.xlu0 %1444 }
 0x438   : > { %v1454_v50 = vmul.f32 1.442695, %v1451_v48  ;;  %v1450_v53 = vsub.f32 %v1440_v37, %v1445_v49  ;;  %v6672_v37 = vld [vmem:[%s7618_s27 + $0x10] sm:$0xff]  }
 0x43a   : > { %6803 = vpow2.f32 %v1454_v50  ;;  %v1452_v54 = vmul.f32 1.442695, %v1450_v53 }
 0x43c   : > { %6805 = vpow2.f32 %v1452_v54 }
 0x447   : > { %v6804_v55 = vpop.eup %6803 }
 0x448   : > { %v1459_v56 = vsel %vm1446_vm7, %v6804_v55, 0.0 }
 0x449   : > { %v6806_v58 = vpop.eup %6805  ;;  %1460 = vadd.xlane.f32.xlu0 %v1459_v56 }
 0x44a   : > { %v1456_v59 = vsel %vm1442_vm8, %v6806_v58, 0.0 }
 0x44b   : > { %1457 = vadd.xlane.f32.xlu1 %v1456_v59 }
 0x4aa   : > { %v1649_v60 = vpop.xlane.xlu0 %1648 }
 0x4ab   : > { %v1653_v62 = vsub.f32 %v1645_v43, %v1649_v60  ;;  %v2019_v43 = vrot.slane %v7732_v14, 1  ;;  %v1992_v60 = vrot.slane %v7776_v28, %v7702_v57 }
 0x4ad   : > { %v1655_v1 = vmul.f32 1.442695, %v1653_v62  ;;  %vm7883_vm11 = vcmp.eq.s32.totalorder %v1992_v60, 1 }
 0x4ae   : > { %v1652_v2 = vpop.xlane.xlu0 %1651 }
 0x4af   : > { %6807 = vpow2.f32 %v1655_v1  ;;  %v1654_v4 = vsub.f32 %v1646_v45, %v1652_v2  ;;  %v7851_v45 = vsel %vm1896_vm9, %v2019_v43, %v7841_v40 }
 0x4b1   : > { %v1657_v5 = vmul.f32 1.442695, %v1654_v4 }
 0x4b3   : > { %6809 = vpow2.f32 %v1657_v5 }
 0x4bc   : > { %v6808_v6 = vpop.eup %6807 }
 0x4bd   : > { %v1659_v7 = vsel %vm1442_vm8, %v6808_v6, 0.0 }
 0x4be   : > { %1660 = vadd.xlane.f32.xlu1 %v1659_v7 }
 0x4c0   : > { %v6810_v8 = vpop.eup %6809 }
 0x4c1   : > { %v1662_v10 = vsel %vm1446_vm7, %v6810_v8, 0.0 }
 0x4c2   : > { %1663 = vadd.xlane.f32.xlu0 %v1662_v10 }
 0x4cf   : > { %1672 = vrot.lane.b32.xlu1 %v7732_v14, %s7219_s10 }
 0x4d2   : > { %v1461_v11 = vpop.xlane.xlu0 %1460 }
 0x4d3   : > { %2113 = vrot.lane.b32.xlu1 %v7767_v26, %s7219_s10  ;;  %6811 = vrcp.f32 %v1461_v11 }
 0x4d4   : > { %v1458_v12 = vpop.xlane.xlu1 %1457 }
 0x4d5   : > { %6813 = vrcp.f32 %v1458_v12 }
 0x4d7   : > { %2111 = vrot.lane.b32.xlu1 %v7807_v16, %s7219_s10 }
 0x4d8   : > { %1670 = vrot.lane.b32.xlu0 %v7734_v15, %s7219_s10 }
 0x4db   : > { %2109 = vrot.lane.b32.xlu1 %v7810_v17, %s7219_s10 }
 0x4dc   : > { %2107 = vrot.lane.b32.xlu0 %v1899_v63, %s7219_s10 }
 0x4e0   : > { %v6812_v21 = vpop.eup %6811 }
 0x4e1   : > { %v1465_v29 = vmul.f32 %v6812_v21, %v6804_v55 }
 0x4e2   : > { %v6814_v27 = vpop.eup %6813 }
 0x4e3   : > { %v1464_v3 = vmul.f32 %v6814_v27, %v6806_v58 }
 0x4e5   : > { %6372 = vmatprep.mubr.msk.f32.mxu1 %vm1442_vm8, %v1464_v3 }
 0x4e6   : > { %6373 = vmatmul.mubr.msk.f32.vlgmr.msra.gmra.mxu1 %vm1442_vm8, %v1465_v29 }
 0x547   : > { %v1661_v61 = vpop.xlane.xlu1 %1660 }
 0x548   : > { %6815 = vrcp.f32 %v1661_v61 }
 0x54b   : > { %v1673_v15 = vpop.permute.xlu1 %1672  ;;  %v1664_v30 = vpop.xlane.xlu0 %1663 }
 0x54c   : > { %6817 = vrcp.f32 %v1664_v30  ;;  %6382 = vmatprep.subr.msk.mxu1 %vm1472_vm4, %v1673_v15 }
 0x54d   : > { %6383 = vmatpush3.msk.msra.mxu1 %vm1472_vm4, %v1673_v15 }
 0x54f   : > { %v1671_v31 = vpop.permute.xlu0 %1670  ;;  %v2114_v14 = vpop.permute.xlu1 %2113 }
 0x550   : > { %6384 = vmatprep.subr.mxu1 %v1671_v31 }
 0x551   : > { %6385 = vmatpush3.msra.mxu1 %v1671_v31 }
 0x552   : > { %6401 = vmatprep.subr.bf16.mxu1 %v7220_v20 }
 0x553   : > { %v2108_v48 = vpop.permute.xlu0 %2107  ;;  %v2112_v49 = vpop.permute.xlu1 %2111 }
 0x555   : > { %v6816_v32 = vpop.eup %6815 }
 0x556   : > { %v1667_v33 = vmul.f32 %v6816_v32, %v6808_v6 }
 0x558   : > { %6386 = vmatprep.mubr.msk.f32.mxu1 %vm1442_vm8, %v1667_v33 }
 0x559   : > { %v6818_v34 = vpop.eup %6817 }
 0x55a   : > { %v1668_v36 = vmul.f32 %v6818_v34, %v6810_v8 }
 0x55c   : > { %6387 = vmatmul.mubr.msk.f32.vlgmr.msra.gmra.mxu1 %vm1442_vm8, %v1668_v36 }
 0x55d   : > { %6402 = vmatpush3.bf16.msra.mxu1 %v6671_v35  ;;  %6409 = vmatprep.mubr.msk.bf16.mxu1 %vm7221_vm10, %v7220_v20 }
 0x55e   : > { %6403 = vmatprep.subr.bf16.mxu1 %v7220_v20 }
 0x561   : > { %6404 = vmatpush3.bf16.msra.mxu1 %v6672_v37 }
 0x562   : > { %6405 = vmatprep.subr.bf16.mxu1 %v7220_v20 }
 0x565   : > { %6406 = vmatpush3.bf16.msra.mxu1 %v6673_v38 }
 0x566   : > { %6407 = vmatprep.subr.bf16.mxu1 %v7220_v20 }
 0x569   : > { %6408 = vmatpush3.bf16.msra.mxu1 %v6674_v39 }
 0x56a   : > { %6420 = vmatprep.subr.msk.mxu1 %vm1472_vm4, %v7841_v40 }
 0x5a6   : > { %v6374_v41 = vpop.f32.mrf.mxu1 }
 0x5a8   : > { %v1542_v42 = vpop.f32.mrf.mxu1 }
 0x5a9   : > { %v1551_v44 = vpack.c.bf16 %v6374_v41, %v1542_v42 }
 0x5ab   : > { %6410 = vmatmul.mubr.msk.bf16.vlgmr.msra.gmra.mxu1 %vm1343_vm3, %v1551_v44 }
 0x5ac   : > { %6421 = vmatpush3.msk.msra.mxu1 %vm1472_vm4, %v7841_v40 }
 0x5ad   : > { %6422 = vmatprep.subr.mxu1 %v7851_v45 }
 0x5ae   : > { %6423 = vmatpush3.msra.mxu1 %v7851_v45 }
 0x61c   : > { %v6388_v9 = vpop.f32.mrf.mxu1 }
 0x61e   : > { %v1749_v46 = vpop.f32.mrf.mxu1 }
 0x61f   : > { %v1758_v47 = vpack.c.bf16 %v6388_v9, %v1749_v46 }
 0x621   : > { %6398 = vmatmul.mubr.msk.bf16.vlgmr.msra.gmra.mxu0 %vm1343_vm3, %v1758_v47  ;;  %v7912_v47 = vld [vmem:[%s8496_s5] ss:$0 sm:$0xff] }
 0x622   : > { %6414 = vmatpush3.xpose.msk.msra.mxu0 %vm1343_vm3, %v7767_v26  ;;  %6417 = vmatprep.mubr.msk.f32.mxu0 %vm1343_vm3, %v1899_v63  ;;  %v2110_v26 = vpop.permute.xlu1 %2109 }
 0x623   : > { %6415 = vmatprep.subr.msk.mxu0 %vm1343_vm3, %v7807_v16 }
 0x626   : > { %6416 = vmatpush3.xpose.msk.msra.mxu0 %vm1343_vm3, %v7807_v16 }
 0x627   : > { %6427 = vmatprep.subr.msk.mxu0 %vm1343_vm3, %v2114_v14 }
 0x629   : > { %6418 = vmatmul.mubr.msk.f32.vlgmr.msra.gmra.mxu0 %vm1343_vm3, %v7810_v17 }
 0x62a   : > { %6428 = vmatpush3.xpose.msk.msra.mxu0 %vm1343_vm3, %v2114_v14  ;;  %6431 = vmatprep.mubr.msk.f32.mxu0 %vm1343_vm3, %v2108_v48  ;;  %v6847_v48 = vld [vmem:[#allocation2] sm:$0xff] }
 0x62b   : > { %6429 = vmatprep.subr.msk.mxu0 %vm1343_vm3, %v2112_v49 }
 0x62e   : > { %6430 = vmatpush3.xpose.msk.msra.mxu0 %vm1343_vm3, %v2112_v49 }
 0x62f   : > { %6453 = vmatprep.subr.bf16.mxu0 %v7220_v20 }
 0x631   : > { %6432 = vmatmul.mubr.msk.f32.vlgmr.msra.gmra.mxu0 %vm1343_vm3, %v2110_v26 }
 0x632   : > { %6454 = vmatpush3.bf16.msra.mxu0 %v6671_v35  ;;  %6461 = vmatprep.mubr.msk.bf16.mxu0 %vm7221_vm10, %v7220_v20 }
 0x633   : > { %6455 = vmatprep.subr.bf16.mxu0 %v7220_v20 }
 0x636   : > { %6456 = vmatpush3.bf16.msra.mxu0 %v6672_v37 }
 0x637   : > { %6457 = vmatprep.subr.bf16.mxu0 %v7220_v20 }
 0x63a   : > { %6458 = vmatpush3.bf16.msra.mxu0 %v6673_v38 }
 0x63b   : > { %6459 = vmatprep.subr.bf16.mxu0 %v7220_v20 }
 0x63e   : > { %6460 = vmatpush3.bf16.msra.mxu0 %v6674_v39 }
 0x66b   : > { %v1888_v50 = vpop.f32.mrf.mxu1 }
 0x66d   : > { %v6411_v53 = vpop.f32.mrf.mxu1 }
 0x66f   : > { %v7877_v54 = vpop.f32.mrf.mxu1 }
 0x671   : > { %v6412_v55 = vpop.f32.mrf.mxu1 }
 0x6e1   : > { %v1820_v56 = vpop.f32.mrf.mxu0 }
 0x6e2   : > { %v1889_v46 = vadd.f32 %v1888_v50, %v1820_v56 }
 0x6e3   : > { %v6399_v58 = vpop.f32.mrf.mxu0 }
 0x6e4   : > { %v2416_v14 = vadd.f32 %v7912_v47, %v1889_v46 }
 0x6e5   : > { %v7879_v59 = vpop.f32.mrf.mxu0 }
 0x6e6   : > { %v7915_v49 = vadd.f32 %v6847_v48, %v2416_v14  ;;  %v2578_v48 = vld [vmem:[%s7620_s24 + $0x308] sm:$0xff] }
 0x6e7   : > { %v6400_v62 = vpop.f32.mrf.mxu0 }
 0x6e9   : > { %v6419_v1 = vpop.f32.mrf.mxu0 }
 0x6ea   : > { %v1988_v4 = vmul.f32 0.125, %v6419_v1 }
 0x6eb   : > { %v1978_v5 = vpop.f32.mrf.mxu0 }
 0x6ec   : > { %v1987_v6 = vmul.f32 0.125, %v1978_v5  ;;  %v1995_v7 = vsel %vm7883_vm11, -1e+30, %v1988_v4 }
 0x6ed   : > { %v1999_v8 = vsel %vm1446_vm7, %v1995_v7, -inf }
 0x6ee   : > { %2000 = vmax.xlane.f32.xlu1 %v1999_v8  ;;  %v1994_v10 = vsel %vm7883_vm11, -1e+30, %v1987_v6 }
 0x6ef   : > { %v1996_v28 = vsel %vm1442_vm8, %v1994_v10, -inf }
 0x6f0   : > { %1997 = vmax.xlane.f32.xlu0 %v1996_v28 }
 0x6f1   : > { %v6433_v11 = vpop.f32.mrf.mxu0 }
 0x6f2   : > { %v2199_v13 = vmul.f32 0.125, %v6433_v11 }
 0x6f3   : > { %v2189_v12 = vpop.f32.mrf.mxu0 }
 0x6f4   : > { %v2198_v16 = vmul.f32 0.125, %v2189_v12  ;;  %v2201_v63 = vsel %vm7883_vm11, -1e+30, %v2199_v13 }
 0x6f5   : > { %v2205_v21 = vsel %vm1446_vm7, %v2201_v63, -inf }
 0x6f6   : > { %v2200_v17 = vsel %vm7883_vm11, -1e+30, %v2198_v16 }
 0x6f7   : > { %v2202_v18 = vsel %vm1442_vm8, %v2200_v17, -inf }
 0x6f8   : > { %2203 = vmax.xlane.f32.xlu0 %v2202_v18 }
 0x6fc   : > { %2206 = vmax.xlane.f32.xlu0 %v2205_v21 }
 0x777   : > { %v2001_v27 = vpop.xlane.xlu1 %2000 }
 0x778   : > { %v2003_v3 = vsub.f32 %v1995_v7, %v2001_v27 }
 0x779   : > { %v1998_v29 = vpop.xlane.xlu0 %1997 }
 0x77a   : > { %v2006_v61 = vmul.f32 1.442695, %v2003_v3  ;;  %v2002_v15 = vsub.f32 %v1994_v10, %v1998_v29 }
 0x77c   : > { %6819 = vpow2.f32 %v2006_v61  ;;  %v2004_v30 = vmul.f32 1.442695, %v2002_v15 }
 0x77e   : > { %6821 = vpow2.f32 %v2004_v30 }
 0x781   : > { %v2204_v31 = vpop.xlane.xlu0 %2203 }
 0x782   : > { %v2208_v32 = vsub.f32 %v2200_v17, %v2204_v31  ;;  %v1892_v17 = vadd.f32 %v7877_v54, %v7879_v59  ;;  %v6848_v31 = vld [vmem:[#allocation2 + $0x8] sm:$0xff] }
 0x784   : > { %v2210_v33 = vmul.f32 1.442695, %v2208_v32 }
 0x785   : > { %v2207_v34 = vpop.xlane.xlu0 %2206 }
 0x786   : > { %6823 = vpow2.f32 %v2210_v33  ;;  %v2209_v35 = vsub.f32 %v2201_v63, %v2207_v34  ;;  %v6849_v34 = vld [vmem:[#allocation2 + $0x10] sm:$0x3] }
 0x788   : > { %v2212_v36 = vmul.f32 1.442695, %v2209_v35 }
 0x789   : > { %v6820_v37 = vpop.eup %6819 }
 0x78a   : > { %6825 = vpow2.f32 %v2212_v36  ;;  %v2011_v38 = vsel %vm1446_vm7, %v6820_v37, 0.0 }
 0x78b   : > { %v6822_v39 = vpop.eup %6821  ;;  %2012 = vadd.xlane.f32.xlu0 %v2011_v38  ;;  %v2601_v38 = vld [vmem:[%s7620_s24 + $0x3c0] sm:$0xff] }
 0x78c   : > { %v2008_v41 = vsel %vm1442_vm8, %v6822_v39, 0.0 }
 0x78d   : > { %2009 = vadd.xlane.f32.xlu1 %v2008_v41 }
 0x793   : > { %v6824_v42 = vpop.eup %6823 }
 0x794   : > { %v2214_v43 = vsel %vm1442_vm8, %v6824_v42, 0.0 }
 0x795   : > { %2215 = vadd.xlane.f32.xlu1 %v2214_v43  ;;  %v2602_v43 = vld [vmem:[%s7620_s24 + $0x3c8] sm:$0xff] }
 0x797   : > { %v6826_v44 = vpop.eup %6825 }
 0x798   : > { %v2217_v9 = vsel %vm1446_vm7, %v6826_v44, 0.0 }
 0x799   : > { %2218 = vadd.xlane.f32.xlu0 %v2217_v9  ;;  %v2585_v9 = vld [vmem:[%s7620_s24 + $0x340] sm:$0xff] }
 0x7a6   : > { %2226 = vrot.lane.b32.xlu1 %v7841_v40, %s7219_s10 }
 0x7af   : > { %2224 = vrot.lane.b32.xlu0 %v7851_v45, %s7219_s10 }
 0x7ca   : > { %2422 = vadd.xlane.f32.xlu1 %v7915_v49 }
 0x814   : > { %v2013_v26 = vpop.xlane.xlu0 %2012 }
 0x815   : > { %6827 = vrcp.f32 %v2013_v26 }
 0x816   : > { %v2010_v40 = vpop.xlane.xlu1 %2009 }
 0x817   : > { %6829 = vrcp.f32 %v2010_v40 }
 0x81e   : > { %v2216_v53 = vpop.xlane.xlu1 %2215 }
 0x81f   : > { %6831 = vrcp.f32 %v2216_v53 }
 0x822   : > { %v2227_v45 = vpop.permute.xlu1 %2226  ;;  %v2219_v50 = vpop.xlane.xlu0 %2218 }
 0x823   : > { %v6828_v55 = vpop.eup %6827  ;;  %6833 = vrcp.f32 %v2219_v50  ;;  %6434 = vmatprep.subr.msk.mxu1 %vm1472_vm4, %v2227_v45 }
 0x824   : > { %v6830_v56 = vpop.eup %6829  ;;  %v2017_v60 = vmul.f32 %v6828_v55, %v6820_v37  ;;  %v2593_v37 = vld [vmem:[%s7620_s24 + $0x380] sm:$0xff] }
 0x825   : > { %v2016_v58 = vmul.f32 %v6830_v56, %v6822_v39  ;;  %v2594_v39 = vld [vmem:[%s7620_s24 + $0x388] sm:$0xff]  ;;  %v5861_v41 = vcombine.low %v2593_v37, %v2601_v38 }
 0x826   : > { %v2225_v62 = vpop.permute.xlu0 %2224  ;;  %v5863_v46 = vcombine.low %v2594_v39, %v2602_v43 }
 0x827   : > { %6424 = vmatprep.mubr.msk.f32.mxu1 %vm1442_vm8, %v2016_v58 }
 0x828   : > { %6425 = vmatmul.mubr.msk.f32.vlgmr.msra.gmra.mxu1 %vm1442_vm8, %v2017_v60 }
 0x829   : > { %6435 = vmatpush3.msk.msra.mxu1 %vm1472_vm4, %v2227_v45 }
 0x82a   : > { %6436 = vmatprep.subr.mxu1 %v2225_v62 }
 0x82b   : > { %6437 = vmatpush3.msra.mxu1 %v2225_v62 }
 0x82c   : > { %v6832_v1 = vpop.eup %6831  ;;  %6441 = vmatprep.subr.bf16.mxu1 %v7220_v20 }
 0x82d   : > { %v2222_v2 = vmul.f32 %v6832_v1, %v6824_v42  ;;  %v5862_v42 = vcombine.high %v2593_v37, %v2601_v38  ;;  %v2505_v37 = vld [vmem:[%s7620_s24 + $0xc0] sm:$0xff]  ;;  %v2498_v38 = vld [vmem:[%s7620_s24 + $0x88] sm:$0xff] }
 0x82f   : > { %6438 = vmatprep.mubr.msk.f32.mxu1 %vm1442_vm8, %v2222_v2 }
 0x830   : > { %v6834_v4 = vpop.eup %6833 }
 0x831   : > { %v2223_v5 = vmul.f32 %v6834_v4, %v6826_v44  ;;  %v2577_v44 = vld [vmem:[%s7620_s24 + $0x300] sm:$0xff] }
 0x832   : > { %v5846_v14 = vcombine.high %v2577_v44, %v2585_v9  ;;  %v5845_v40 = vcombine.low %v2577_v44, %v2585_v9  ;;  %v2561_v4 = vld [vmem:[%s7620_s24 + $0x280] sm:$0xff] }
 0x833   : > { %6439 = vmatmul.mubr.msk.f32.vlgmr.msra.gmra.mxu1 %vm1442_vm8, %v2223_v5  ;;  %v2569_v5 = vld [vmem:[%s7620_s24 + $0x2c0] sm:$0xff] }
 0x834   : > { %6442 = vmatpush3.bf16.msra.mxu1 %v7748_v19  ;;  %6449 = vmatprep.mubr.msk.bf16.mxu1 %vm7221_vm10, %v7220_v20  ;;  %v2481_v9 = vld [vmem:[%s7620_s24] sm:$0xff] }
 0x835   : > { %6443 = vmatprep.subr.bf16.mxu1 %v7220_v20 }
 0x838   : > { %6444 = vmatpush3.bf16.msra.mxu1 %v7754_v23 }
 0x839   : > { %6445 = vmatprep.subr.bf16.mxu1 %v7220_v20 }
 0x83c   : > { %6446 = vmatpush3.bf16.msra.mxu1 %v7760_v24 }
 0x83d   : > { %6447 = vmatprep.subr.bf16.mxu1 %v7220_v20 }
 0x840   : > { %6448 = vmatpush3.bf16.msra.mxu1 %v7765_v25 }
 0x841   : > { %3333 = vmatprep.subr.bf16.mxu1 %v5862_v42 }
 0x853   : > { %v2423_v25 = vpop.xlane.xlu1 %2422 }
 0x854   : > { %v2431_v63 = vmul.f32 0.0078125, %v2423_v25 }
 0x856   : > { %v7943_v30 = vsub.f32 %v7915_v49, %v2431_v63  ;;  %v2586_v49 = vld [vmem:[%s7620_s24 + $0x348] sm:$0xff] }
 0x857   : > { %v5848_v26 = vcombine.high %v2578_v48, %v2586_v49  ;;  %v5847_v53 = vcombine.low %v2578_v48, %v2586_v49  ;;  %v2530_v63 = vld [vmem:[%s7620_s24 + $0x188] sm:$0xff] }
 0x858   : > { %v2437_v33 = vmul.f32 %v7943_v30, %v7943_v30  ;;  %v2490_v48 = vld [vmem:[%s7620_s24 + $0x48] sm:$0xff] }
 0x8e8   : > { %v6426_v6 = vpop.f32.mrf.mxu1 }
 0x8ea   : > { %v2097_v7 = vpop.f32.mrf.mxu1 }
 0x8eb   : > { %v2106_v8 = vpack.c.bf16 %v6426_v6, %v2097_v7  ;;  %v2562_v6 = vld [vmem:[%s7620_s24 + $0x288] sm:$0xff]  ;;  %v5830_v7 = vcombine.high %v2561_v4, %v2569_v5 }
 0x8ed   : > { %6462 = vmatmul.mubr.msk.bf16.vlgmr.msra.gmra.mxu0 %vm1343_vm3, %v2106_v8  ;;  %v2570_v8 = vld [vmem:[%s7620_s24 + $0x2c8] sm:$0xff] }
 0x8ee   : > { %3416 = vmatprep.mubr.bf16.mxu0 %v7218_v22 }
 0x8f3   : > { %v6440_v19 = vpop.f32.mrf.mxu1 }
 0x8f5   : > { %v2303_v10 = vpop.f32.mrf.mxu1 }
 0x8f6   : > { %v2312_v28 = vpack.c.bf16 %v6440_v19, %v2303_v10  ;;  %v5829_v19 = vcombine.low %v2561_v4, %v2569_v5  ;;  %v5831_v10 = vcombine.low %v2562_v6, %v2570_v8 }
 0x8f8   : > { %6450 = vmatmul.mubr.msk.bf16.vlgmr.msra.gmra.mxu1 %vm1343_vm3, %v2312_v28  ;;  %v5832_v28 = vcombine.high %v2562_v6, %v2570_v8 }
 0x8f9   : > { %3365 = vmatprep.mubr.bf16.mxu1 %v7218_v22  ;;  %3334 = vmatpush1.bf16.msra.mxu1 %v5861_v41  ;;  %v2506_v41 = vld [vmem:[%s7620_s24 + $0xc8] sm:$0xff] }
 0x8fa   : > { %3335 = vmatprep.subr.bf16.mxu1 %v5846_v14  ;;  %v5768_v44 = vcombine.high %v2498_v38, %v2506_v41 }
 0x8fd   : > { %3336 = vmatpush1.bf16.msra.mxu1 %v5845_v40 }
 0x8fe   : > { %3337 = vmatprep.subr.bf16.mxu1 %v5830_v7 }
 0x901   : > { %3338 = vmatpush1.bf16.msra.mxu1 %v5829_v19 }
 0x9ad   : > { %v2394_v23 = vpop.f32.mrf.mxu0 }
 0x9af   : > { %v6463_v24 = vpop.f32.mrf.mxu0 }
 0x9b0   : > { %v2553_v24 = vld [vmem:[%s7620_s24 + $0x240] sm:$0xff] }
 0x9b1   : > { %v2397_v11 = vpop.f32.mrf.mxu0 }
 0x9b3   : > { %v6464_v20 = vpop.f32.mrf.mxu0 }
 0x9b8   : > { %v2350_v12 = vpop.f32.mrf.mxu1 }
 0x9b9   : > { %v2395_v13 = vadd.f32 %v2394_v23, %v2350_v12  ;;  %v2545_v23 = vld [vmem:[%s7620_s24 + $0x200] sm:$0xff]  ;;  %v2554_v12 = vld [vmem:[%s7620_s24 + $0x248] sm:$0xff] }
 0x9ba   : > { %v6451_v16 = vpop.f32.mrf.mxu1  ;;  %v5814_v20 = vcombine.high %v2545_v23, %v2553_v24  ;;  %v5813_v25 = vcombine.low %v2545_v23, %v2553_v24 }
 0x9bb   : > { %v2403_v18 = vrot.slane %v2395_v13, 7 }
 0x9bc   : > { %v2353_v21 = vpop.f32.mrf.mxu1  ;;  %3339 = vmatprep.subr.bf16.mxu1 %v5814_v20  ;;  %v5747_v20 = vld [vmem:[%s914_s14] ss:$0 sm:$0xff] }
 0x9bd   : > { %v2398_v27 = vadd.f32 %v2397_v11, %v2353_v21  ;;  %v2408_v3 = vsel %vm1472_vm4, %v1892_v17, %v2403_v18  ;;  %v2546_v11 = vld [vmem:[%s7620_s24 + $0x208] sm:$0xff]  ;;  %3340 = vmatpush1.bf16.msra.mxu1 %v5813_v25  ;;  %v2529_v17 = vld [vmem:[%s7620_s24 + $0x180] sm:$0xff] }
 0x9be   : > { %v6452_v29 = vpop.f32.mrf.mxu1  ;;  %v2417_v61 = vadd.f32 %v7912_v47, %v2408_v3  ;;  %v5815_v13 = vcombine.low %v2546_v11, %v2554_v12  ;;  %v5816_v16 = vcombine.high %v2546_v11, %v2554_v12 }
 0x9bf   : > { %v2404_v15 = vrot.slane %v2398_v27, 7  ;;  %v2538_v27 = vld [vmem:[%s7620_s24 + $0x1c8] sm:$0xff] }
 0x9c0   : > { %v2420_v32 = vadd.f32 %v6848_v31, %v2417_v61  ;;  %v5799_v29 = vcombine.low %v2530_v63, %v2538_v27  ;;  %v5800_v61 = vcombine.high %v2530_v63, %v2538_v27  ;;  %v2521_v31 = vld [vmem:[%s7620_s24 + $0x140] sm:$0xff]  ;;  %v2580_v63 = vld [vmem:[%s7620_s24 + $0x318] sm:$0xff] }
 0x9c1   : > { %v2405_v54 = vsel %vm1472_vm4, %v2403_v18, %v2404_v15  ;;  %v2537_v18 = vld [vmem:[%s7620_s24 + $0x1c0] sm:$0xff] }
 0x9c2   : > { %2424 = vadd.xlane.f32.xlu0 %v2420_v32  ;;  %v2418_v59 = vadd.f32 %v7912_v47, %v2405_v54  ;;  %v5864_v47 = vcombine.high %v2594_v39, %v2602_v43  ;;  %v5798_v21 = vcombine.high %v2529_v17, %v2537_v18  ;;  %v5797_v3 = vcombine.low %v2529_v17, %v2537_v18  ;;  %v2513_v15 = vld [vmem:[%s7620_s24 + $0x100] sm:$0xff]  ;;  %v2587_v18 = vld [vmem:[%s7620_s24 + $0x350] sm:$0xff] }
 0x9c3   : > { %v5782_v54 = vcombine.high %v2513_v15, %v2521_v31  ;;  %v5767_v43 = vcombine.low %v2498_v38, %v2506_v41  ;;  %v2555_v41 = vld [vmem:[%s7620_s24 + $0x250] sm:$0xff] }
 0x9c4   : > { %v2421_v35 = vadd.f32 %v6849_v34, %v2418_v59  ;;  %3384 = vmatprep.subr.bf16.mxu0 %v5864_v47  ;;  %3341 = vmatprep.subr.bf16.mxu1 %v5798_v21  ;;  %v2522_v59 = vld [vmem:[%s7620_s24 + $0x148] sm:$0xff]  ;;  %v2588_v21 = vld [vmem:[%s7620_s24 + $0x358] sm:$0xff] }
 0x9c5   : > { %3385 = vmatpush1.bf16.msra.mxu0 %v5863_v46  ;;  %3342 = vmatpush1.bf16.msra.mxu1 %v5797_v3  ;;  %v2489_v46 = vld [vmem:[%s7620_s24 + $0x40] sm:$0xff]  ;;  %v2482_v47 = vld [vmem:[%s7620_s24 + $0x8] sm:$0xff] }
 0x9c6   : > { %2440 = vadd.xlane.f32.xlu0 %v2437_v33  ;;  %v2427_v36 = vsel %vm2426_vm12, %v2421_v35, 0.0  ;;  %3386 = vmatprep.subr.bf16.mxu0 %v5848_v26  ;;  %v5781_v33 = vcombine.low %v2513_v15, %v2521_v31  ;;  %v5750_v14 = vcombine.high %v2481_v9, %v2489_v46  ;;  %v5749_v49 = vcombine.low %v2481_v9, %v2489_v46 }
 0x9c7   : > { %2428 = vadd.xlane.f32.xlu1 %v2427_v36  ;;  %3343 = vmatprep.subr.bf16.mxu1 %v5782_v54  ;;  %v2497_v36 = vld [vmem:[%s7620_s24 + $0x80] sm:$0xff]  ;;  %v5751_v26 = vcombine.low %v2482_v47, %v2490_v48  ;;  %v5752_v40 = vcombine.high %v2482_v47, %v2490_v48  ;;  %v5852_v31 = vcombine.high %v2580_v63, %v2588_v21  ;;  %v2571_v54 = vld [vmem:[%s7620_s24 + $0x2d0] sm:$0xff] }
 0x9c8   : > { %v5766_v39 = vcombine.high %v2497_v36, %v2505_v37  ;;  %v5765_v42 = vcombine.low %v2497_v36, %v2505_v37  ;;  %v5851_v36 = vcombine.low %v2580_v63, %v2588_v21  ;;  %v2531_v48 = vld [vmem:[%s7620_s24 + $0x190] sm:$0xff]  ;;  %v2597_v21 = vld [vmem:[%s7620_s24 + $0x3a0] sm:$0xff] }
 0x9c9   : > { %3387 = vmatpush1.bf16.msra.mxu0 %v5847_v53  ;;  %3344 = vmatpush1.bf16.msra.mxu1 %v5781_v33  ;;  %v2595_v53 = vld [vmem:[%s7620_s24 + $0x390] sm:$0xff]  ;;  %v2572_v33 = vld [vmem:[%s7620_s24 + $0x2d8] sm:$0xff] }
 0x9ca   : > { %3388 = vmatprep.subr.bf16.mxu0 %v5832_v28  ;;  %3345 = vmatprep.subr.bf16.mxu1 %v5766_v39  ;;  %v2547_v39 = vld [vmem:[%s7620_s24 + $0x210] sm:$0xff] }
 0x9cb   : > { %v5818_v47 = vcombine.high %v2547_v39, %v2555_v41 }
 0x9cd   : > { %3389 = vmatpush1.bf16.msra.mxu0 %v5831_v10  ;;  %3346 = vmatpush1.bf16.msra.mxu1 %v5765_v42  ;;  %v2548_v42 = vld [vmem:[%s7620_s24 + $0x218] sm:$0xff] }
 0x9ce   : > { %3390 = vmatprep.subr.bf16.mxu0 %v5816_v16  ;;  %3347 = vmatprep.subr.bf16.mxu1 %v5750_v14  ;;  %v5748_v16 = vld [vmem:[%s917_s28] ss:$0 sm:$0xff] }
 0x9d1   : > { %3391 = vmatpush1.bf16.msra.mxu0 %v5815_v13  ;;  %3348 = vmatpush1.bf16.msra.mxu1 %v5749_v49  ;;  %v2539_v49 = vld [vmem:[%s7620_s24 + $0x1d0] sm:$0xff] }
 0x9d2   : > { %3392 = vmatprep.subr.bf16.mxu0 %v5800_v61 }
 0x9d5   : > { %3393 = vmatpush1.bf16.msra.mxu0 %v5799_v29 }
 0xa4b   : > { %v2425_v45 = vpop.xlane.xlu0 %2424 }
 0xa4c   : > { %v2432_v50 = vmul.f32 0.0078125, %v2425_v45  ;;  %v2603_v45 = vld [vmem:[%s7620_s24 + $0x3d0] sm:$0xff] }
 0xa4e   : > { %v7958_v55 = vsub.f32 %v2420_v32, %v2432_v50  ;;  %v2514_v32 = vld [vmem:[%s7620_s24 + $0x108] sm:$0xff]  ;;  %v2596_v50 = vld [vmem:[%s7620_s24 + $0x398] sm:$0xff] }
 0xa4f   : > { %v5783_v34 = vcombine.low %v2514_v32, %v2522_v59  ;;  %v2441_v4 = vpop.xlane.xlu0 %2440 }
 0xa50   : > { %v2429_v56 = vpop.xlane.xlu1 %2428  ;;  %v2438_v58 = vmul.f32 %v7958_v55, %v7958_v55  ;;  %v2447_v5 = vmul.f32 0.0078125, %v2441_v4  ;;  %v5801_v4 = vcombine.low %v2531_v48, %v2539_v49 }
 0xa51   : > { %v2433_v60 = vmul.f32 0.0078125, %v2429_v56  ;;  %v5866_v56 = vcombine.high %v2595_v53, %v2603_v45 }
 0xa52   : > { %2442 = vadd.xlane.f32.xlu1 %v2438_v58  ;;  %v2604_v58 = vld [vmem:[%s7620_s24 + $0x3d8] sm:$0xff]  ;;  %v2450_v6 = vadd.f32 1e-05, %v2447_v5 }
 0xa53   : > { %v7962_v62 = vsub.f32 %v2421_v35, %v2433_v60  ;;  %v5784_v35 = vcombine.high %v2514_v32, %v2522_v59  ;;  %v5865_v60 = vcombine.low %v2595_v53, %v2603_v45  ;;  %3435 = vmatprep.subr.bf16.mxu1 %v5866_v56  ;;  %v2563_v32 = vld [vmem:[%s7620_s24 + $0x290] sm:$0xff]  ;;  %v2564_v59 = vld [vmem:[%s7620_s24 + $0x298] sm:$0xff]  ;;  %v5817_v53 = vcombine.low %v2547_v39, %v2555_v41 }
 0xa54   : > { %6835 = vrsqrt.f32 %v2450_v6  ;;  %v5834_v37 = vcombine.high %v2563_v32, %v2571_v54  ;;  %v5836_v38 = vcombine.high %v2564_v59, %v2572_v33  ;;  %v5835_v9 = vcombine.low %v2564_v59, %v2572_v33  ;;  %v2581_v33 = vld [vmem:[%s7620_s24 + $0x320] sm:$0xff] }
 0xa55   : > { %v2439_v1 = vmul.f32 %v7962_v62, %v7962_v62  ;;  %3394 = vmatprep.subr.bf16.mxu0 %v5784_v35 }
 0xa56   : > { %3395 = vmatpush1.bf16.msra.mxu0 %v5783_v34 }
 0xa57   : > { %v2444_v2 = vsel %vm2426_vm12, %v2439_v1, 0.0  ;;  %3396 = vmatprep.subr.bf16.mxu0 %v5768_v44  ;;  %v5867_v1 = vcombine.low %v2596_v50, %v2604_v58  ;;  %v5833_v44 = vcombine.low %v2563_v32, %v2571_v54 }
 0xa58   : > { %2445 = vadd.xlane.f32.xlu0 %v2444_v2  ;;  %v5868_v2 = vcombine.high %v2596_v50, %v2604_v58  ;;  %v5802_v50 = vcombine.high %v2531_v48, %v2539_v49  ;;  %v2515_v58 = vld [vmem:[%s7620_s24 + $0x110] sm:$0xff] }
 0xa5a   : > { %3397 = vmatpush1.bf16.msra.mxu0 %v5767_v43  ;;  %v2556_v43 = vld [vmem:[%s7620_s24 + $0x258] sm:$0xff] }
 0xa5b   : > { %3398 = vmatprep.subr.bf16.mxu0 %v5752_v40  ;;  %v5820_v14 = vcombine.high %v2548_v42, %v2556_v43  ;;  %v2540_v40 = vld [vmem:[%s7620_s24 + $0x1d8] sm:$0xff]  ;;  %v5819_v45 = vcombine.low %v2548_v42, %v2556_v43  ;;  %v2565_v42 = vld [vmem:[%s7620_s24 + $0x2a0] sm:$0xff] }
 0xa5c   : > { %v2573_v43 = vld [vmem:[%s7620_s24 + $0x2e0] sm:$0xff] }
 0xa5d   : > { %v5838_v48 = vcombine.high %v2565_v42, %v2573_v43 }
 0xa5e   : > { %3399 = vmatpush1.bf16.msra.mxu0 %v5751_v26  ;;  %v2532_v26 = vld [vmem:[%s7620_s24 + $0x198] sm:$0xff] }
 0xa5f   : > { %3486 = vmatprep.subr.bf16.mxu0 %v5868_v2  ;;  %v5804_v56 = vcombine.high %v2532_v26, %v2540_v40  ;;  %v2524_v2 = vld [vmem:[%s7620_s24 + $0x158] sm:$0xff]  ;;  %v5803_v5 = vcombine.low %v2532_v26, %v2540_v40  ;;  %v2549_v26 = vld [vmem:[%s7620_s24 + $0x220] sm:$0xff] }
 0xa60   : > { %v2557_v40 = vld [vmem:[%s7620_s24 + $0x260] sm:$0xff] }
 0xa61   : > { %v6836_v24 = vpop.eup %6835 }
 0xa62   : > { %v2456_v11 = vmul.f32 %v6836_v24, %v7943_v30  ;;  %v2579_v30 = vld [vmem:[%s7620_s24 + $0x310] sm:$0xff] }
 0xa63   : > { %v5850_v15 = vcombine.high %v2579_v30, %v2587_v18  ;;  %v5849_v35 = vcombine.low %v2579_v30, %v2587_v18 }
 0xa64   : > { %v2466_v25 = vmul.f32 %v5747_v20, %v2456_v11 }
 0xa66   : > { %v8011_v27 = vadd.f32 %v5748_v16, %v2466_v25  ;;  %v2491_v25 = vld [vmem:[%s7620_s24 + $0x50] sm:$0xff] }
 0xadb   : > { %v2443_v7 = vpop.xlane.xlu1 %2442 }
 0xadc   : > { %v2448_v8 = vmul.f32 0.0078125, %v2443_v7 }
 0xade   : > { %v2451_v19 = vadd.f32 1e-05, %v2448_v8  ;;  %v2499_v8 = vld [vmem:[%s7620_s24 + $0x90] sm:$0xff] }
 0xae0   : > { %6837 = vrsqrt.f32 %v2451_v19  ;;  %v2507_v19 = vld [vmem:[%s7620_s24 + $0xd0] sm:$0xff] }
 0xae1   : > { %v2446_v10 = vpop.xlane.xlu0 %2445  ;;  %v5770_v11 = vcombine.high %v2499_v8, %v2507_v19 }
 0xae2   : > { %v2449_v28 = vmul.f32 0.0078125, %v2446_v10  ;;  %v2500_v10 = vld [vmem:[%s7620_s24 + $0x98] sm:$0xff] }
 0xae4   : > { %v2452_v23 = vadd.f32 1e-05, %v2449_v28  ;;  %v2508_v28 = vld [vmem:[%s7620_s24 + $0xd8] sm:$0xff] }
 0xae5   : > { %v5771_v30 = vcombine.low %v2500_v10, %v2508_v28 }
 0xae6   : > { %6839 = vrsqrt.f32 %v2452_v23 }
 0xaed   : > { %v6838_v12 = vpop.eup %6837 }
 0xaee   : > { %v2457_v13 = vmul.f32 %v6838_v12, %v7958_v55  ;;  %v2483_v12 = vld [vmem:[%s7620_s24 + $0x10] sm:$0xff] }
 0xaef   : > { %v5754_v18 = vcombine.high %v2483_v12, %v2491_v25 }
 0xaf0   : > { %v2467_v17 = vmul.f32 %v5747_v20, %v2457_v13  ;;  %v2484_v13 = vld [vmem:[%s7620_s24 + $0x18] sm:$0xff] }
 0xaf2   : > { %v8013_v3 = vadd.f32 %v5748_v16, %v2467_v17  ;;  %v5769_v17 = vcombine.low %v2499_v8, %v2507_v19 }
 0xaf3   : > { %v6840_v29 = vpop.eup %6839 }
 0xaf4   : > { %v8017_v55 = vpack.c.bf16 %v8013_v3, %v8011_v27  ;;  %v2458_v61 = vmul.f32 %v6840_v29, %v7962_v62  ;;  %v2605_v29 = vld [vmem:[%s7620_s24 + $0x3e0] sm:$0xff] }
 0xaf5   : > { %v5870_v54 = vcombine.high %v2597_v21, %v2605_v29 }
 0xaf6   : > { %v2468_v34 = vmul.f32 %v5747_v20, %v2458_v61  ;;  %3366 = vmatmul.mubr.bf16.vlgmr.msra.gmra.mxu1 %v8017_v55  ;;  %3417 = vmatmul.mubr.bf16.vlgmr.msra.gmra.mxu0 %v8017_v55  ;;  %v5772_v20 = vcombine.high %v2500_v10, %v2508_v28  ;;  %v2598_v61 = vld [vmem:[%s7620_s24 + $0x3a8] sm:$0xff]  ;;  %v2517_v10 = vld [vmem:[%s7620_s24 + $0x120] sm:$0xff] }
 0xaf7   : > { %3436 = vmatpush1.bf16.msra.mxu1 %v5865_v60  ;;  %3487 = vmatpush1.bf16.msra.mxu0 %v5867_v1  ;;  %v2523_v60 = vld [vmem:[%s7620_s24 + $0x150] sm:$0xff]  ;;  %v2516_v1 = vld [vmem:[%s7620_s24 + $0x118] sm:$0xff]  ;;  %v2525_v28 = vld [vmem:[%s7620_s24 + $0x160] sm:$0xff] }
 0xaf8   : > { %v8026_v62 = vadd.f32 %v5748_v16, %v2468_v34  ;;  %3437 = vmatprep.subr.bf16.mxu1 %v5850_v15  ;;  %3488 = vmatprep.subr.bf16.mxu0 %v5852_v31  ;;  %v5786_v6 = vcombine.high %v2515_v58, %v2523_v60  ;;  %v5788_v7 = vcombine.high %v2516_v1, %v2524_v2  ;;  %v2492_v16 = vld [vmem:[%s7620_s24 + $0x58] sm:$0xff]  ;;  %v2606_v15 = vld [vmem:[%s7620_s24 + $0x3e8] sm:$0xff]  ;;  %v2589_v34 = vld [vmem:[%s7620_s24 + $0x360] sm:$0xff] }
 0xaf9   : > { %3375 = vmatprep.mubr.bf16.mxu1 %v7218_v22  ;;  %3426 = vmatprep.mubr.bf16.mxu0 %v7218_v22  ;;  %v5785_v23 = vcombine.low %v2515_v58, %v2523_v60  ;;  %v5787_v24 = vcombine.low %v2516_v1, %v2524_v2  ;;  %v5756_v63 = vcombine.high %v2484_v13, %v2492_v16  ;;  %v2533_v1 = vld [vmem:[%s7620_s24 + $0x1a0] sm:$0xff] }
 0xafa   : > { %v8036_v46 = vpack.c.bf16 %v8026_v62, %v8026_v62  ;;  %v5753_v31 = vcombine.low %v2483_v12, %v2491_v25  ;;  %v5755_v32 = vcombine.low %v2484_v13, %v2492_v16  ;;  %v5872_v59 = vcombine.high %v2598_v61, %v2606_v15  ;;  %v2541_v2 = vld [vmem:[%s7620_s24 + $0x1e0] sm:$0xff] }
 0xafb   : > { %3438 = vmatpush1.bf16.msra.mxu1 %v5849_v35  ;;  %3489 = vmatpush1.bf16.msra.mxu0 %v5851_v36  ;;  %v2582_v35 = vld [vmem:[%s7620_s24 + $0x328] sm:$0xff]  ;;  %v5854_v39 = vcombine.high %v2581_v33, %v2589_v34  ;;  %v5822_v58 = vcombine.high %v2549_v26, %v2557_v40  ;;  %v5806_v8 = vcombine.high %v2533_v1, %v2541_v2  ;;  %v2501_v13 = vld [vmem:[%s7620_s24 + $0xa0] sm:$0xff] }
 0xafc   : > { %3439 = vmatprep.subr.bf16.mxu1 %v5834_v37  ;;  %3490 = vmatprep.subr.bf16.mxu0 %v5836_v38  ;;  %v2590_v36 = vld [vmem:[%s7620_s24 + $0x368] sm:$0xff]  ;;  %v5869_v37 = vcombine.low %v2597_v21, %v2605_v29  ;;  %v5871_v38 = vcombine.low %v2598_v61, %v2606_v15  ;;  %v5790_v12 = vcombine.high %v2517_v10, %v2525_v28  ;;  %v2509_v16 = vld [vmem:[%s7620_s24 + $0xe0] sm:$0xff] }
 0xafd   : > { %v5856_v41 = vcombine.high %v2582_v35, %v2590_v36  ;;  %v5774_v21 = vcombine.high %v2501_v13, %v2509_v16  ;;  %v2485_v61 = vld [vmem:[%s7620_s24 + $0x20] sm:$0xff] }
 0xafe   : > { %3376 = vmatmul.mubr.bf16.gmra.mxu1 %v8036_v46  ;;  %3427 = vmatmul.mubr.bf16.gmra.mxu0 %v8036_v46  ;;  %v2493_v15 = vld [vmem:[%s7620_s24 + $0x60] sm:$0xff] }
 0xaff   : > { %3440 = vmatpush1.bf16.msra.mxu1 %v5833_v44  ;;  %3491 = vmatpush1.bf16.msra.mxu0 %v5835_v9  ;;  %v2566_v44 = vld [vmem:[%s7620_s24 + $0x2a8] sm:$0xff] }
 0xb00   : > { %3441 = vmatprep.subr.bf16.mxu1 %v5818_v47  ;;  %3492 = vmatprep.subr.bf16.mxu0 %v5820_v14  ;;  %v2574_v9 = vld [vmem:[%s7620_s24 + $0x2e8] sm:$0xff]  ;;  %v5853_v47 = vcombine.low %v2581_v33, %v2589_v34  ;;  %v5855_v14 = vcombine.low %v2582_v35, %v2590_v36  ;;  %v5758_v33 = vcombine.high %v2485_v61, %v2493_v15  ;;  %v2599_v35 = vld [vmem:[%s7620_s24 + $0x3b0] sm:$0xff] }
 0xb01   : > { %3467 = vmatprep.mubr.bf16.mxu1 %v7218_v22  ;;  %3518 = vmatprep.mubr.bf16.mxu0 %v7218_v22  ;;  %v5840_v49 = vcombine.high %v2566_v44, %v2574_v9  ;;  %v2607_v36 = vld [vmem:[%s7620_s24 + $0x3f0] sm:$0xff] }
 0xb03   : > { %3442 = vmatpush1.bf16.msra.mxu1 %v5817_v53  ;;  %3493 = vmatpush1.bf16.msra.mxu0 %v5819_v45  ;;  %v2550_v53 = vld [vmem:[%s7620_s24 + $0x228] sm:$0xff] }
 0xb04   : > { %3443 = vmatprep.subr.bf16.mxu1 %v5802_v50  ;;  %3494 = vmatprep.subr.bf16.mxu0 %v5804_v56  ;;  %v2558_v45 = vld [vmem:[%s7620_s24 + $0x268] sm:$0xff]  ;;  %v5837_v50 = vcombine.low %v2565_v42, %v2573_v43  ;;  %v5839_v56 = vcombine.low %v2566_v44, %v2574_v9  ;;  %v5874_v42 = vcombine.high %v2599_v35, %v2607_v36  ;;  %v2583_v44 = vld [vmem:[%s7620_s24 + $0x330] sm:$0xff] }
 0xb05   : > { %v5824_v60 = vcombine.high %v2550_v53, %v2558_v45  ;;  %v2591_v9 = vld [vmem:[%s7620_s24 + $0x370] sm:$0xff] }
 0xb07   : > { %3444 = vmatpush1.bf16.msra.mxu1 %v5801_v4  ;;  %3495 = vmatpush1.bf16.msra.mxu0 %v5803_v5  ;;  %v2534_v4 = vld [vmem:[%s7620_s24 + $0x1a8] sm:$0xff] }
 0xb08   : > { %3445 = vmatprep.subr.bf16.mxu1 %v5786_v6  ;;  %3496 = vmatprep.subr.bf16.mxu0 %v5788_v7  ;;  %v2542_v5 = vld [vmem:[%s7620_s24 + $0x1e8] sm:$0xff]  ;;  %v5821_v6 = vcombine.low %v2549_v26, %v2557_v40  ;;  %v5823_v7 = vcombine.low %v2550_v53, %v2558_v45  ;;  %v5858_v26 = vcombine.high %v2583_v44, %v2591_v9  ;;  %v2567_v53 = vld [vmem:[%s7620_s24 + $0x2b0] sm:$0xff] }
 0xb09   : > { %v5808_v19 = vcombine.high %v2534_v4, %v2542_v5  ;;  %v2575_v45 = vld [vmem:[%s7620_s24 + $0x2f0] sm:$0xff] }
 0xb0b   : > { %3446 = vmatpush1.bf16.msra.mxu1 %v5785_v23  ;;  %3497 = vmatpush1.bf16.msra.mxu0 %v5787_v24  ;;  %v2518_v23 = vld [vmem:[%s7620_s24 + $0x128] sm:$0xff] }
 0xb0c   : > { %3447 = vmatprep.subr.bf16.mxu1 %v5770_v11  ;;  %3498 = vmatprep.subr.bf16.mxu0 %v5772_v20  ;;  %v2526_v24 = vld [vmem:[%s7620_s24 + $0x168] sm:$0xff]  ;;  %v5805_v11 = vcombine.low %v2533_v1, %v2541_v2  ;;  %v5807_v20 = vcombine.low %v2534_v4, %v2542_v5  ;;  %v5842_v1 = vcombine.high %v2567_v53, %v2575_v45  ;;  %v2551_v4 = vld [vmem:[%s7620_s24 + $0x230] sm:$0xff] }
 0xb0d   : > { %v5792_v25 = vcombine.high %v2518_v23, %v2526_v24  ;;  %v2559_v5 = vld [vmem:[%s7620_s24 + $0x270] sm:$0xff] }
 0xb0f   : > { %3448 = vmatpush1.bf16.msra.mxu1 %v5769_v17  ;;  %3499 = vmatpush1.bf16.msra.mxu0 %v5771_v30  ;;  %v2502_v17 = vld [vmem:[%s7620_s24 + $0xa8] sm:$0xff] }
 0xb10   : > { %3449 = vmatprep.subr.bf16.mxu1 %v5754_v18  ;;  %3500 = vmatprep.subr.bf16.mxu0 %v5756_v63  ;;  %v2510_v30 = vld [vmem:[%s7620_s24 + $0xe8] sm:$0xff]  ;;  %v5789_v18 = vcombine.low %v2517_v10, %v2525_v28  ;;  %v5791_v63 = vcombine.low %v2518_v23, %v2526_v24  ;;  %v5826_v10 = vcombine.high %v2551_v4, %v2559_v5  ;;  %v2535_v23 = vld [vmem:[%s7620_s24 + $0x1b0] sm:$0xff] }
 0xb11   : > { %v5776_v29 = vcombine.high %v2502_v17, %v2510_v30  ;;  %v2543_v24 = vld [vmem:[%s7620_s24 + $0x1f0] sm:$0xff] }
 0xb13   : > { %3450 = vmatpush1.bf16.msra.mxu1 %v5753_v31  ;;  %3501 = vmatpush1.bf16.msra.mxu0 %v5755_v32  ;;  %v2486_v31 = vld [vmem:[%s7620_s24 + $0x28] sm:$0xff] }
 0xb14   : > { %3537 = vmatprep.subr.bf16.mxu1 %v5870_v54  ;;  %3588 = vmatprep.subr.bf16.mxu0 %v5872_v59  ;;  %v2494_v32 = vld [vmem:[%s7620_s24 + $0x68] sm:$0xff]  ;;  %v5773_v54 = vcombine.low %v2501_v13, %v2509_v16  ;;  %v5775_v59 = vcombine.low %v2502_v17, %v2510_v30  ;;  %v5810_v13 = vcombine.high %v2535_v23, %v2543_v24  ;;  %v2519_v17 = vld [vmem:[%s7620_s24 + $0x130] sm:$0xff] }
 0xb15   : > { %v5760_v34 = vcombine.high %v2486_v31, %v2494_v32  ;;  %v2527_v30 = vld [vmem:[%s7620_s24 + $0x170] sm:$0xff] }
 0xb16   : > { %3468 = vmatmul.mubr.bf16.vlgmr.msra.gmra.mxu1 %v8017_v55  ;;  %3519 = vmatmul.mubr.bf16.vlgmr.msra.gmra.mxu0 %v8017_v55 }
 0xb17   : > { %3538 = vmatpush1.bf16.msra.mxu1 %v5869_v37  ;;  %3589 = vmatpush1.bf16.msra.mxu0 %v5871_v38  ;;  %v2600_v37 = vld [vmem:[%s7620_s24 + $0x3b8] sm:$0xff] }
 0xb18   : > { %3539 = vmatprep.subr.bf16.mxu1 %v5854_v39  ;;  %3590 = vmatprep.subr.bf16.mxu0 %v5856_v41  ;;  %v2608_v38 = vld [vmem:[%s7620_s24 + $0x3f8] sm:$0xff]  ;;  %v5757_v39 = vcombine.low %v2485_v61, %v2493_v15  ;;  %v5759_v41 = vcombine.low %v2486_v31, %v2494_v32  ;;  %v5794_v61 = vcombine.high %v2519_v17, %v2527_v30  ;;  %v2503_v31 = vld [vmem:[%s7620_s24 + $0xb0] sm:$0xff] }
 0xb19   : > { %3477 = vmatprep.mubr.bf16.mxu1 %v7218_v22  ;;  %3528 = vmatprep.mubr.bf16.mxu0 %v7218_v22  ;;  %v5876_v43 = vcombine.high %v2600_v37, %v2608_v38  ;;  %v2511_v32 = vld [vmem:[%s7620_s24 + $0xf0] sm:$0xff] }
 0xb1b   : > { %3540 = vmatpush1.bf16.msra.mxu1 %v5853_v47  ;;  %3591 = vmatpush1.bf16.msra.mxu0 %v5855_v14  ;;  %v2584_v47 = vld [vmem:[%s7620_s24 + $0x338] sm:$0xff] }
 0xb1c   : > { %3541 = vmatprep.subr.bf16.mxu1 %v5838_v48  ;;  %3592 = vmatprep.subr.bf16.mxu0 %v5840_v49  ;;  %v2592_v14 = vld [vmem:[%s7620_s24 + $0x378] sm:$0xff]  ;;  %v5873_v48 = vcombine.low %v2599_v35, %v2607_v36  ;;  %v5875_v49 = vcombine.low %v2600_v37, %v2608_v38  ;;  %v5778_v35 = vcombine.high %v2503_v31, %v2511_v32  ;;  %v2487_v37 = vld [vmem:[%s7620_s24 + $0x30] sm:$0xff] }
 0xb1d   : > { %v5860_v40 = vcombine.high %v2584_v47, %v2592_v14  ;;  %v2495_v38 = vld [vmem:[%s7620_s24 + $0x70] sm:$0xff] }
 0xb1e   : > { %3478 = vmatmul.mubr.bf16.gmra.mxu1 %v8036_v46  ;;  %3529 = vmatmul.mubr.bf16.gmra.mxu0 %v8036_v46 }
 0xb1f   : > { %3542 = vmatpush1.bf16.msra.mxu1 %v5837_v50  ;;  %3593 = vmatpush1.bf16.msra.mxu0 %v5839_v56  ;;  %v2568_v50 = vld [vmem:[%s7620_s24 + $0x2b8] sm:$0xff] }
 0xb20   : > { %3543 = vmatprep.subr.bf16.mxu1 %v5822_v58  ;;  %3594 = vmatprep.subr.bf16.mxu0 %v5824_v60  ;;  %v2576_v56 = vld [vmem:[%s7620_s24 + $0x2f8] sm:$0xff]  ;;  %v5857_v58 = vcombine.low %v2583_v44, %v2591_v9  ;;  %v5859_v60 = vcombine.low %v2584_v47, %v2592_v14  ;;  %v5762_v44 = vcombine.high %v2487_v37, %v2495_v38 }
 0xb21   : > { %3569 = vmatprep.mubr.bf16.mxu1 %v7218_v22  ;;  %3620 = vmatprep.mubr.bf16.mxu0 %v7218_v22  ;;  %v5844_v2 = vcombine.high %v2568_v50, %v2576_v56  ;;  %v5761_v47 = vcombine.low %v2487_v37, %v2495_v38 }
 0xb23   : > { %3544 = vmatpush1.bf16.msra.mxu1 %v5821_v6  ;;  %3595 = vmatpush1.bf16.msra.mxu0 %v5823_v7  ;;  %v2552_v6 = vld [vmem:[%s7620_s24 + $0x238] sm:$0xff] }
 0xb24   : > { %3545 = vmatprep.subr.bf16.mxu1 %v5806_v8  ;;  %3596 = vmatprep.subr.bf16.mxu0 %v5808_v19  ;;  %v2560_v7 = vld [vmem:[%s7620_s24 + $0x278] sm:$0xff]  ;;  %v5841_v8 = vcombine.low %v2567_v53, %v2575_v45  ;;  %v5843_v19 = vcombine.low %v2568_v50, %v2576_v56  ;;  %v6679_v53 = vld [vmem:[%s7624_s0 + $0x70] sm:$0xff]  }
 0xb25   : > { %v5828_v28 = vcombine.high %v2552_v6, %v2560_v7  ;;  %v6680_v45 = vld [vmem:[%s7624_s0 + $0xf0] sm:$0xff]  }
 0xb26   : > { %v6681_v50 = vld [vmem:[%s7624_s0 + $0x30] sm:$0xff]  }
 0xb27   : > { %3546 = vmatpush1.bf16.msra.mxu1 %v5805_v11  ;;  %3597 = vmatpush1.bf16.msra.mxu0 %v5807_v20  ;;  %v2536_v11 = vld [vmem:[%s7620_s24 + $0x1b8] sm:$0xff]  ;;  %v6682_v56 = vld [vmem:[%s7624_s0 + $0xb0] sm:$0xff]  }
 0xb28   : > { %3547 = vmatprep.subr.bf16.mxu1 %v5790_v12  ;;  %3598 = vmatprep.subr.bf16.mxu0 %v5792_v25  ;;  %v2544_v20 = vld [vmem:[%s7620_s24 + $0x1f8] sm:$0xff]  ;;  %v5825_v12 = vcombine.low %v2551_v4, %v2559_v5  ;;  %v5827_v25 = vcombine.low %v2552_v6, %v2560_v7  ;;  %v6689_v4 = vld [vmem:[%s7624_s0 + $0x20] sm:$0xff]  }
 0xb29   : > { %v5812_v16 = vcombine.high %v2536_v11, %v2544_v20  ;;  %v6690_v5 = vld [vmem:[%s7624_s0 + $0xa0] sm:$0xff]   ;;  %v6691_v6 = vld [vmem:[%s7624_s0 + $0x58] sm:$0xff]  }
 0xb2a   : > { %v6692_v7 = vld [vmem:[%s7624_s0 + $0xd8] sm:$0xff]  }
 0xb2b   : > { %3548 = vmatpush1.bf16.msra.mxu1 %v5789_v18  ;;  %3599 = vmatpush1.bf16.msra.mxu0 %v5791_v63  ;;  %v2520_v18 = vld [vmem:[%s7620_s24 + $0x138] sm:$0xff] }
 0xb2c   : > { %3549 = vmatprep.subr.bf16.mxu1 %v5774_v21  ;;  %3600 = vmatprep.subr.bf16.mxu0 %v5776_v29  ;;  %v2528_v63 = vld [vmem:[%s7620_s24 + $0x178] sm:$0xff]  ;;  %v5809_v21 = vcombine.low %v2535_v23, %v2543_v24  ;;  %v5811_v29 = vcombine.low %v2536_v11, %v2544_v20  ;;  %v6698_v23 = vld [vmem:[%s7624_s0 + $0x90] sm:$0xff]   ;;  %v6699_v24 = vld [vmem:[%s7624_s0 + $0x48] sm:$0xff]  }
 0xb2d   : > { %v5796_v15 = vcombine.high %v2520_v18, %v2528_v63  ;;  %v6700_v11 = vld [vmem:[%s7624_s0 + $0xc8] sm:$0xff]  }
 0xb2e   : > { %v6701_v20 = vld [vmem:[%s7624_s0 + $0x8] sm:$0xff]  }
 0xb2f   : > { %3550 = vmatpush1.bf16.msra.mxu1 %v5773_v54  ;;  %3601 = vmatpush1.bf16.msra.mxu0 %v5775_v59  ;;  %v2504_v54 = vld [vmem:[%s7620_s24 + $0xb8] sm:$0xff] }
 0xb30   : > { %3551 = vmatprep.subr.bf16.mxu1 %v5758_v33  ;;  %3602 = vmatprep.subr.bf16.mxu0 %v5760_v34  ;;  %v2512_v59 = vld [vmem:[%s7620_s24 + $0xf8] sm:$0xff]  ;;  %v5793_v33 = vcombine.low %v2519_v17, %v2527_v30  ;;  %v5795_v34 = vcombine.low %v2520_v18, %v2528_v63  ;;  %v6706_v17 = vld [vmem:[%s7624_s0 + $0x80] sm:$0xff]   ;;  %v2627_v63 = vsub.s32 3, %v7694_v51 }
 0xb31   : > { %v5780_v36 = vcombine.high %v2504_v54, %v2512_v59  ;;  %v6707_v30 = vld [vmem:[%s7624_s0 + $0x178] sm:$0xff]  }
 0xb32   : > { %v6708_v18 = vld [vmem:[%s7624_s0 + $0x1f8] sm:$0xff]  }
 0xb33   : > { %3552 = vmatpush1.bf16.msra.mxu1 %v5757_v39  ;;  %3603 = vmatpush1.bf16.msra.mxu0 %v5759_v41  ;;  %v2488_v39 = vld [vmem:[%s7620_s24 + $0x38] sm:$0xff] }
 0xb34   : > { %3639 = vmatprep.subr.bf16.mxu1 %v5874_v42  ;;  %3690 = vmatprep.subr.bf16.mxu0 %v5876_v43  ;;  %v2496_v41 = vld [vmem:[%s7620_s24 + $0x78] sm:$0xff]  ;;  %v5777_v42 = vcombine.low %v2503_v31, %v2511_v32  ;;  %v5779_v43 = vcombine.low %v2504_v54, %v2512_v59 }
 0xb35   : > { %v5764_v9 = vcombine.high %v2488_v39, %v2496_v41  ;;  %v5763_v14 = vcombine.low %v2488_v39, %v2496_v41 }
 0xb36   : > { %3570 = vmatmul.mubr.bf16.vlgmr.msra.gmra.mxu1 %v8017_v55  ;;  %3621 = vmatmul.mubr.bf16.vlgmr.msra.gmra.mxu0 %v8017_v55 }
 0xb37   : > { %3640 = vmatpush1.bf16.msra.mxu1 %v5873_v48  ;;  %3691 = vmatpush1.bf16.msra.mxu0 %v5875_v49  ;;  %v6675_v48 = vld [vmem:[%s7624_s0 + $0x78] sm:$0xff]  }
 0xb38   : > { %3641 = vmatprep.subr.bf16.mxu1 %v5858_v26  ;;  %3692 = vmatprep.subr.bf16.mxu0 %v5860_v40  ;;  %v6676_v49 = vld [vmem:[%s7624_s0 + $0xf8] sm:$0xff]  }
 0xb39   : > { %3579 = vmatprep.mubr.bf16.mxu1 %v7218_v22  ;;  %3630 = vmatprep.mubr.bf16.mxu0 %v7218_v22  ;;  %v6677_v26 = vld [vmem:[%s7624_s0 + $0x38] sm:$0xff]  }
 0xb3a   : > { %v6678_v40 = vld [vmem:[%s7624_s0 + $0xb8] sm:$0xff]  }
 0xb3b   : > { %3642 = vmatpush1.bf16.msra.mxu1 %v5857_v58  ;;  %3693 = vmatpush1.bf16.msra.mxu0 %v5859_v60  ;;  %v6683_v58 = vld [vmem:[%s7624_s0 + $0x68] sm:$0xff]  }
 0xb3c   : > { %3643 = vmatprep.subr.bf16.mxu1 %v5842_v1  ;;  %3694 = vmatprep.subr.bf16.mxu0 %v5844_v2  ;;  %v6684_v60 = vld [vmem:[%s7624_s0 + $0xe8] sm:$0xff]   ;;  %v6688_v2 = vld [vmem:[%s7624_s0 + $0xe0] sm:$0xff]  }
 0xb3d   : > { %v6686_v1 = vld [vmem:[%s7624_s0 + $0xa8] sm:$0xff]  }
 0xb3e   : > { %3580 = vmatmul.mubr.bf16.gmra.mxu1 %v8036_v46  ;;  %3631 = vmatmul.mubr.bf16.gmra.mxu0 %v8036_v46 }
 0xb3f   : > { %3644 = vmatpush1.bf16.msra.mxu1 %v5841_v8  ;;  %3695 = vmatpush1.bf16.msra.mxu0 %v5843_v19  ;;  %v6693_v8 = vld [vmem:[%s7624_s0 + $0x18] sm:$0xff]  }
 0xb40   : > { %3645 = vmatprep.subr.bf16.mxu1 %v5826_v10  ;;  %3696 = vmatprep.subr.bf16.mxu0 %v5828_v28  ;;  %v6694_v19 = vld [vmem:[%s7624_s0 + $0x98] sm:$0xff]   ;;  %v6696_v10 = vld [vmem:[%s7624_s0 + $0xd0] sm:$0xff]  }
 0xb41   : > { %3671 = vmatprep.mubr.bf16.mxu1 %v7218_v22  ;;  %3722 = vmatprep.mubr.bf16.mxu0 %v7218_v22  ;;  %v6697_v28 = vld [vmem:[%s7624_s0 + $0x10] sm:$0xff]  }
 0xb43   : > { %3646 = vmatpush1.bf16.msra.mxu1 %v5825_v12  ;;  %3697 = vmatpush1.bf16.msra.mxu0 %v5827_v25  ;;  %v6702_v12 = vld [vmem:[%s7624_s0 + $0x88] sm:$0xff]   ;;  %v6703_v25 = vld [vmem:[%s7624_s0 + $0x40] sm:$0xff]  }
 0xb44   : > { %3647 = vmatprep.subr.bf16.mxu1 %v5810_v13  ;;  %3698 = vmatprep.subr.bf16.mxu0 %v5812_v16  ;;  %v6704_v13 = vld [vmem:[%s7624_s0 + $0xc0] sm:$0xff]  }
 0xb45   : > { %v6705_v16 = vld [vmem:[%s7624_s0] sm:$0xff]  }
 0xb47   : > { %3648 = vmatpush1.bf16.msra.mxu1 %v5809_v21  ;;  %3699 = vmatpush1.bf16.msra.mxu0 %v5811_v29  ;;  %v8180_v21 = vld [vmem:[%s7622_s9] sm:$0xff] }
 0xb48   : > { %3649 = vmatprep.subr.bf16.mxu1 %v5794_v61  ;;  %3700 = vmatprep.subr.bf16.mxu0 %v5796_v15  ;;  %v2620_v15 = vrot.slane %v8180_v21, %v7702_v57  ;;  %v2628_v31 = vrot.slane %v8180_v21, %v2627_v63  ;;  %v2616_v32 = vrot.slane %v8180_v21, %v7697_v52 }
 0xb49   : > { %v2624_v54 = vrot.slane %v8180_v21, %v7714_v0 }
 0xb4b   : > { %3650 = vmatpush1.bf16.msra.mxu1 %v5793_v33  ;;  %3701 = vmatpush1.bf16.msra.mxu0 %v5795_v34 }
 0xb4c   : > { %3651 = vmatprep.subr.bf16.mxu1 %v5778_v35  ;;  %3702 = vmatprep.subr.bf16.mxu0 %v5780_v36 }
 0xb4f   : > { %3652 = vmatpush1.bf16.msra.mxu1 %v5777_v42  ;;  %3703 = vmatpush1.bf16.msra.mxu0 %v5779_v43 }
 0xb50   : > { %3653 = vmatprep.subr.bf16.mxu1 %v5762_v44  ;;  %3704 = vmatprep.subr.bf16.mxu0 %v5764_v9 }
 0xb53   : > { %3654 = vmatpush1.bf16.msra.mxu1 %v5761_v47  ;;  %3705 = vmatpush1.bf16.msra.mxu0 %v5763_v14 }
 0xb54   : > { %6087 = vmatprep.subr.bf16.mxu1 %v6675_v48  ;;  %6115 = vmatprep.subr.bf16.mxu0 %v6676_v49 }
 0xb56   : > { %3672 = vmatmul.mubr.bf16.vlgmr.msra.gmra.mxu1 %v8017_v55  ;;  %3723 = vmatmul.mubr.bf16.vlgmr.msra.gmra.mxu0 %v8017_v55  ;;  %v6685_v55 = vld [vmem:[%s7624_s0 + $0x28] sm:$0xff]  }
 0xb57   : > { %3681 = vmatprep.mubr.bf16.mxu1 %v7218_v22  ;;  %3732 = vmatprep.mubr.bf16.mxu0 %v7218_v22  ;;  %v6687_v22 = vld [vmem:[%s7624_s0 + $0x60] sm:$0xff]  }
 0xb58   : > { %6088 = vmatpush3.bf16.msra.mxu1 %v6677_v26  ;;  %6116 = vmatpush3.bf16.msra.mxu0 %v6678_v40 }
 0xb59   : > { %6089 = vmatprep.subr.bf16.mxu1 %v6679_v53  ;;  %6117 = vmatprep.subr.bf16.mxu0 %v6680_v45 }
 0xb5c   : > { %6090 = vmatpush3.bf16.msra.mxu1 %v6681_v50  ;;  %6118 = vmatpush3.bf16.msra.mxu0 %v6682_v56 }
 0xb5d   : > { %6091 = vmatprep.subr.bf16.mxu1 %v6683_v58  ;;  %6119 = vmatprep.subr.bf16.mxu0 %v6684_v60 }
 0xb5e   : > { %3682 = vmatmul.mubr.bf16.gmra.mxu1 %v8036_v46  ;;  %3733 = vmatmul.mubr.bf16.gmra.mxu0 %v8036_v46  ;;  %v6695_v46 = vld [vmem:[%s7624_s0 + $0x50] sm:$0xff]  }
 0xb60   : > { %6092 = vmatpush3.bf16.msra.mxu1 %v6685_v55  ;;  %6120 = vmatpush3.bf16.msra.mxu0 %v6686_v1 }
 0xb61   : > { %6093 = vmatprep.subr.bf16.mxu1 %v6687_v22  ;;  %6121 = vmatprep.subr.bf16.mxu0 %v6688_v2 }
 0xb64   : > { %6094 = vmatpush3.bf16.msra.mxu1 %v6689_v4  ;;  %6122 = vmatpush3.bf16.msra.mxu0 %v6690_v5  ;;  %v6709_v5 = vld [vmem:[%s7624_s0 + $0x138] sm:$0xff]  }
 0xb65   : > { %6095 = vmatprep.subr.bf16.mxu1 %v6691_v6  ;;  %6123 = vmatprep.subr.bf16.mxu0 %v6692_v7  ;;  %v6710_v6 = vld [vmem:[%s7624_s0 + $0x1b8] sm:$0xff]  }
 0xb68   : > { %6096 = vmatpush3.bf16.msra.mxu1 %v6693_v8  ;;  %6124 = vmatpush3.bf16.msra.mxu0 %v6694_v19 }
 0xb69   : > { %6097 = vmatprep.subr.bf16.mxu1 %v6695_v46  ;;  %6125 = vmatprep.subr.bf16.mxu0 %v6696_v10 }
 0xb6c   : > { %6098 = vmatpush3.bf16.msra.mxu1 %v6697_v28  ;;  %6126 = vmatpush3.bf16.msra.mxu0 %v6698_v23  ;;  %v6711_v23 = vld [vmem:[%s7624_s0 + $0x170] sm:$0xff]  }
 0xb6d   : > { %6099 = vmatprep.subr.bf16.mxu1 %v6699_v24  ;;  %6127 = vmatprep.subr.bf16.mxu0 %v6700_v11  ;;  %v6712_v24 = vld [vmem:[%s7624_s0 + $0x1f0] sm:$0xff]  }
 0xb70   : > { %6100 = vmatpush3.bf16.msra.mxu1 %v6701_v20  ;;  %6128 = vmatpush3.bf16.msra.mxu0 %v6702_v12 }
 0xb71   : > { %6101 = vmatprep.subr.bf16.mxu1 %v6703_v25  ;;  %6129 = vmatprep.subr.bf16.mxu0 %v6704_v13 }
 0xb74   : > { %6102 = vmatpush3.bf16.msra.mxu1 %v6705_v16  ;;  %6130 = vmatpush3.bf16.msra.mxu0 %v6706_v17  ;;  %v6713_v17 = vld [vmem:[%s7624_s0 + $0x130] sm:$0xff]  }
 0xb75   : > { %6143 = vmatprep.subr.bf16.mxu1 %v6707_v30  ;;  %6171 = vmatprep.subr.bf16.mxu0 %v6708_v18  ;;  %v6714_v30 = vld [vmem:[%s7624_s0 + $0x1b0] sm:$0xff]  }
 0xbb6   : > { %v3367_v29 = vpop.f32.mrf.mxu1  ;;  %v3418_v61 = vpop.f32.mrf.mxu0 }
 0xbb7   : > { %v3368_v41 = vadd.f32 %v3367_v29, %v2616_v32  ;;  %v3419_v42 = vadd.f32 %v3418_v61, %v2624_v54  ;;  %v6715_v61 = vld [vmem:[%s7624_s0 + $0x168] sm:$0xff]  }
 0xbb8   : > { %v3369_v59 = vpop.f32.mrf.mxu1  ;;  %v3420_v33 = vpop.f32.mrf.mxu0 }
 0xbb9   : > { %v3370_v36 = vadd.f32 %v3369_v59, %v2620_v15  ;;  %v3421_v37 = vadd.f32 %v3420_v33, %v2628_v31  ;;  %v3741_v56 = vmax.f32 %v3368_v41, 0.0  ;;  %v3743_v58 = vmax.f32 %v3419_v42, 0.0  ;;  %v6719_v33 = vld [vmem:[%s7624_s0 + $0x160] sm:$0xff]   ;;  %v6726_v41 = vld [vmem:[%s7624_s0 + $0x198] sm:$0xff]  }
 0xbba   : > { %v3371_v34 = vpop.f32.mrf.mxu1  ;;  %v3422_v35 = vpop.f32.mrf.mxu0  ;;  %v2635_v42 = vsub.s32 5, %v7694_v51 }
 0xbbb   : > { %v3372_v38 = vadd.f32 %v3371_v34, %v2616_v32  ;;  %v3423_v39 = vadd.f32 %v3422_v35, %v2624_v54  ;;  %v3742_v40 = vmax.f32 %v3370_v36, 0.0  ;;  %v3744_v53 = vmax.f32 %v3421_v37, 0.0  ;;  %v6720_v34 = vld [vmem:[%s7624_s0 + $0x1e0] sm:$0xff]   ;;  %v6723_v37 = vld [vmem:[%s7624_s0 + $0x158] sm:$0xff]  }
 0xbbc   : > { %v3373_v43 = vpop.f32.mrf.mxu1  ;;  %v3424_v44 = vpop.f32.mrf.mxu0  ;;  %v6721_v35 = vld [vmem:[%s7624_s0 + $0x120] sm:$0xff]  }
 0xbbd   : > { %v3374_v9 = vadd.f32 %v3373_v43, %v2620_v15  ;;  %v3425_v47 = vadd.f32 %v3424_v44, %v2628_v31  ;;  %v3757_v14 = vmax.f32 %v3372_v38, 0.0  ;;  %v3759_v48 = vmax.f32 %v3423_v39, 0.0  ;;  %v6722_v36 = vld [vmem:[%s7624_s0 + $0x1a0] sm:$0xff]   ;;  %v6724_v38 = vld [vmem:[%s7624_s0 + $0x1d8] sm:$0xff]   ;;  %v6727_v43 = vld [vmem:[%s7624_s0 + $0x150] sm:$0xff]  }
 0xbbe   : > { %v3377_v49 = vpop.f32.mrf.mxu1  ;;  %v3428_v26 = vpop.f32.mrf.mxu0  ;;  %v6725_v39 = vld [vmem:[%s7624_s0 + $0x118] sm:$0xff]   ;;  %v6728_v44 = vld [vmem:[%s7624_s0 + $0x1d0] sm:$0xff]  }
 0xbbf   : > { %v3758_v45 = vmax.f32 %v3374_v9, 0.0  ;;  %v3760_v50 = vmax.f32 %v3425_v47, 0.0  ;;  %v3789_v7 = vpack.c.bf16 %v3757_v14, %v3741_v56  ;;  %v3791_v8 = vpack.c.bf16 %v3759_v48, %v3743_v58  ;;  %v6729_v48 = vld [vmem:[%s7624_s0 + $0x110] sm:$0xff]  }
 0xbc0   : > { %v3379_v60 = vpop.f32.mrf.mxu1  ;;  %v3430_v55 = vpop.f32.mrf.mxu0  ;;  %v3378_v19 = vadd.f32 %v3377_v49, %v2616_v32  ;;  %v3429_v46 = vadd.f32 %v3428_v26, %v2624_v54  ;;  %v6718_v32 = vld [vmem:[%s7624_s0 + $0x1a8] sm:$0xff]   ;;  %v2643_v9 = vsub.s32 7, %v7694_v51  ;;  %v2631_v47 = vsub.s32 4, %v7694_v51  ;;  %v6730_v49 = vld [vmem:[%s7624_s0 + $0x190] sm:$0xff]  }
 0xbc1   : > { %v3790_v1 = vpack.c.bf16 %v3758_v45, %v3742_v40  ;;  %v3792_v22 = vpack.c.bf16 %v3760_v50, %v3744_v53  ;;  %v3380_v2 = vadd.f32 %v3379_v60, %v2620_v15  ;;  %v3431_v4 = vadd.f32 %v3430_v55, %v2628_v31  ;;  %v6716_v15 = vld [vmem:[%s7624_s0 + $0x1e8] sm:$0xff]  }
 0xbc2   : > { %v3381_v10 = vpop.f32.mrf.mxu1  ;;  %v3432_v28 = vpop.f32.mrf.mxu0  ;;  %v3773_v18 = vmax.f32 %v3378_v19, 0.0  ;;  %v3775_v29 = vmax.f32 %v3429_v46, 0.0  ;;  %v6717_v31 = vld [vmem:[%s7624_s0 + $0x128] sm:$0xff]   ;;  %v2639_v14 = vsub.s32 6, %v7694_v51  ;;  %v2636_v53 = vrot.slane %v8180_v21, %v2635_v42  ;;  %v6800_v51 = vld [vmem:[%s7624_s0 + $0x3c0] sm:$0xff]  }
 0xbc3   : > { %v3774_v11 = vmax.f32 %v3380_v2, 0.0  ;;  %v3776_v20 = vmax.f32 %v3431_v4, 0.0  ;;  %4884 = vmatprep.mubr.bf16.mxu1 %v3790_v1  ;;  %4932 = vmatprep.mubr.bf16.mxu0 %v3792_v22  ;;  %v6731_v45 = vld [vmem:[%s7624_s0 + $0x148] sm:$0xff]   ;;  %v2644_v56 = vrot.slane %v8180_v21, %v2643_v9  ;;  %v2632_v58 = vrot.slane %v8180_v21, %v2631_v47 }
 0xbc4   : > { %v3382_v12 = vpop.f32.mrf.mxu1  ;;  %v3433_v25 = vpop.f32.mrf.mxu0  ;;  %4885 = vmatmul.mubr.bf16.vlgmr.msra.gmra.mxu1 %v3789_v7  ;;  %4933 = vmatmul.mubr.bf16.vlgmr.msra.gmra.mxu0 %v3791_v8  ;;  %v3805_v54 = vpack.c.bf16 %v3773_v18, %v3773_v18  ;;  %v3807_v59 = vpack.c.bf16 %v3775_v29, %v3775_v29  ;;  %v6732_v50 = vld [vmem:[%s7624_s0 + $0x1c8] sm:$0xff]   ;;  %v2640_v60 = vrot.slane %v8180_v21, %v2639_v14  ;;  %v6735_v7 = vld [vmem:[%s7624_s0 + $0x140] sm:$0xff]   ;;  %v6739_v18 = vld [vmem:[%s7624_s0 + $0x278] sm:$0xff]  }
 0xbc5   : > { %v3806_v13 = vpack.c.bf16 %v3774_v11, %v3774_v11  ;;  %v3808_v16 = vpack.c.bf16 %v3776_v20, %v3776_v20  ;;  %6144 = vmatpush3.bf16.msra.mxu1 %v6709_v5  ;;  %6172 = vmatpush3.bf16.msra.mxu0 %v6710_v6  ;;  %v6733_v22 = vld [vmem:[%s7624_s0 + $0x108] sm:$0xff]   ;;  %v6736_v8 = vld [vmem:[%s7624_s0 + $0x1c0] sm:$0xff]  }
 0xbc6   : > { %6145 = vmatprep.subr.bf16.mxu1 %v6711_v23  ;;  %6173 = vmatprep.subr.bf16.mxu0 %v6712_v24  ;;  %v6734_v2 = vld [vmem:[%s7624_s0 + $0x188] sm:$0xff]   ;;  %v6737_v12 = vld [vmem:[%s7624_s0 + $0x100] sm:$0xff]  }
 0xbc7   : > { %4892 = vmatprep.mubr.bf16.mxu1 %v3806_v13  ;;  %4940 = vmatprep.mubr.bf16.mxu0 %v3808_v16 }
 0xbc9   : > { %6146 = vmatpush3.bf16.msra.mxu1 %v6713_v17  ;;  %6174 = vmatpush3.bf16.msra.mxu0 %v6714_v30  ;;  %v6738_v30 = vld [vmem:[%s7624_s0 + $0x180] sm:$0xff]  }
 0xbca   : > { %6147 = vmatprep.subr.bf16.mxu1 %v6715_v61  ;;  %6175 = vmatprep.subr.bf16.mxu0 %v6716_v15 }
 0xbcc   : > { %4893 = vmatmul.mubr.bf16.gmra.mxu1 %v3805_v54  ;;  %4941 = vmatmul.mubr.bf16.gmra.mxu0 %v3807_v59 }
 0xbcd   : > { %6148 = vmatpush3.bf16.msra.mxu1 %v6717_v31  ;;  %6176 = vmatpush3.bf16.msra.mxu0 %v6718_v32 }
 0xbce   : > { %6149 = vmatprep.subr.bf16.mxu1 %v6719_v33  ;;  %6177 = vmatprep.subr.bf16.mxu0 %v6720_v34  ;;  %v6740_v34 = vld [vmem:[%s7624_s0 + $0x2f8] sm:$0xff]  }
 0xbd1   : > { %6150 = vmatpush3.bf16.msra.mxu1 %v6721_v35  ;;  %6178 = vmatpush3.bf16.msra.mxu0 %v6722_v36 }
 0xbd2   : > { %6151 = vmatprep.subr.bf16.mxu1 %v6723_v37  ;;  %6179 = vmatprep.subr.bf16.mxu0 %v6724_v38 }
 0xbd5   : > { %6152 = vmatpush3.bf16.msra.mxu1 %v6725_v39  ;;  %6180 = vmatpush3.bf16.msra.mxu0 %v6726_v41  ;;  %v6741_v39 = vld [vmem:[%s7624_s0 + $0x238] sm:$0xff]  }
 0xbd6   : > { %v3469_v26 = vpop.f32.mrf.mxu1  ;;  %v3520_v40 = vpop.f32.mrf.mxu0  ;;  %6153 = vmatprep.subr.bf16.mxu1 %v6727_v43  ;;  %6181 = vmatprep.subr.bf16.mxu0 %v6728_v44 }
 0xbd7   : > { %v3470_v28 = vadd.f32 %v3469_v26, %v2632_v58  ;;  %v3521_v21 = vadd.f32 %v3520_v40, %v2640_v60  ;;  %v6743_v26 = vld [vmem:[%s7624_s0 + $0x270] sm:$0xff]  }
 0xbd8   : > { %v3471_v55 = vpop.f32.mrf.mxu1  ;;  %v3522_v1 = vpop.f32.mrf.mxu0 }
 0xbd9   : > { %6154 = vmatpush3.bf16.msra.mxu1 %v6729_v48  ;;  %6182 = vmatpush3.bf16.msra.mxu0 %v6730_v49  ;;  %v3472_v4 = vadd.f32 %v3471_v55, %v2636_v53  ;;  %v3523_v19 = vadd.f32 %v3522_v1, %v2644_v56  ;;  %v3745_v32 = vmax.f32 %v3470_v28, 0.0  ;;  %v3747_v54 = vmax.f32 %v3521_v21, 0.0  ;;  %v6742_v49 = vld [vmem:[%s7624_s0 + $0x2b8] sm:$0xff]   ;;  %v6752_v21 = vld [vmem:[%s7624_s0 + $0x2e0] sm:$0xff]  }
 0xbda   : > { %v3473_v5 = vpop.f32.mrf.mxu1  ;;  %v3524_v6 = vpop.f32.mrf.mxu0  ;;  %6155 = vmatprep.subr.bf16.mxu1 %v6731_v45  ;;  %6183 = vmatprep.subr.bf16.mxu0 %v6732_v50 }
 0xbdb   : > { %v3474_v46 = vadd.f32 %v3473_v5, %v2632_v58  ;;  %v3525_v10 = vadd.f32 %v3524_v6, %v2640_v60  ;;  %v3746_v25 = vmax.f32 %v3472_v4, 0.0  ;;  %v3748_v29 = vmax.f32 %v3523_v19, 0.0  ;;  %v6746_v4 = vld [vmem:[%s7624_s0 + $0x2b0] sm:$0xff]   ;;  %v6747_v5 = vld [vmem:[%s7624_s0 + $0x268] sm:$0xff]  }
 0xbdc   : > { %v3475_v23 = vpop.f32.mrf.mxu1  ;;  %v3526_v24 = vpop.f32.mrf.mxu0 }
 0xbdd   : > { %v3476_v11 = vadd.f32 %v3475_v23, %v2636_v53  ;;  %v3527_v20 = vadd.f32 %v3526_v24, %v2644_v56  ;;  %6156 = vmatpush3.bf16.msra.mxu1 %v6733_v22  ;;  %6184 = vmatpush3.bf16.msra.mxu0 %v6734_v2  ;;  %v3761_v13 = vmax.f32 %v3474_v46, 0.0  ;;  %v3763_v61 = vmax.f32 %v3525_v10, 0.0  ;;  %v6745_v2 = vld [vmem:[%s7624_s0 + $0x230] sm:$0xff]   ;;  %v6750_v46 = vld [vmem:[%s7624_s0 + $0x2a8] sm:$0xff]   ;;  %v6751_v10 = vld [vmem:[%s7624_s0 + $0x260] sm:$0xff]  }
 0xbde   : > { %v3479_v16 = vpop.f32.mrf.mxu1  ;;  %v3530_v17 = vpop.f32.mrf.mxu0  ;;  %6157 = vmatprep.subr.bf16.mxu1 %v6735_v7  ;;  %6185 = vmatprep.subr.bf16.mxu0 %v6736_v8  ;;  %v6748_v7 = vld [vmem:[%s7624_s0 + $0x2e8] sm:$0xff]   ;;  %v6753_v23 = vld [vmem:[%s7624_s0 + $0x220] sm:$0xff]  }
 0xbdf   : > { %v3762_v15 = vmax.f32 %v3476_v11, 0.0  ;;  %v3764_v31 = vmax.f32 %v3527_v20, 0.0  ;;  %v3793_v41 = vpack.c.bf16 %v3761_v13, %v3745_v32  ;;  %v3480_v43 = vadd.f32 %v3479_v16, %v2632_v58  ;;  %v6744_v58 = vld [vmem:[%s7624_s0 + $0x2f0] sm:$0xff]   ;;  %v6749_v8 = vld [vmem:[%s7624_s0 + $0x228] sm:$0xff]   ;;  %v6754_v24 = vld [vmem:[%s7624_s0 + $0x2a0] sm:$0xff]  }
 0xbe0   : > { %v3481_v59 = vpop.f32.mrf.mxu1  ;;  %v3532_v33 = vpop.f32.mrf.mxu0  ;;  %v3795_v40 = vpack.c.bf16 %v3763_v61, %v3747_v54  ;;  %v3531_v45 = vadd.f32 %v3530_v17, %v2640_v60  ;;  %v6755_v11 = vld [vmem:[%s7624_s0 + $0x258] sm:$0xff]   ;;  %v6759_v13 = vld [vmem:[%s7624_s0 + $0x250] sm:$0xff]   ;;  %v6764_v54 = vld [vmem:[%s7624_s0 + $0x2c8] sm:$0xff]  }
 0xbe1   : > { %v3794_v35 = vpack.c.bf16 %v3762_v15, %v3746_v25  ;;  %v3796_v36 = vpack.c.bf16 %v3764_v31, %v3748_v29  ;;  %v3482_v37 = vadd.f32 %v3481_v59, %v2636_v53  ;;  %v3533_v38 = vadd.f32 %v3532_v33, %v2644_v56  ;;  %6158 = vmatpush3.bf16.msra.mxu1 %v6737_v12  ;;  %v6756_v20 = vld [vmem:[%s7624_s0 + $0x2d8] sm:$0xff]   ;;  %v6760_v16 = vld [vmem:[%s7624_s0 + $0x2d0] sm:$0xff]   ;;  %v6763_v31 = vld [vmem:[%s7624_s0 + $0x248] sm:$0xff]  }
 0xbe2   : > { %6186 = vmatpush3.bf16.msra.mxu0 %v6738_v30  ;;  %v3483_v44 = vpop.f32.mrf.mxu1  ;;  %v3534_v48 = vpop.f32.mrf.mxu0  ;;  %6199 = vmatprep.subr.bf16.mxu1 %v6739_v18  ;;  %v3777_v60 = vmax.f32 %v3480_v43, 0.0  ;;  %v3779_v6 = vmax.f32 %v3531_v45, 0.0  ;;  %v6757_v12 = vld [vmem:[%s7624_s0 + $0x218] sm:$0xff]   ;;  %v6761_v30 = vld [vmem:[%s7624_s0 + $0x210] sm:$0xff]  }
 0xbe3   : > { %v3778_v50 = vmax.f32 %v3482_v37, 0.0  ;;  %v3780_v55 = vmax.f32 %v3533_v38, 0.0  ;;  %4980 = vmatprep.mubr.bf16.mxu1 %v3794_v35  ;;  %5028 = vmatprep.mubr.bf16.mxu0 %v3796_v36  ;;  %v6758_v25 = vld [vmem:[%s7624_s0 + $0x298] sm:$0xff]   ;;  %v6762_v15 = vld [vmem:[%s7624_s0 + $0x290] sm:$0xff]   ;;  %v6765_v35 = vld [vmem:[%s7624_s0 + $0x208] sm:$0xff]  }
 0xbe4   : > { %v3484_v53 = vpop.f32.mrf.mxu1  ;;  %v3535_v56 = vpop.f32.mrf.mxu0  ;;  %4981 = vmatmul.mubr.bf16.vlgmr.msra.gmra.mxu1 %v3793_v41  ;;  %6227 = vmatprep.subr.bf16.mxu0 %v6740_v34  ;;  %v3809_v19 = vpack.c.bf16 %v3777_v60, %v3777_v60  ;;  %v3811_v28 = vpack.c.bf16 %v3779_v6, %v3779_v6  ;;  %v8260_v17 = vld [vmem:[%s7622_s9 + $0x8] sm:$0xff] }
 0xbe5   : > { %v3810_v1 = vpack.c.bf16 %v3778_v50, %v3778_v50  ;;  %v3812_v22 = vpack.c.bf16 %v3780_v55, %v3780_v55  ;;  %5029 = vmatmul.mubr.bf16.vlgmr.msra.gmra.mxu0 %v3795_v40  ;;  %6200 = vmatpush3.bf16.msra.mxu1 %v6741_v39  ;;  %v2652_v61 = vrot.slane %v8260_v17, %v7702_v57  ;;  %v6767_v39 = vld [vmem:[%s7624_s0 + $0x240] sm:$0xff]  }
 0xbe6   : > { %6228 = vmatpush3.bf16.msra.mxu0 %v6742_v49  ;;  %6201 = vmatprep.subr.bf16.mxu1 %v6743_v26  ;;  %v2660_v32 = vrot.slane %v8260_v17, %v2627_v63  ;;  %v2648_v59 = vrot.slane %v8260_v17, %v7697_v52  ;;  %v2656_v33 = vrot.slane %v8260_v17, %v7714_v0  ;;  %v6766_v63 = vld [vmem:[%s7624_s0 + $0x288] sm:$0xff]   ;;  %v6768_v52 = vld [vmem:[%s7624_s0 + $0x2c0] sm:$0xff]  }
 0xbe7   : > { %4988 = vmatprep.mubr.bf16.mxu1 %v3810_v1  ;;  %5036 = vmatprep.mubr.bf16.mxu0 %v3812_v22  ;;  %v6769_v50 = vld [vmem:[%s7624_s0 + $0x200] sm:$0xff]   ;;  %v6771_v22 = vld [vmem:[%s7624_s0 + $0x378] sm:$0xff]  }
 0xbe8   : > { %6229 = vmatprep.subr.bf16.mxu0 %v6744_v58  ;;  %v6770_v1 = vld [vmem:[%s7624_s0 + $0x280] sm:$0xff]  }
 0xbe9   : > { %6202 = vmatpush3.bf16.msra.mxu1 %v6745_v2 }
 0xbea   : > { %6230 = vmatpush3.bf16.msra.mxu0 %v6746_v4  ;;  %6203 = vmatprep.subr.bf16.mxu1 %v6747_v5 }
 0xbeb   : > { %6231 = vmatprep.subr.bf16.mxu0 %v6748_v7 }
 0xbec   : > { %4989 = vmatmul.mubr.bf16.gmra.mxu1 %v3809_v19 }
 0xbed   : > { %5037 = vmatmul.mubr.bf16.gmra.mxu0 %v3811_v28  ;;  %6204 = vmatpush3.bf16.msra.mxu1 %v6749_v8 }
 0xbee   : > { %6232 = vmatpush3.bf16.msra.mxu0 %v6750_v46  ;;  %6205 = vmatprep.subr.bf16.mxu1 %v6751_v10  ;;  %v6772_v46 = vld [vmem:[%s7624_s0 + $0x3f8] sm:$0xff]  }
 0xbef   : > { %6233 = vmatprep.subr.bf16.mxu0 %v6752_v21 }
 0xbf1   : > { %6206 = vmatpush3.bf16.msra.mxu1 %v6753_v23 }
 0xbf2   : > { %6234 = vmatpush3.bf16.msra.mxu0 %v6754_v24  ;;  %6207 = vmatprep.subr.bf16.mxu1 %v6755_v11  ;;  %v6773_v24 = vld [vmem:[%s7624_s0 + $0x338] sm:$0xff]  }
 0xbf3   : > { %6235 = vmatprep.subr.bf16.mxu0 %v6756_v20 }
 0xbf5   : > { %6208 = vmatpush3.bf16.msra.mxu1 %v6757_v12 }
 0xbf6   : > { %6236 = vmatpush3.bf16.msra.mxu0 %v6758_v25  ;;  %v3571_v18 = vpop.f32.mrf.mxu1  ;;  %v3622_v29 = vpop.f32.mrf.mxu0  ;;  %6209 = vmatprep.subr.bf16.mxu1 %v6759_v13  ;;  %v6774_v13 = vld [vmem:[%s7624_s0 + $0x3b8] sm:$0xff]  }
 0xbf7   : > { %6237 = vmatprep.subr.bf16.mxu0 %v6760_v16  ;;  %v3572_v0 = vadd.f32 %v3571_v18, %v2648_v59  ;;  %v3623_v48 = vadd.f32 %v3622_v29, %v2656_v33  ;;  %v6775_v16 = vld [vmem:[%s7624_s0 + $0x370] sm:$0xff]  }
 0xbf8   : > { %v3573_v34 = vpop.f32.mrf.mxu1  ;;  %v3624_v57 = vpop.f32.mrf.mxu0 }
 0xbf9   : > { %6210 = vmatpush3.bf16.msra.mxu1 %v6761_v30  ;;  %v3574_v36 = vadd.f32 %v3573_v34, %v2652_v61  ;;  %v3625_v41 = vadd.f32 %v3624_v57, %v2660_v32  ;;  %v3749_v6 = vmax.f32 %v3572_v0, 0.0  ;;  %v3751_v7 = vmax.f32 %v3623_v48, 0.0  ;;  %v6777_v34 = vld [vmem:[%s7624_s0 + $0x330] sm:$0xff]   ;;  %v6786_v0 = vld [vmem:[%s7624_s0 + $0x3a0] sm:$0xff]   ;;  %v6787_v48 = vld [vmem:[%s7624_s0 + $0x358] sm:$0xff]  }
 0xbfa   : > { %6238 = vmatpush3.bf16.msra.mxu0 %v6762_v15  ;;  %v3575_v37 = vpop.f32.mrf.mxu1  ;;  %v3626_v38 = vpop.f32.mrf.mxu0  ;;  %6211 = vmatprep.subr.bf16.mxu1 %v6763_v31  ;;  %v6778_v57 = vld [vmem:[%s7624_s0 + $0x3b0] sm:$0xff]  }
 0xbfb   : > { %v3576_v43 = vadd.f32 %v3575_v37, %v2648_v59  ;;  %v3627_v44 = vadd.f32 %v3626_v38, %v2656_v33  ;;  %6239 = vmatprep.subr.bf16.mxu0 %v6764_v54  ;;  %v3750_v55 = vmax.f32 %v3574_v36, 0.0  ;;  %v3752_v2 = vmax.f32 %v3625_v41, 0.0  ;;  %v6780_v37 = vld [vmem:[%s7624_s0 + $0x3e8] sm:$0xff]   ;;  %v6783_v41 = vld [vmem:[%s7624_s0 + $0x360] sm:$0xff]  }
 0xbfc   : > { %v3577_v49 = vpop.f32.mrf.mxu1  ;;  %v3628_v26 = vpop.f32.mrf.mxu0  ;;  %v6781_v38 = vld [vmem:[%s7624_s0 + $0x328] sm:$0xff]  }
 0xbfd   : > { %v3578_v40 = vadd.f32 %v3577_v49, %v2652_v61  ;;  %v3629_v45 = vadd.f32 %v3628_v26, %v2660_v32  ;;  %6212 = vmatpush3.bf16.msra.mxu1 %v6765_v35  ;;  %v3765_v53 = vmax.f32 %v3576_v43, 0.0  ;;  %v3767_v60 = vmax.f32 %v3627_v44, 0.0  ;;  %v6779_v35 = vld [vmem:[%s7624_s0 + $0x368] sm:$0xff]   ;;  %v6784_v44 = vld [vmem:[%s7624_s0 + $0x3e0] sm:$0xff]   ;;  %v6788_v49 = vld [vmem:[%s7624_s0 + $0x3d8] sm:$0xff]  }
 0xbfe   : > { %6240 = vmatpush3.bf16.msra.mxu0 %v6766_v63  ;;  %v3581_v56 = vpop.f32.mrf.mxu1  ;;  %v3632_v58 = vpop.f32.mrf.mxu0  ;;  %6213 = vmatprep.subr.bf16.mxu1 %v6767_v39  ;;  %v6782_v39 = vld [vmem:[%s7624_s0 + $0x3a8] sm:$0xff]   ;;  %v6789_v26 = vld [vmem:[%s7624_s0 + $0x318] sm:$0xff]  }
 0xbff   : > { %v3766_v4 = vmax.f32 %v3578_v40, 0.0  ;;  %v3768_v5 = vmax.f32 %v3629_v45, 0.0  ;;  %6241 = vmatprep.subr.bf16.mxu0 %v6768_v52  ;;  %v3797_v11 = vpack.c.bf16 %v3765_v53, %v3749_v6  ;;  %v3582_v20 = vadd.f32 %v3581_v56, %v2648_v59  ;;  %v6785_v52 = vld [vmem:[%s7624_s0 + $0x320] sm:$0xff]   ;;  %v6790_v40 = vld [vmem:[%s7624_s0 + $0x398] sm:$0xff]   ;;  %v6791_v45 = vld [vmem:[%s7624_s0 + $0x350] sm:$0xff]  }
 0xc00   : > { %v3583_v8 = vpop.f32.mrf.mxu1  ;;  %v3634_v19 = vpop.f32.mrf.mxu0  ;;  %v3799_v30 = vpack.c.bf16 %v3767_v60, %v3751_v7  ;;  %v3633_v18 = vadd.f32 %v3632_v58, %v2656_v33  ;;  %v2668_v58 = vrot.slane %v8260_v17, %v2635_v42  ;;  %v6796_v60 = vld [vmem:[%s7624_s0 + $0x3c8] sm:$0xff]  }
 0xc01   : > { %v3798_v10 = vpack.c.bf16 %v3766_v4, %v3750_v55  ;;  %v3800_v28 = vpack.c.bf16 %v3768_v5, %v3752_v2  ;;  %v3584_v21 = vadd.f32 %v3583_v8, %v2652_v61  ;;  %v3635_v23 = vadd.f32 %v3634_v19, %v2660_v32  ;;  %6214 = vmatpush3.bf16.msra.mxu1 %v6769_v50  ;;  %v6776_v32 = vld [vmem:[%s7624_s0 + $0x3f0] sm:$0xff]   ;;  %v6797_v7 = vld [vmem:[%s7624_s0 + $0x308] sm:$0xff]  }
 0xc02   : > { %6242 = vmatpush3.bf16.msra.mxu0 %v6770_v1  ;;  %v3585_v12 = vpop.f32.mrf.mxu1  ;;  %v3636_v25 = vpop.f32.mrf.mxu0  ;;  %6255 = vmatprep.subr.bf16.mxu1 %v6771_v22  ;;  %v3781_v33 = vmax.f32 %v3582_v20, 0.0  ;;  %v3783_v36 = vmax.f32 %v3633_v18, 0.0  ;;  %v6792_v50 = vld [vmem:[%s7624_s0 + $0x3d0] sm:$0xff]   ;;  %v6795_v22 = vld [vmem:[%s7624_s0 + $0x348] sm:$0xff]   ;;  %v2676_v2 = vrot.slane %v8260_v17, %v2643_v9  ;;  %v2664_v4 = vrot.slane %v8260_v17, %v2631_v47  ;;  %v6802_v18 = vld [vmem:[%s7624_s0 + $0x380] sm:$0xff]  }
 0xc03   : > { %v3782_v29 = vmax.f32 %v3584_v21, 0.0  ;;  %v3784_v15 = vmax.f32 %v3635_v23, 0.0  ;;  %5076 = vmatprep.mubr.bf16.mxu1 %v3798_v10  ;;  %5124 = vmatprep.mubr.bf16.mxu0 %v3800_v28  ;;  %v6793_v55 = vld [vmem:[%s7624_s0 + $0x310] sm:$0xff]   ;;  %v2672_v5 = vrot.slane %v8260_v17, %v2639_v14  ;;  %v6798_v9 = vld [vmem:[%s7624_s0 + $0x388] sm:$0xff]   ;;  %v6799_v10 = vld [vmem:[%s7624_s0 + $0x340] sm:$0xff]  }
 0xc04   : > { %v3586_v61 = vpop.f32.mrf.mxu1  ;;  %v3637_v31 = vpop.f32.mrf.mxu0  ;;  %5077 = vmatmul.mubr.bf16.vlgmr.msra.gmra.mxu1 %v3797_v11  ;;  %6283 = vmatprep.subr.bf16.mxu0 %v6772_v46  ;;  %v3813_v63 = vpack.c.bf16 %v3781_v33, %v3781_v33  ;;  %v3815_v43 = vpack.c.bf16 %v3783_v36, %v3783_v36  ;;  %v6794_v1 = vld [vmem:[%s7624_s0 + $0x390] sm:$0xff]   ;;  %v6801_v12 = vld [vmem:[%s7624_s0 + $0x300] sm:$0xff]  }
 0xc05   : > { %v3814_v54 = vpack.c.bf16 %v3782_v29, %v3782_v29  ;;  %v3816_v59 = vpack.c.bf16 %v3784_v15, %v3784_v15  ;;  %5125 = vmatmul.mubr.bf16.vlgmr.msra.gmra.mxu0 %v3799_v30  ;;  %6256 = vmatpush3.bf16.msra.mxu1 %v6773_v24 }
 0xc06   : > { %6284 = vmatpush3.bf16.msra.mxu0 %v6774_v13  ;;  %6257 = vmatprep.subr.bf16.mxu1 %v6775_v16 }
 0xc07   : > { %5084 = vmatprep.mubr.bf16.mxu1 %v3814_v54  ;;  %5132 = vmatprep.mubr.bf16.mxu0 %v3816_v59 }
 0xc08   : > { %6285 = vmatprep.subr.bf16.mxu0 %v6776_v32 }
 0xc09   : > { %6258 = vmatpush3.bf16.msra.mxu1 %v6777_v34 }
 0xc0a   : > { %6286 = vmatpush3.bf16.msra.mxu0 %v6778_v57  ;;  %6259 = vmatprep.subr.bf16.mxu1 %v6779_v35 }
 0xc0b   : > { %6287 = vmatprep.subr.bf16.mxu0 %v6780_v37 }
 0xc0c   : > { %5085 = vmatmul.mubr.bf16.gmra.mxu1 %v3813_v63 }
 0xc0d   : > { %5133 = vmatmul.mubr.bf16.gmra.mxu0 %v3815_v43  ;;  %6260 = vmatpush3.bf16.msra.mxu1 %v6781_v38 }
 0xc0e   : > { %6288 = vmatpush3.bf16.msra.mxu0 %v6782_v39  ;;  %6261 = vmatprep.subr.bf16.mxu1 %v6783_v41 }
 0xc0f   : > { %6289 = vmatprep.subr.bf16.mxu0 %v6784_v44 }
 0xc11   : > { %6262 = vmatpush3.bf16.msra.mxu1 %v6785_v52 }
 0xc12   : > { %6290 = vmatpush3.bf16.msra.mxu0 %v6786_v0  ;;  %6263 = vmatprep.subr.bf16.mxu1 %v6787_v48 }
 0xc13   : > { %6291 = vmatprep.subr.bf16.mxu0 %v6788_v49 }
 0xc15   : > { %6264 = vmatpush3.bf16.msra.mxu1 %v6789_v26 }
 0xc16   : > { %6292 = vmatpush3.bf16.msra.mxu0 %v6790_v40  ;;  %v3673_v53 = vpop.f32.mrf.mxu1  ;;  %v3724_v56 = vpop.f32.mrf.mxu0  ;;  %6265 = vmatprep.subr.bf16.mxu1 %v6791_v45 }
 0xc17   : > { %6293 = vmatprep.subr.bf16.mxu0 %v6792_v50  ;;  %v3674_v14 = vadd.f32 %v3673_v53, %v2664_v4  ;;  %v3725_v17 = vadd.f32 %v3724_v56, %v2672_v5 }
 0xc18   : > { %v3675_v42 = vpop.f32.mrf.mxu1  ;;  %v3726_v6 = vpop.f32.mrf.mxu0 }
 0xc19   : > { %6266 = vmatpush3.bf16.msra.mxu1 %v6793_v55  ;;  %v3676_v8 = vadd.f32 %v3675_v42, %v2668_v58  ;;  %v3727_v28 = vadd.f32 %v3726_v6, %v2676_v2  ;;  %v3753_v32 = vmax.f32 %v3674_v14, 0.0  ;;  %v3755_v54 = vmax.f32 %v3725_v17, 0.0 }
 0xc1a   : > { %6294 = vmatpush3.bf16.msra.mxu0 %v6794_v1  ;;  %v3677_v19 = vpop.f32.mrf.mxu1  ;;  %v3728_v46 = vpop.f32.mrf.mxu0  ;;  %6267 = vmatprep.subr.bf16.mxu1 %v6795_v22 }
 0xc1b   : > { %v3678_v21 = vadd.f32 %v3677_v19, %v2664_v4  ;;  %v3729_v47 = vadd.f32 %v3728_v46, %v2672_v5  ;;  %6295 = vmatprep.subr.bf16.mxu0 %v6796_v60  ;;  %v3754_v25 = vmax.f32 %v3676_v8, 0.0  ;;  %v3756_v29 = vmax.f32 %v3727_v28, 0.0 }
 0xc1c   : > { %v3679_v23 = vpop.f32.mrf.mxu1  ;;  %v3730_v24 = vpop.f32.mrf.mxu0 }
 0xc1d   : > { %v3680_v11 = vadd.f32 %v3679_v23, %v2668_v58  ;;  %v3731_v20 = vadd.f32 %v3730_v24, %v2676_v2  ;;  %6268 = vmatpush3.bf16.msra.mxu1 %v6797_v7  ;;  %v3769_v13 = vmax.f32 %v3678_v21, 0.0  ;;  %v3771_v15 = vmax.f32 %v3729_v47, 0.0 }
 0xc1e   : > { %6296 = vmatpush3.bf16.msra.mxu0 %v6798_v9  ;;  %v3683_v16 = vpop.f32.mrf.mxu1  ;;  %v3734_v30 = vpop.f32.mrf.mxu0  ;;  %6269 = vmatprep.subr.bf16.mxu1 %v6799_v10 }
 0xc1f   : > { %v3770_v61 = vmax.f32 %v3680_v11, 0.0  ;;  %v3772_v31 = vmax.f32 %v3731_v20, 0.0  ;;  %6297 = vmatprep.subr.bf16.mxu0 %v6800_v51  ;;  %v3801_v37 = vpack.c.bf16 %v3769_v13, %v3753_v32  ;;  %v3684_v38 = vadd.f32 %v3683_v16, %v2664_v4 }
 0xc20   : > { %v3685_v59 = vpop.f32.mrf.mxu1  ;;  %v3736_v34 = vpop.f32.mrf.mxu0  ;;  %v3803_v41 = vpack.c.bf16 %v3771_v15, %v3755_v54  ;;  %v3735_v43 = vadd.f32 %v3734_v30, %v2672_v5 }
 0xc21   : > { %v3802_v33 = vpack.c.bf16 %v3770_v61, %v3754_v25  ;;  %v3804_v57 = vpack.c.bf16 %v3772_v31, %v3756_v29  ;;  %v3686_v35 = vadd.f32 %v3685_v59, %v2668_v58  ;;  %v3737_v36 = vadd.f32 %v3736_v34, %v2676_v2  ;;  %6270 = vmatpush3.bf16.msra.mxu1 %v6801_v12  ;;  %v5877_v58 = vld [vmem:[%s911_s7] ss:$0 sm:$0xff] }
 0xc22   : > { %6298 = vmatpush3.bf16.msra.mxu0 %v6802_v18  ;;  %v3687_v63 = vpop.f32.mrf.mxu1  ;;  %v3738_v39 = vpop.f32.mrf.mxu0  ;;  %v3785_v40 = vmax.f32 %v3684_v38, 0.0  ;;  %v3787_v45 = vmax.f32 %v3735_v43, 0.0 }
 0xc23   : > { %v3786_v44 = vmax.f32 %v3686_v35, 0.0  ;;  %v3788_v52 = vmax.f32 %v3737_v36, 0.0  ;;  %5172 = vmatprep.mubr.bf16.mxu1 %v3802_v33  ;;  %5220 = vmatprep.mubr.bf16.mxu0 %v3804_v57 }
 0xc24   : > { %v3688_v0 = vpop.f32.mrf.mxu1  ;;  %v3739_v48 = vpop.f32.mrf.mxu0  ;;  %5173 = vmatmul.mubr.bf16.vlgmr.msra.gmra.mxu1 %v3801_v37  ;;  %v3817_v50 = vpack.c.bf16 %v3785_v40, %v3785_v40  ;;  %v3819_v55 = vpack.c.bf16 %v3787_v45, %v3787_v45 }
 0xc25   : > { %v3818_v49 = vpack.c.bf16 %v3786_v44, %v3786_v44  ;;  %v3820_v26 = vpack.c.bf16 %v3788_v52, %v3788_v52  ;;  %5221 = vmatmul.mubr.bf16.vlgmr.msra.gmra.mxu0 %v3803_v41 }
 0xc27   : > { %5180 = vmatprep.mubr.bf16.mxu1 %v3818_v49  ;;  %5228 = vmatprep.mubr.bf16.mxu0 %v3820_v26 }
 0xc2c   : > { %5181 = vmatmul.mubr.bf16.gmra.mxu1 %v3817_v50 }
 0xc2d   : > { %5229 = vmatmul.mubr.bf16.gmra.mxu0 %v3819_v55 }
 0xc84   : > { %v6103_v53 = vpop.f32.mrf.mxu1  ;;  %v6131_v56 = vpop.f32.mrf.mxu0 }
 0xc86   : > { %v6104_v1 = vpop.f32.mrf.mxu1  ;;  %v6132_v22 = vpop.f32.mrf.mxu0 }
 0xc87   : > { %v6105_v2 = vadd.f32 %v6104_v1, %v6103_v53  ;;  %v6133_v60 = vadd.f32 %v6132_v22, %v6131_v56 }
 0xc88   : > { %v6106_v4 = vpop.f32.mrf.mxu1  ;;  %v6134_v5 = vpop.f32.mrf.mxu0 }
 0xc89   : > { %v4887_v42 = vadd.f32 %v6105_v2, %v5877_v58 }
 0xc8a   : > { %v6107_v6 = vpop.f32.mrf.mxu1  ;;  %v6135_v7 = vpop.f32.mrf.mxu0 }
 0xc8b   : > { %v4935_v8 = vadd.f32 %v6133_v60, %v4887_v42  ;;  %v6108_v19 = vadd.f32 %v6107_v6, %v6106_v4  ;;  %v6136_v46 = vadd.f32 %v6135_v7, %v6134_v5 }
 0xc8c   : > { %v6109_v9 = vpop.f32.mrf.mxu1  ;;  %v6137_v10 = vpop.f32.mrf.mxu0 }
 0xc8d   : > { %v4890_v28 = vadd.f32 %v6108_v19, %v5877_v58 }
 0xc8e   : > { %v6110_v21 = vpop.f32.mrf.mxu1  ;;  %v6138_v47 = vpop.f32.mrf.mxu0 }
 0xc8f   : > { %v4938_v51 = vadd.f32 %v6136_v46, %v4890_v28  ;;  %v6111_v14 = vadd.f32 %v6110_v21, %v6109_v9  ;;  %v6139_v17 = vadd.f32 %v6138_v47, %v6137_v10 }
 0xc90   : > { %v6112_v23 = vpop.f32.mrf.mxu1  ;;  %v6140_v24 = vpop.f32.mrf.mxu0 }
 0xc91   : > { %v4895_v11 = vadd.f32 %v6111_v14, %v5877_v58 }
 0xc92   : > { %v6113_v20 = vpop.f32.mrf.mxu1  ;;  %v6141_v12 = vpop.f32.mrf.mxu0 }
 0xc93   : > { %v4943_v25 = vadd.f32 %v6139_v17, %v4895_v11 }
 0xca4   : > { %v6159_v13 = vpop.f32.mrf.mxu1 }
 0xca5   : > { %v6187_v16 = vpop.f32.mrf.mxu0 }
 0xca6   : > { %v6160_v30 = vpop.f32.mrf.mxu1 }
 0xca7   : > { %v6188_v18 = vpop.f32.mrf.mxu0  ;;  %v6161_v22 = vadd.f32 %v6160_v30, %v6159_v13 }
 0xca8   : > { %v6162_v29 = vpop.f32.mrf.mxu1  ;;  %v6189_v60 = vadd.f32 %v6188_v18, %v6187_v16 }
 0xca9   : > { %v6190_v15 = vpop.f32.mrf.mxu0  ;;  %v4983_v2 = vadd.f32 %v6161_v22, %v4935_v8 }
 0xcaa   : > { %v6163_v61 = vpop.f32.mrf.mxu1 }
 0xcab   : > { %v6164_v31 = vadd.f32 %v6163_v61, %v6162_v29  ;;  %v6191_v32 = vpop.f32.mrf.mxu0  ;;  %v5031_v5 = vadd.f32 %v6189_v60, %v4983_v2 }
 0xcac   : > { %v6192_v54 = vadd.f32 %v6191_v32, %v6190_v15  ;;  %v6165_v59 = vpop.f32.mrf.mxu1 }
 0xcad   : > { %v4986_v34 = vadd.f32 %v6164_v31, %v4938_v51  ;;  %v6193_v33 = vpop.f32.mrf.mxu0 }
 0xcae   : > { %v6166_v57 = vpop.f32.mrf.mxu1 }
 0xcaf   : > { %v5034_v35 = vadd.f32 %v6192_v54, %v4986_v34  ;;  %v6194_v36 = vpop.f32.mrf.mxu0  ;;  %v6167_v42 = vadd.f32 %v6166_v57, %v6165_v59 }
 0xcb0   : > { %v6168_v37 = vpop.f32.mrf.mxu1  ;;  %v6195_v28 = vadd.f32 %v6194_v36, %v6193_v33 }
 0xcb1   : > { %v6196_v38 = vpop.f32.mrf.mxu0  ;;  %v4991_v19 = vadd.f32 %v6167_v42, %v4943_v25 }
 0xcb2   : > { %v6169_v63 = vpop.f32.mrf.mxu1 }
 0xcb3   : > { %v6197_v39 = vpop.f32.mrf.mxu0  ;;  %v5039_v24 = vadd.f32 %v6195_v28, %v4991_v19 }
 0xcc4   : > { %v6215_v41 = vpop.f32.mrf.mxu1 }
 0xcc5   : > { %v6243_v43 = vpop.f32.mrf.mxu0 }
 0xcc6   : > { %v6216_v44 = vpop.f32.mrf.mxu1 }
 0xcc7   : > { %v6244_v52 = vpop.f32.mrf.mxu0  ;;  %v6217_v4 = vadd.f32 %v6216_v44, %v6215_v41 }
 0xcc8   : > { %v6218_v0 = vpop.f32.mrf.mxu1  ;;  %v6245_v46 = vadd.f32 %v6244_v52, %v6243_v43 }
 0xcc9   : > { %v6246_v48 = vpop.f32.mrf.mxu0  ;;  %v5079_v6 = vadd.f32 %v6217_v4, %v5031_v5 }
 0xcca   : > { %v6219_v49 = vpop.f32.mrf.mxu1 }
 0xccb   : > { %v6247_v26 = vpop.f32.mrf.mxu0  ;;  %v5127_v21 = vadd.f32 %v6245_v46, %v5079_v6  ;;  %v6220_v17 = vadd.f32 %v6219_v49, %v6218_v0 }
 0xccc   : > { %v6221_v40 = vpop.f32.mrf.mxu1  ;;  %v6248_v31 = vadd.f32 %v6247_v26, %v6246_v48 }
 0xccd   : > { %v6249_v45 = vpop.f32.mrf.mxu0  ;;  %v5082_v18 = vadd.f32 %v6220_v17, %v5034_v35 }
 0xcce   : > { %v6222_v50 = vpop.f32.mrf.mxu1 }
 0xccf   : > { %v6250_v55 = vpop.f32.mrf.mxu0  ;;  %v6223_v47 = vadd.f32 %v6222_v50, %v6221_v40  ;;  %v5130_v57 = vadd.f32 %v6248_v31, %v5082_v18 }
 0xcd0   : > { %v6224_v53 = vpop.f32.mrf.mxu1  ;;  %v6251_v29 = vadd.f32 %v6250_v55, %v6249_v45 }
 0xcd1   : > { %v6252_v56 = vpop.f32.mrf.mxu0  ;;  %v5087_v13 = vadd.f32 %v6223_v47, %v5039_v24 }
 0xcd2   : > { %v6225_v58 = vpop.f32.mrf.mxu1 }
 0xcd3   : > { %v6253_v1 = vpop.f32.mrf.mxu0  ;;  %v5135_v59 = vadd.f32 %v6251_v29, %v5087_v13 }
 0xce4   : > { %v6271_v7 = vpop.f32.mrf.mxu1 }
 0xce5   : > { %v6299_v9 = vpop.f32.mrf.mxu0 }
 0xce6   : > { %v6272_v10 = vpop.f32.mrf.mxu1 }
 0xce7   : > { %v6273_v51 = vadd.f32 %v6272_v10, %v6271_v7  ;;  %v6300_v14 = vpop.f32.mrf.mxu0  ;;  %v6006_v10 = vld [vmem:[%s920_s18] ss:$0 sm:$0xff] }
 0xce8   : > { %v6274_v23 = vpop.f32.mrf.mxu1  ;;  %v6301_v8 = vadd.f32 %v6300_v14, %v6299_v9 }
 0xce9   : > { %v5175_v11 = vadd.f32 %v6273_v51, %v5127_v21  ;;  %v6302_v20 = vpop.f32.mrf.mxu0  ;;  %v6007_v21 = vld [vmem:[%s923_s16] ss:$0 sm:$0xff] }
 0xcea   : > { %v6275_v12 = vpop.f32.mrf.mxu1 }
 0xceb   : > { %v5223_v16 = vadd.f32 %v6301_v8, %v5175_v11  ;;  %v6303_v30 = vpop.f32.mrf.mxu0  ;;  %v6276_v32 = vadd.f32 %v6275_v12, %v6274_v23 }
 0xcec   : > { %v6277_v25 = vpop.f32.mrf.mxu1  ;;  %v6304_v44 = vadd.f32 %v6303_v30, %v6302_v20 }
 0xced   : > { %v6305_v15 = vpop.f32.mrf.mxu0  ;;  %v5236_v61 = vadd.f32 %v5223_v16, %v8011_v27  ;;  %v5178_v39 = vadd.f32 %v6276_v32, %v5130_v57 }
 0xcee   : > { %v6278_v54 = vpop.f32.mrf.mxu1 }
 0xcef   : > { %v6279_v34 = vadd.f32 %v6278_v54, %v6277_v25  ;;  %v6306_v33 = vpop.f32.mrf.mxu0  ;;  %5239 = vadd.xlane.f32.xlu0 %v5236_v61  ;;  %v5226_v27 = vadd.f32 %v6304_v44, %v5178_v39 }
 0xcf0   : > { %v6280_v36 = vpop.f32.mrf.mxu1  ;;  %v6307_v38 = vadd.f32 %v6306_v33, %v6305_v15 }
 0xcf1   : > { %v5183_v37 = vadd.f32 %v6279_v34, %v5135_v59  ;;  %v6308_v63 = vpop.f32.mrf.mxu0  ;;  %v5237_v48 = vadd.f32 %v5226_v27, %v8013_v3 }
 0xcf2   : > { %v6281_v41 = vpop.f32.mrf.mxu1 }
 0xcf3   : > { %v5231_v35 = vadd.f32 %v6307_v38, %v5183_v37  ;;  %v6309_v43 = vpop.f32.mrf.mxu0 }
 0xcf5   : > { %v5238_v52 = vadd.f32 %v5231_v35, %v8026_v62 }
 0xcf7   : > { %v5243_v0 = vsel %vm2426_vm12, %v5238_v52, 0.0 }
 0xcf8   : > { %5244 = vadd.xlane.f32.xlu1 %v5243_v0 }
 0xcfc   : > { %5241 = vadd.xlane.f32.xlu1 %v5237_v48 }
 0xd78   : > { %v5240_v49 = vpop.xlane.xlu0 %5239 }
 0xd79   : > { %v5246_v26 = vmul.f32 0.0078125, %v5240_v49 }
 0xd7b   : > { %v5249_v40 = vsub.f32 %v5236_v61, %v5246_v26 }
 0xd7d   : > { %v5252_v45 = vmul.f32 %v5249_v40, %v5249_v40 }
 0xd7f   : > { %5255 = vadd.xlane.f32.xlu0 %v5252_v45 }
 0xd81   : > { %v5245_v50 = vpop.xlane.xlu1 %5244 }
 0xd82   : > { %v5248_v55 = vmul.f32 0.0078125, %v5245_v50 }
 0xd84   : > { %v5251_v53 = vsub.f32 %v5238_v52, %v5248_v55 }
 0xd85   : > { %v5242_v56 = vpop.xlane.xlu1 %5241 }
 0xd86   : > { %v5247_v58 = vmul.f32 0.0078125, %v5242_v56  ;;  %v5254_v1 = vmul.f32 %v5251_v53, %v5251_v53 }
 0xd88   : > { %v5250_v22 = vsub.f32 %v5237_v48, %v5247_v58  ;;  %v5259_v62 = vsel %vm2426_vm12, %v5254_v1, 0.0 }
 0xd89   : > { %5260 = vadd.xlane.f32.xlu0 %v5259_v62 }
 0xd8a   : > { %v5253_v2 = vmul.f32 %v5250_v22, %v5250_v22 }
 0xd8c   : > { %5257 = vadd.xlane.f32.xlu1 %v5253_v2 }
 0xe08   : > { %v5256_v3 = vpop.xlane.xlu0 %5255 }
 0xe09   : > { %v5262_v60 = vmul.f32 0.0078125, %v5256_v3 }
 0xe0b   : > { %v5265_v4 = vadd.f32 1e-05, %v5262_v60 }
 0xe0d   : > { %6841 = vrsqrt.f32 %v5265_v4 }
 0xe12   : > { %v5261_v5 = vpop.xlane.xlu0 %5260 }
 0xe13   : > { %v5264_v42 = vmul.f32 0.0078125, %v5261_v5 }
 0xe15   : > { %v5267_v6 = vadd.f32 1e-05, %v5264_v42  ;;  %v5258_v7 = vpop.xlane.xlu1 %5257 }
 0xe16   : > { %v5263_v19 = vmul.f32 0.0078125, %v5258_v7 }
 0xe17   : > { %6843 = vrsqrt.f32 %v5267_v6 }
 0xe18   : > { %v5266_v46 = vadd.f32 1e-05, %v5263_v19 }
 0xe1a   : > { %v6842_v9 = vpop.eup %6841  ;;  %6845 = vrsqrt.f32 %v5266_v46 }
 0xe1b   : > { %v5271_v28 = vmul.f32 %v6842_v9, %v5249_v40 }
 0xe1d   : > { %v5281_v47 = vmul.f32 %v6006_v10, %v5271_v28 }
 0xe1f   : > { %v8345_v51 = vadd.f32 %v6007_v21, %v5281_v47 }
 0xe21   : > { %5294 = vst [vmem:[#allocation2] sm:$0xff] %v8345_v51 }
 0xe24   : > { %v6844_v14 = vpop.eup %6843 }
 0xe25   : > { %v5273_v17 = vmul.f32 %v6844_v14, %v5251_v53 }
 0xe27   : > { %v6846_v23 = vpop.eup %6845  ;;  %v5283_v24 = vmul.f32 %v6006_v10, %v5273_v17 }
 0xe28   : > { %v5272_v11 = vmul.f32 %v6846_v23, %v5250_v22 }
 0xe29   : > { %v5293_v8 = vadd.f32 %v6007_v21, %v5283_v24 }
 0xe2a   : > { %v5282_v20 = vmul.f32 %v6006_v10, %v5272_v11  ;;  %5300 = sbr.rel (%p6008_p4) target bundleno = 3860 (0xf14), region = 144 }
 0xe2b   : > { %5296 = vst [vmem:[#allocation2 + $0x10] sm:$0x3] %v5293_v8 }
 0xe2c   : > { %v5292_v12 = vadd.f32 %v6007_v21, %v5282_v20 }
 0xe2e   : > { %5295 = vst [vmem:[#allocation2 + $0x8] sm:$0xff] %v5292_v12 }
 0xe2f   : > { %v5317_v13 = vld [vmem:[#allocation16 + $0x78] sm:$0xff]  ;;  %v7222_v16 = vmov 0.0   ;;  %v5316_v30 = vld [vmem:[#allocation16 + $0x70] sm:$0xff]  ;;  %vm7223_vm13 = vmmov 0   ;;  %v5315_v18 = vld [vmem:[#allocation16 + $0x68] sm:$0xff]  ;;  %v5301_v38 = vsel %vm1472_vm4, %v8345_v51, %v5292_v12 }
 0xe30   : > { %6465 = vmatprep.subr.mxu0 %v7222_v16  ;;  %6497 = vmatprep.mubr.msk.f32.mxu0 %vm7223_vm13, %v7222_v16  ;;  %v5314_v25 = vld [vmem:[#allocation16 + $0x60] sm:$0xff]  ;;  %v5313_v29 = vld [vmem:[#allocation16 + $0x58] sm:$0xff]  ;;  %v5312_v15 = vld [vmem:[#allocation16 + $0x50] sm:$0xff] }
 0xe31   : > { %6466 = vmatpush3.msra.mxu0 %v5317_v13  ;;  %v5311_v61 = vld [vmem:[#allocation16 + $0x48] sm:$0xff]  ;;  %v5310_v31 = vld [vmem:[#allocation16 + $0x40] sm:$0xff]  ;;  %v5309_v32 = vld [vmem:[#allocation16 + $0x38] sm:$0xff] }
 0xe32   : > { %6467 = vmatprep.subr.mxu0 %v7222_v16  ;;  %v5308_v54 = vld [vmem:[#allocation16 + $0x30] sm:$0xff]  ;;  %v5307_v59 = vld [vmem:[#allocation16 + $0x28] sm:$0xff]  ;;  %v5306_v34 = vld [vmem:[#allocation16 + $0x20] sm:$0xff] }
 0xe33   : > { %6468 = vmatpush3.msra.mxu0 %v5316_v30  ;;  %v5305_v33 = vld [vmem:[#allocation16 + $0x18] sm:$0xff]  ;;  %v5304_v57 = vld [vmem:[#allocation16 + $0x10] sm:$0xff]  ;;  %v5303_v36 = vld [vmem:[#allocation16 + $0x8] sm:$0xff] }
 0xe34   : > { %6469 = vmatprep.subr.mxu0 %v7222_v16  ;;  %v5302_v37 = vld [vmem:[#allocation16] sm:$0xff]  ;;  %v6009_v63 = vld [vmem:[%s8502_s26] ss:$0 sm:$0xff] }
 0xe35   : > { %6470 = vmatpush3.msra.mxu0 %v5315_v18 }
 0xe36   : > { %6471 = vmatprep.subr.mxu0 %v7222_v16 }
 0xe37   : > { %6472 = vmatpush3.msra.mxu0 %v5314_v25 }
 0xe38   : > { %6473 = vmatprep.subr.mxu0 %v7222_v16 }
 0xe39   : > { %6474 = vmatpush3.msra.mxu0 %v5313_v29 }
 0xe3a   : > { %6475 = vmatprep.subr.mxu0 %v7222_v16 }
 0xe3b   : > { %6476 = vmatpush3.msra.mxu0 %v5312_v15 }
 0xe3c   : > { %6477 = vmatprep.subr.mxu0 %v7222_v16 }
 0xe3d   : > { %6478 = vmatpush3.msra.mxu0 %v5311_v61 }
 0xe3e   : > { %6479 = vmatprep.subr.mxu0 %v7222_v16 }
 0xe3f   : > { %6480 = vmatpush3.msra.mxu0 %v5310_v31 }
 0xe40   : > { %6481 = vmatprep.subr.mxu0 %v7222_v16 }
 0xe41   : > { %6482 = vmatpush3.msra.mxu0 %v5309_v32 }
 0xe42   : > { %6483 = vmatprep.subr.mxu0 %v7222_v16 }
 0xe43   : > { %6484 = vmatpush3.msra.mxu0 %v5308_v54 }
 0xe44   : > { %6485 = vmatprep.subr.mxu0 %v7222_v16 }
 0xe45   : > { %6486 = vmatpush3.msra.mxu0 %v5307_v59 }
 0xe46   : > { %6487 = vmatprep.subr.mxu0 %v7222_v16 }
 0xe47   : > { %6488 = vmatpush3.msra.mxu0 %v5306_v34 }
 0xe48   : > { %6489 = vmatprep.subr.mxu0 %v7222_v16 }
 0xe49   : > { %6490 = vmatpush3.msra.mxu0 %v5305_v33 }
 0xe4a   : > { %6491 = vmatprep.subr.mxu0 %v7222_v16 }
 0xe4b   : > { %6492 = vmatpush3.msra.mxu0 %v5304_v57 }
 0xe4c   : > { %6493 = vmatprep.subr.mxu0 %v7222_v16 }
 0xe4d   : > { %6494 = vmatpush3.msra.mxu0 %v5303_v36 }
 0xe4e   : > { %6495 = vmatprep.subr.mxu0 %v7222_v16 }
 0xe4f   : > { %6496 = vmatpush3.msra.mxu0 %v5302_v37 }
 0xe50   : > { %6498 = vmatmul.mubr.f32.vlgmr.msra.gmra.mxu0 %v5301_v38 }
 0xf10   : > { %v5391_v39 = vpop.f32.mrf.mxu0 }
 0xf11   : > { %v5392_v41 = vadd.f32 %v6009_v63, %v5391_v39 }
 0xf12   : > { %v6499_v35 = vpop.f32.mrf.mxu0 }
 0xf13   : > { %5395 = vst [vmem:[#allocation17] sm:$0x3] %v5392_v41 }
 0xf14 PF: > { %p6581_p9 = scmp.eq.s32.totalorder %s7344_s1, 1  ;;  %s7224_s22 = smov [#allocation17]  }
 0xf15   : > { %s5403_s16 = sshll.u32 %s7224_s22, 4  ;;  %s5404_s16 = int_to_ptr.vmem [resolvable:$true] %s5403_s16 }
 0xf16   : > { %s7120_s10 = scalar_lea.vmem %s5404_s16, 32  ;;  %p7127_p2 = scmp.lt.s32.totalorder %s5404_s16, %s5404_s16 }
 0xf17   : > { %p7121_p3 = scmp.ne.s32.totalorder %s5404_s16, %s7120_s10  ;;  %p7128_p11 = scmp.lt.s32.totalorder %s7120_s10, %s7120_s10 }
 0xf19   : > { %p7122_p10 = pnand %p7121_p3, %p6581_p9  ;;  %p7129_p13 = por %p7128_p11, %p7127_p2 }
 0xf1b   : > { %p7123_p12 = pneg %p7122_p10 }
 0xf1d   : > { %p7130_p0 = pnand %p7129_p13, %p7123_p12 }
 0xf1f   : > { %7133 = shalt.err (!%p7130_p0)
}
 0xf20   : > { %s8503_s21 = sld [smem:[#allocation46_spill]] }
 0xf26   : > { %6535 = dma.vmem_to_hbm [thread:$0]  (%p6581_p9), %s5404_s16, 32, %s8503_s21, [#allocation5]  }
 0xf27   : > { %7181 = dma.done.wait (%p6581_p9), [#allocation5], 32  }
 0xf28   : > { %7183 = vsyncadd (%p6581_p9), [#allocation5], 4294967264 }
 0xf29 PF: > { %s8504_s21 = sld [smem:[#allocation27_spill]] }
 0xf2a   : > { %s8505_s0 = sld [smem:[#allocation24_spill]] }
 0xf2b   : > { %s8506_s30 = sld [smem:[#allocation25_spill]] }
 0xf2c   : > { %s8507_s20 = sld [smem:[#allocation28_spill]] }
 0xf2f   : > { %p30_p7 = scmp.ge.s32.totalorder %s8504_s21, 4  }
 0xf31   :  { %32 = sbr.rel (!%p30_p7) target bundleno = 24 (0x18), region = 225 }
 0xf36   :  { %5416 = vsyncpa [#allocation4], 1 }
 0xf37   :  { %5418 = vsyncpa [#allocation4 + $0x1], 1 }
 0xf38   :  { %5419 = vsyncpa [#allocation7], 1 }
 0xf39   :  { %5420 = vsyncpa [#allocation10], 1 }
 0xf3a   :  { %5421 = vsyncpa [#allocation5], 1 }
 0xf3b   :  { %5423 = vsyncpa [#allocation5 + $0x1], 1 }

</bundles_post_ra>
